<compile_context>
chip_gen: v7x
topology: tpu7x:2x2x1
jax: 0.10.0
libtpu: 0.0.40
codegen_flags: <defaults>
</compile_context>

<pallas_src>
import math

import jax
import jax.numpy as jnp
from jax.experimental import pallas as pl
from jax.experimental.pallas import tpu as pltpu

# ----------------------------- model dimensions ------------------------------
B, T, S = 2, 8, 16            # batch, target length, encoder (memory) length
V, D, H, F = 16, 32, 4, 64    # vocab_size, attention_dim, heads, linear_units
DK = D // H                   # per-head dim
L = 2                         # num_blocks (small for the demo)
BT, BS = B * T, B * S
EPS = 1e-5
NEG = -1e30                   # additive mask value (NaN-safe stand-in for -inf)
SCALE = 1.0 / math.sqrt(DK)


# ------------------------------ shared math -----------------------------------
def _layer_norm(x, g, b):
    mu = jnp.mean(x, axis=-1, keepdims=True)
    var = jnp.mean((x - mu) ** 2, axis=-1, keepdims=True)
    return (x - mu) * jax.lax.rsqrt(var + EPS) * g + b


def _attend(q, k, v, addmask):
    """q: (BT, D); k, v: (Nk, D); addmask: (BT, Nk) additive 0/NEG mask.

    Static per-head loop for scores/softmax/context (avoids in-kernel 3-D
    reshape/transpose); per-head contexts are concatenated along lanes so the
    output projection is ONE full-width matmul outside this function."""
    ctx = []
    for h in range(H):
        sl = slice(h * DK, (h + 1) * DK)
        s = jax.lax.dot_general(q[:, sl], k[:, sl], (((1,), (1,)), ((), ())),
                                preferred_element_type=jnp.float32)
        s = s * SCALE + addmask                          # (BT, Nk)
        m = jnp.max(s, axis=-1, keepdims=True)
        p = jnp.exp(s - m)
        denom = jnp.sum(p, axis=-1, keepdims=True)
        # approx=True (EUP) is a drop-in here; exact kept for the 1e-3 check.
        p = p * pl.reciprocal(denom, approx=False)
        ctx.append(jnp.dot(p, v[:, sl], preferred_element_type=jnp.float32))
    return jnp.concatenate(ctx, axis=-1)                 # (BT, D)


# ------------------------------ fused kernel -----------------------------------
def decoder_kernel(
        tgt_ref, mem_ref, smask_ref, xmask_ref,
        embw_ref, embb_ref, pe_ref,
        ln1g_ref, ln1b_ref, wqkv_ref, bqkv_ref, wo_ref, bo_ref,
        ln2g_ref, ln2b_ref, swq_ref, sbq_ref, swkv_ref, sbkv_ref, swo_ref, sbo_ref,
        ln3g_ref, ln3b_ref, w1_ref, b1_ref, w2_ref, b2_ref,
        afg_ref, afb_ref, outw_ref, outb_ref,
        out_ref):
    # --- embed: Linear(V -> D) + PositionalEncoding: x*sqrt(D) + pe ---
    x = jnp.dot(tgt_ref[...], embw_ref[...],
                preferred_element_type=jnp.float32) + embb_ref[...]
    x = x * math.sqrt(D) + pe_ref[...]                   # (BT, D)

    mem = mem_ref[...]                                   # (BS, D)
    smask = smask_ref[...]                               # (BT, BT) additive
    xmask = xmask_ref[...]                               # (BT, BS) additive

    for l in range(L):   # static unroll; all stacked weights are VMEM-resident
        # --- self attention (normalize_before=True) ---
        r = x
        xn = _layer_norm(x, ln1g_ref[l], ln1b_ref[l])
        qkv = jnp.dot(xn, wqkv_ref[l],
                      preferred_element_type=jnp.float32) + bqkv_ref[l]
        ctx = _attend(qkv[:, :D], qkv[:, D:2 * D], qkv[:, 2 * D:], smask)
        x = r + jnp.dot(ctx, wo_ref[l],
                        preferred_element_type=jnp.float32) + bo_ref[l]

        # --- encoder-decoder cross attention ---
        r = x
        xn = _layer_norm(x, ln2g_ref[l], ln2b_ref[l])
        q = jnp.dot(xn, swq_ref[l],
                    preferred_element_type=jnp.float32) + sbq_ref[l]
        kv = jnp.dot(mem, swkv_ref[l],
                     preferred_element_type=jnp.float32) + sbkv_ref[l]
        ctx = _attend(q, kv[:, :D], kv[:, D:], xmask)
        x = r + jnp.dot(ctx, swo_ref[l],
                        preferred_element_type=jnp.float32) + sbo_ref[l]

        # --- position-wise feed forward (ReLU) ---
        r = x
        xn = _layer_norm(x, ln3g_ref[l], ln3b_ref[l])
        hid = jnp.maximum(
            jnp.dot(xn, w1_ref[l], preferred_element_type=jnp.float32) + b1_ref[l],
            0.0)
        x = r + jnp.dot(hid, w2_ref[l],
                        preferred_element_type=jnp.float32) + b2_ref[l]

    # --- after_norm + output_layer ---
    xn = _layer_norm(x, afg_ref[...], afb_ref[...])
    out_ref[...] = jnp.dot(xn, outw_ref[...],
                           preferred_element_type=jnp.float32) + outb_ref[...]


# ------------------------------ wrapper helpers --------------------------------
def pack_params(params):
    """Stack per-layer weights along a leading layer axis and fuse QKV / KV."""
    ls = params["layers"]
    stack = lambda name: jnp.stack([lp[name] for lp in ls])
    return {
        "ln1_g": stack("ln1_g"), "ln1_b": stack("ln1_b"),
        "ln2_g": stack("ln2_g"), "ln2_b": stack("ln2_b"),
        "ln3_g": stack("ln3_g"), "ln3_b": stack("ln3_b"),
        "wqkv": jnp.stack([jnp.concatenate([lp["wq"], lp["wk"], lp["wv"]], -1) for lp in ls]),
        "bqkv": jnp.stack([jnp.concatenate([lp["bq"], lp["bk"], lp["bv"]], -1) for lp in ls]),
        "wo": stack("wo"), "bo": stack("bo"),
        "swq": stack("swq"), "sbq": stack("sbq"),
        "swkv": jnp.stack([jnp.concatenate([lp["swk"], lp["swv"]], -1) for lp in ls]),
        "sbkv": jnp.stack([jnp.concatenate([lp["sbk"], lp["sbv"]], -1) for lp in ls]),
        "swo": stack("swo"), "sbo": stack("sbo"),
        "w1": stack("w1"), "b1": stack("b1"),
        "w2": stack("w2"), "b2": stack("b2"),
    }


def build_additive_masks(ys_in_lens, memory_mask, epoch=101, change_epoch=100):
    """Block-diagonal additive masks so the whole batch runs as (B*T) rows.

    self:  (B*T, B*T)  — key padding (+ causal when epoch<=change_epoch)
                         AND cross-batch blocks masked out.
    cross: (B*T, B*S)  — memory padding AND cross-batch blocks masked out."""
    key_valid = jnp.arange(T)[None, :] < ys_in_lens[:, None]          # (B, T)
    tmask = jnp.broadcast_to(key_valid[:, None, :], (B, T, T))        # (B, T, T)
    if epoch <= change_epoch:
        tmask = tmask & jnp.tril(jnp.ones((T, T), bool))[None]
    eye = jnp.eye(B, dtype=bool)
    m4 = eye[:, None, :, None] & tmask[:, :, None, :]                 # (B,T,B,T)
    self_add = jnp.where(m4.reshape(BT, BT), 0.0, NEG).astype(jnp.float32)

    mvalid = memory_mask[:, 0, :] > 0.5                               # (B, S)
    c4 = eye[:, None, :, None] & mvalid[None, None, :, :]             # (B,1,B,S)
    c4 = jnp.broadcast_to(c4, (B, T, B, S))
    cross_add = jnp.where(c4.reshape(BT, BS), 0.0, NEG).astype(jnp.float32)
    return self_add, cross_add


def _flops_and_transcendentals():
    per_layer = (2 * BT * D * (3 * D)          # fused qkv
                 + 2 * BT * D * BT             # self scores (all heads)
                 + 2 * BT * BT * D             # self ctx
                 + 2 * BT * D * D              # self out proj
                 + 2 * BT * D * D              # cross q
                 + 2 * BS * D * (2 * D)        # fused cross kv
                 + 2 * BT * D * BS             # cross scores
                 + 2 * BT * BS * D             # cross ctx
                 + 2 * BT * D * D              # cross out proj
                 + 2 * BT * D * F              # ffn1
                 + 2 * BT * F * D)             # ffn2
    flops = 2 * BT * V * D + L * per_layer + 2 * BT * D * V
    trans = L * (BT * BT * H + BT * BS * H)    # exps
    return int(flops), int(trans)


def transformer_decoder_forward(params, memory, memory_mask, ys_in_pad, ys_in_lens,
                                epoch=101, change_epoch=100):
    """memory: (B, S, D); memory_mask: (B, 1, S) float {0,1};
    ys_in_pad: (B, T, V) float; ys_in_lens: (B,) int."""
    packed = pack_params(params)
    self_add, cross_add = build_additive_masks(ys_in_lens, memory_mask,
                                               epoch, change_epoch)
    # layout plumbing done wrapper-side: batch folded into rows
    tgt_flat = ys_in_pad.reshape(BT, V)
    mem_flat = memory.reshape(BS, D)
    pe_tiled = jnp.tile(params["pe"], (B, 1))                         # (BT, D)

    args = (tgt_flat, mem_flat, self_add, cross_add,
            params["embed_w"], params["embed_b"], pe_tiled,
            packed["ln1_g"], packed["ln1_b"], packed["wqkv"], packed["bqkv"],
            packed["wo"], packed["bo"],
            packed["ln2_g"], packed["ln2_b"], packed["swq"], packed["sbq"],
            packed["swkv"], packed["sbkv"], packed["swo"], packed["sbo"],
            packed["ln3_g"], packed["ln3_b"], packed["w1"], packed["b1"],
            packed["w2"], packed["b2"],
            params["after_g"], params["after_b"], params["out_w"], params["out_b"])

    flops, trans = _flops_and_transcendentals()
    bytes_accessed = sum(int(a.size) * 4 for a in args) + BT * V * 4

    logits_flat = pl.pallas_call(
        decoder_kernel,
        out_shape=jax.ShapeDtypeStruct((BT, V), jnp.float32),
        cost_estimate=pl.CostEstimate(flops=flops, transcendentals=trans,
                                      bytes_accessed=bytes_accessed),
        compiler_params=pltpu.CompilerParams(vmem_limit_bytes=64 * 1024 * 1024),
    )(*args)

    logits = logits_flat.reshape(B, T, V)
    olens = 1
    # TODO(synk): dropout is identity (inference); second return mirrors torch.tensor(0.0).
    return logits, jnp.float32(0.0), olens


# ------------------------------ parameter init ----------------------------------
def _linear_init(key, din, dout):
    k1, k2 = jax.random.split(key)
    bound = 1.0 / math.sqrt(din)
    w = jax.random.uniform(k1, (din, dout), jnp.float32, -bound, bound)
    b = jax.random.uniform(k2, (1, dout), jnp.float32, -bound, bound)
    return w, b


def _sinusoidal_pe(max_len, d_model):
    pos = jnp.arange(max_len, dtype=jnp.float32)[:, None]
    div = jnp.exp(jnp.arange(0, d_model, 2, dtype=jnp.float32)
                  * (-math.log(10000.0) / d_model))
    pe = jnp.zeros((max_len, d_model), jnp.float32)
    pe = pe.at[:, 0::2].set(jnp.sin(pos * div))
    pe = pe.at[:, 1::2].set(jnp.cos(pos * div))
    return pe


def init_params(key):
    keys = jax.random.split(key, 2 + L)
    params = {}
    params["embed_w"], params["embed_b"] = _linear_init(keys[0], V, D)
    params["pe"] = _sinusoidal_pe(T, D)
    params["after_g"] = jnp.ones((1, D), jnp.float32)
    params["after_b"] = jnp.zeros((1, D), jnp.float32)
    params["out_w"], params["out_b"] = _linear_init(keys[1], D, V)

    layers = []
    for i in range(L):
        lk = jax.random.split(keys[2 + i], 10)
        lp = {
            "ln1_g": jnp.ones((1, D), jnp.float32), "ln1_b": jnp.zeros((1, D), jnp.float32),
            "ln2_g": jnp.ones((1, D), jnp.float32), "ln2_b": jnp.zeros((1, D), jnp.float32),
            "ln3_g": jnp.ones((1, D), jnp.float32), "ln3_b": jnp.zeros((1, D), jnp.float32),
        }
        lp["wq"], lp["bq"] = _linear_init(lk[0], D, D)
        lp["wk"], lp["bk"] = _linear_init(lk[1], D, D)
        lp["wv"], lp["bv"] = _linear_init(lk[2], D, D)
        lp["wo"], lp["bo"] = _linear_init(lk[3], D, D)
        lp["swq"], lp["sbq"] = _linear_init(lk[4], D, D)
        lp["swk"], lp["sbk"] = _linear_init(lk[5], D, D)
        lp["swv"], lp["sbv"] = _linear_init(lk[6], D, D)
        lp["swo"], lp["sbo"] = _linear_init(lk[7], D, D)
        lp["w1"], lp["b1"] = _linear_init(lk[8], D, F)
        lp["w2"], lp["b2"] = _linear_init(lk[9], F, D)
        layers.append(lp)
    params["layers"] = layers
    return params


# ------------------------------ pure-JAX reference --------------------------------
def _ref_mha(q_in, kv_in, mask, wq, bq, wk, bk, wv, bv, wo, bo):
    q = q_in @ wq + bq
    k = kv_in @ wk + bk
    v = kv_in @ wv + bv
    tq, tk = q_in.shape[0], kv_in.shape[0]
    qh = q.reshape(tq, H, DK).transpose(1, 0, 2)
    kh = k.reshape(tk, H, DK).transpose(1, 0, 2)
    vh = v.reshape(tk, H, DK).transpose(1, 0, 2)
    scores = jnp.einsum("hqd,hkd->hqk", qh, kh) / math.sqrt(DK)
    scores = jnp.where(mask[None], scores, -jnp.inf)
    attn = jax.nn.softmax(scores, axis=-1)
    ctx = jnp.einsum("hqk,hkd->hqd", attn, vh).transpose(1, 0, 2).reshape(tq, D)
    return ctx @ wo + bo


def reference_forward(params, memory, memory_mask, ys_in_pad, ys_in_lens,
                      epoch=101, change_epoch=100):
    key_valid = jnp.arange(T)[None, :] < ys_in_lens[:, None]          # (B, T)
    tmask_all = jnp.broadcast_to(key_valid[:, None, :], (B, T, T))
    if epoch <= change_epoch:
        tmask_all = tmask_all & jnp.tril(jnp.ones((T, T), bool))[None]
    outs = []
    for b in range(B):
        x = jnp.dot(ys_in_pad[b], params["embed_w"]) + params["embed_b"]
        x = x * math.sqrt(D) + params["pe"]
        tmask = tmask_all[b]
        mmask = memory_mask[b] > 0.5
        mem = memory[b]
        for lp in params["layers"]:
            r = x
            xn = _layer_norm(x, lp["ln1_g"], lp["ln1_b"])
            x = r + _ref_mha(xn, xn, tmask, lp["wq"], lp["bq"], lp["wk"], lp["bk"],
                             lp["wv"], lp["bv"], lp["wo"], lp["bo"])
            r = x
            xn = _layer_norm(x, lp["ln2_g"], lp["ln2_b"])
            x = r + _ref_mha(xn, mem, mmask, lp["swq"], lp["sbq"], lp["swk"], lp["sbk"],
                             lp["swv"], lp["sbv"], lp["swo"], lp["sbo"])
            r = x
            xn = _layer_norm(x, lp["ln3_g"], lp["ln3_b"])
            hid = jnp.maximum(jnp.dot(xn, lp["w1"]) + lp["b1"], 0.0)
            x = r + jnp.dot(hid, lp["w2"]) + lp["b2"]
        x = _layer_norm(x, params["after_g"], params["after_b"])
        x = jnp.dot(x, params["out_w"]) + params["out_b"]
        outs.append(x)
    return jnp.stack(outs)


# ----------------------------------- main -----------------------------------------
if __name__ == "__main__":
    key = jax.random.PRNGKey(0)
    kp, kt, km = jax.random.split(key, 3)

    params = init_params(kp)
    ys_in_pad = jax.random.normal(kt, (B, T, V), jnp.float32)   # continuous "token" feats
    memory = jax.random.normal(km, (B, S, D), jnp.float32)
    ys_in_lens = jnp.array([T, 5], jnp.int32)
    mem_lens = jnp.array([S, 12], jnp.int32)
    memory_mask = (jnp.arange(S)[None, :] < mem_lens[:, None])[:, None, :].astype(jnp.float32)

    logits, zero, olens = transformer_decoder_forward(
        params, memory, memory_mask, ys_in_pad, ys_in_lens)
    logits = jax.block_until_ready(logits)

    assert logits.shape == (B, T, V), logits.shape
    ref = reference_forward(params, memory, memory_mask, ys_in_pad, ys_in_lens)
    max_err = float(jnp.max(jnp.abs(logits - ref)))
    assert jnp.allclose(logits, ref, atol=1e-3, rtol=1e-3), f"max_err={max_err}"

    print("KERNEL_OK")
</pallas_src>

<mosaic_0001>
module attributes {stable_mosaic.version = 11 : i64} {
  func.func @decoder_kernel(%arg0: memref<16x16xf32, #tpu.memory_space<vmem>>, %arg1: memref<32x32xf32, #tpu.memory_space<vmem>>, %arg2: memref<16x16xf32, #tpu.memory_space<vmem>>, %arg3: memref<16x32xf32, #tpu.memory_space<vmem>>, %arg4: memref<16x32xf32, #tpu.memory_space<vmem>>, %arg5: memref<1x32xf32, #tpu.memory_space<vmem>>, %arg6: memref<16x32xf32, #tpu.memory_space<vmem>>, %arg7: memref<2x1x32xf32, #tpu.memory_space<vmem>>, %arg8: memref<2x1x32xf32, #tpu.memory_space<vmem>>, %arg9: memref<2x32x96xf32, #tpu.memory_space<vmem>>, %arg10: memref<2x1x96xf32, #tpu.memory_space<vmem>>, %arg11: memref<2x32x32xf32, #tpu.memory_space<vmem>>, %arg12: memref<2x1x32xf32, #tpu.memory_space<vmem>>, %arg13: memref<2x1x32xf32, #tpu.memory_space<vmem>>, %arg14: memref<2x1x32xf32, #tpu.memory_space<vmem>>, %arg15: memref<2x32x32xf32, #tpu.memory_space<vmem>>, %arg16: memref<2x1x32xf32, #tpu.memory_space<vmem>>, %arg17: memref<2x32x64xf32, #tpu.memory_space<vmem>>, %arg18: memref<2x1x64xf32, #tpu.memory_space<vmem>>, %arg19: memref<2x32x32xf32, #tpu.memory_space<vmem>>, %arg20: memref<2x1x32xf32, #tpu.memory_space<vmem>>, %arg21: memref<2x1x32xf32, #tpu.memory_space<vmem>>, %arg22: memref<2x1x32xf32, #tpu.memory_space<vmem>>, %arg23: memref<2x32x64xf32, #tpu.memory_space<vmem>>, %arg24: memref<2x1x64xf32, #tpu.memory_space<vmem>>, %arg25: memref<2x64x32xf32, #tpu.memory_space<vmem>>, %arg26: memref<2x1x32xf32, #tpu.memory_space<vmem>>, %arg27: memref<1x32xf32, #tpu.memory_space<vmem>>, %arg28: memref<1x32xf32, #tpu.memory_space<vmem>>, %arg29: memref<32x16xf32, #tpu.memory_space<vmem>>, %arg30: memref<1x16xf32, #tpu.memory_space<vmem>>, %arg31: memref<16x16xf32, #tpu.memory_space<vmem>>) attributes {dimension_semantics = [], scalar_prefetch = 0 : i64, scratch_operands = 0 : i64, tpu.core_type = #tpu.core_type<tc>} {
    %c0 = arith.constant 0 : index
    %c0_0 = arith.constant 0 : index
    %0 = vector.load %arg0[%c0, %c0_0] : memref<16x16xf32, #tpu.memory_space<vmem>>, vector<16x16xf32>
    %c0_1 = arith.constant 0 : index
    %c0_2 = arith.constant 0 : index
    %1 = vector.load %arg4[%c0_1, %c0_2] : memref<16x32xf32, #tpu.memory_space<vmem>>, vector<16x32xf32>
    %cst = arith.constant dense<0.000000e+00> : vector<16x32xf32>
    %2 = tpu.matmul %0, %1, %cst {dimension_numbers = #tpu.dot_dimension_numbers<[1], [0], [0], [1], [0, 0, 1, 1], [], []>} : vector<16x16xf32>, vector<16x32xf32>, vector<16x32xf32> -> vector<16x32xf32>
    %c0_3 = arith.constant 0 : index
    %c0_4 = arith.constant 0 : index
    %3 = vector.load %arg5[%c0_3, %c0_4] : memref<1x32xf32, #tpu.memory_space<vmem>>, vector<1x32xf32>
    %4 = vector.broadcast %3 : vector<1x32xf32> to vector<16x32xf32>
    %5 = arith.addf %2, %4 : vector<16x32xf32>
    %cst_5 = arith.constant 5.65685415 : f32
    %6 = vector.broadcast %cst_5 : f32 to vector<16x32xf32>
    %7 = arith.mulf %5, %6 : vector<16x32xf32>
    %c0_6 = arith.constant 0 : index
    %c0_7 = arith.constant 0 : index
    %8 = vector.load %arg6[%c0_6, %c0_7] : memref<16x32xf32, #tpu.memory_space<vmem>>, vector<16x32xf32>
    %9 = arith.addf %7, %8 : vector<16x32xf32>
    %c0_8 = arith.constant 0 : index
    %c0_9 = arith.constant 0 : index
    %10 = vector.load %arg1[%c0_8, %c0_9] : memref<32x32xf32, #tpu.memory_space<vmem>>, vector<32x32xf32>
    %c0_10 = arith.constant 0 : index
    %c0_11 = arith.constant 0 : index
    %11 = vector.load %arg2[%c0_10, %c0_11] : memref<16x16xf32, #tpu.memory_space<vmem>>, vector<16x16xf32>
    %c0_12 = arith.constant 0 : index
    %c0_13 = arith.constant 0 : index
    %12 = vector.load %arg3[%c0_12, %c0_13] : memref<16x32xf32, #tpu.memory_space<vmem>>, vector<16x32xf32>
    %c0_14 = arith.constant 0 : index
    %c0_15 = arith.constant 0 : index
    %c0_16 = arith.constant 0 : index
    %13 = vector.load %arg7[%c0_14, %c0_15, %c0_16] : memref<2x1x32xf32, #tpu.memory_space<vmem>>, vector<1x1x32xf32>
    %14 = vector.shape_cast %13 : vector<1x1x32xf32> to vector<1x32xf32>
    %c0_17 = arith.constant 0 : index
    %c0_18 = arith.constant 0 : index
    %c0_19 = arith.constant 0 : index
    %15 = vector.load %arg8[%c0_17, %c0_18, %c0_19] : memref<2x1x32xf32, #tpu.memory_space<vmem>>, vector<1x1x32xf32>
    %16 = vector.shape_cast %15 : vector<1x1x32xf32> to vector<1x32xf32>
    %cst_20 = arith.constant dense<0.000000e+00> : vector<16xf32>
    %17 = vector.multi_reduction <add>, %9, %cst_20 [1] : vector<16x32xf32> to vector<16xf32>
    %18 = vector.shape_cast %17 : vector<16xf32> to vector<16x1xf32>
    %cst_21 = arith.constant 3.200000e+01 : f32
    %19 = vector.broadcast %cst_21 : f32 to vector<16x1xf32>
    %20 = arith.divf %18, %19 : vector<16x1xf32>
    %21 = vector.broadcast %20 : vector<16x1xf32> to vector<16x32xf32>
    %22 = arith.subf %9, %21 : vector<16x32xf32>
    %23 = arith.mulf %22, %22 : vector<16x32xf32>
    %cst_22 = arith.constant dense<0.000000e+00> : vector<16xf32>
    %24 = vector.multi_reduction <add>, %23, %cst_22 [1] : vector<16x32xf32> to vector<16xf32>
    %25 = vector.shape_cast %24 : vector<16xf32> to vector<16x1xf32>
    %cst_23 = arith.constant 3.200000e+01 : f32
    %26 = vector.broadcast %cst_23 : f32 to vector<16x1xf32>
    %27 = arith.divf %25, %26 : vector<16x1xf32>
    %28 = vector.broadcast %20 : vector<16x1xf32> to vector<16x32xf32>
    %29 = arith.subf %9, %28 : vector<16x32xf32>
    %cst_24 = arith.constant 9.99999974E-6 : f32
    %30 = vector.broadcast %cst_24 : f32 to vector<16x1xf32>
    %31 = arith.addf %27, %30 : vector<16x1xf32>
    %32 = math.rsqrt %31 : vector<16x1xf32>
    %33 = vector.broadcast %32 : vector<16x1xf32> to vector<16x32xf32>
    %34 = arith.mulf %29, %33 : vector<16x32xf32>
    %35 = vector.broadcast %14 : vector<1x32xf32> to vector<16x32xf32>
    %36 = arith.mulf %34, %35 : vector<16x32xf32>
    %37 = vector.broadcast %16 : vector<1x32xf32> to vector<16x32xf32>
    %38 = arith.addf %36, %37 : vector<16x32xf32>
    %c0_25 = arith.constant 0 : index
    %c0_26 = arith.constant 0 : index
    %c0_27 = arith.constant 0 : index
    %39 = vector.load %arg9[%c0_25, %c0_26, %c0_27] : memref<2x32x96xf32, #tpu.memory_space<vmem>>, vector<1x32x96xf32>
    %40 = vector.shape_cast %39 : vector<1x32x96xf32> to vector<32x96xf32>
    %cst_28 = arith.constant dense<0.000000e+00> : vector<16x96xf32>
    %41 = tpu.matmul %38, %40, %cst_28 {dimension_numbers = #tpu.dot_dimension_numbers<[1], [0], [0], [1], [0, 0, 1, 1], [], []>} : vector<16x32xf32>, vector<32x96xf32>, vector<16x96xf32> -> vector<16x96xf32>
    %c0_29 = arith.constant 0 : index
    %c0_30 = arith.constant 0 : index
    %c0_31 = arith.constant 0 : index
    %42 = vector.load %arg10[%c0_29, %c0_30, %c0_31] : memref<2x1x96xf32, #tpu.memory_space<vmem>>, vector<1x1x96xf32>
    %43 = vector.shape_cast %42 : vector<1x1x96xf32> to vector<1x96xf32>
    %44 = vector.broadcast %43 : vector<1x96xf32> to vector<16x96xf32>
    %45 = arith.addf %41, %44 : vector<16x96xf32>
    %46 = vector.extract_strided_slice %45 {offsets = [0, 0], sizes = [16, 32], strides = [1, 1]} : vector<16x96xf32> to vector<16x32xf32>
    %47 = vector.extract_strided_slice %45 {offsets = [0, 32], sizes = [16, 32], strides = [1, 1]} : vector<16x96xf32> to vector<16x32xf32>
    %48 = vector.extract_strided_slice %45 {offsets = [0, 64], sizes = [16, 32], strides = [1, 1]} : vector<16x96xf32> to vector<16x32xf32>
    %49 = vector.extract_strided_slice %46 {offsets = [0, 0], sizes = [16, 8], strides = [1, 1]} : vector<16x32xf32> to vector<16x8xf32>
    %50 = vector.extract_strided_slice %47 {offsets = [0, 0], sizes = [16, 8], strides = [1, 1]} : vector<16x32xf32> to vector<16x8xf32>
    %cst_32 = arith.constant dense<0.000000e+00> : vector<16x16xf32>
    %51 = tpu.matmul %49, %50, %cst_32 {dimension_numbers = #tpu.dot_dimension_numbers<[1], [1], [0], [0], [0, 0, 1, 0], [], []>} : vector<16x8xf32>, vector<16x8xf32>, vector<16x16xf32> -> vector<16x16xf32>
    %cst_33 = arith.constant 0.353553385 : f32
    %52 = vector.broadcast %cst_33 : f32 to vector<16x16xf32>
    %53 = arith.mulf %51, %52 : vector<16x16xf32>
    %54 = arith.addf %53, %11 : vector<16x16xf32>
    %cst_34 = arith.constant dense<0xFF800000> : vector<16xf32>
    %55 = vector.multi_reduction <maximumf>, %54, %cst_34 [1] : vector<16x16xf32> to vector<16xf32>
    %56 = vector.shape_cast %55 : vector<16xf32> to vector<16x1xf32>
    %57 = vector.broadcast %56 : vector<16x1xf32> to vector<16x16xf32>
    %58 = arith.subf %54, %57 : vector<16x16xf32>
    %59 = math.exp %58 : vector<16x16xf32>
    %cst_35 = arith.constant dense<0.000000e+00> : vector<16xf32>
    %60 = vector.multi_reduction <add>, %59, %cst_35 [1] : vector<16x16xf32> to vector<16xf32>
    %61 = vector.shape_cast %60 : vector<16xf32> to vector<16x1xf32>
    %62 = tpu.reciprocal %61 : vector<16x1xf32> -> vector<16x1xf32>
    %63 = vector.broadcast %62 : vector<16x1xf32> to vector<16x16xf32>
    %64 = arith.mulf %59, %63 : vector<16x16xf32>
    %65 = vector.extract_strided_slice %48 {offsets = [0, 0], sizes = [16, 8], strides = [1, 1]} : vector<16x32xf32> to vector<16x8xf32>
    %cst_36 = arith.constant dense<0.000000e+00> : vector<16x8xf32>
    %66 = tpu.matmul %64, %65, %cst_36 {dimension_numbers = #tpu.dot_dimension_numbers<[1], [0], [0], [1], [0, 0, 1, 1], [], []>} : vector<16x16xf32>, vector<16x8xf32>, vector<16x8xf32> -> vector<16x8xf32>
    %67 = vector.extract_strided_slice %46 {offsets = [0, 8], sizes = [16, 8], strides = [1, 1]} : vector<16x32xf32> to vector<16x8xf32>
    %68 = vector.extract_strided_slice %47 {offsets = [0, 8], sizes = [16, 8], strides = [1, 1]} : vector<16x32xf32> to vector<16x8xf32>
    %cst_37 = arith.constant dense<0.000000e+00> : vector<16x16xf32>
    %69 = tpu.matmul %67, %68, %cst_37 {dimension_numbers = #tpu.dot_dimension_numbers<[1], [1], [0], [0], [0, 0, 1, 0], [], []>} : vector<16x8xf32>, vector<16x8xf32>, vector<16x16xf32> -> vector<16x16xf32>
    %cst_38 = arith.constant 0.353553385 : f32
    %70 = vector.broadcast %cst_38 : f32 to vector<16x16xf32>
    %71 = arith.mulf %69, %70 : vector<16x16xf32>
    %72 = arith.addf %71, %11 : vector<16x16xf32>
    %cst_39 = arith.constant dense<0xFF800000> : vector<16xf32>
    %73 = vector.multi_reduction <maximumf>, %72, %cst_39 [1] : vector<16x16xf32> to vector<16xf32>
    %74 = vector.shape_cast %73 : vector<16xf32> to vector<16x1xf32>
    %75 = vector.broadcast %74 : vector<16x1xf32> to vector<16x16xf32>
    %76 = arith.subf %72, %75 : vector<16x16xf32>
    %77 = math.exp %76 : vector<16x16xf32>
    %cst_40 = arith.constant dense<0.000000e+00> : vector<16xf32>
    %78 = vector.multi_reduction <add>, %77, %cst_40 [1] : vector<16x16xf32> to vector<16xf32>
    %79 = vector.shape_cast %78 : vector<16xf32> to vector<16x1xf32>
    %80 = tpu.reciprocal %79 : vector<16x1xf32> -> vector<16x1xf32>
    %81 = vector.broadcast %80 : vector<16x1xf32> to vector<16x16xf32>
    %82 = arith.mulf %77, %81 : vector<16x16xf32>
    %83 = vector.extract_strided_slice %48 {offsets = [0, 8], sizes = [16, 8], strides = [1, 1]} : vector<16x32xf32> to vector<16x8xf32>
    %cst_41 = arith.constant dense<0.000000e+00> : vector<16x8xf32>
    %84 = tpu.matmul %82, %83, %cst_41 {dimension_numbers = #tpu.dot_dimension_numbers<[1], [0], [0], [1], [0, 0, 1, 1], [], []>} : vector<16x16xf32>, vector<16x8xf32>, vector<16x8xf32> -> vector<16x8xf32>
    %85 = vector.extract_strided_slice %46 {offsets = [0, 16], sizes = [16, 8], strides = [1, 1]} : vector<16x32xf32> to vector<16x8xf32>
    %86 = vector.extract_strided_slice %47 {offsets = [0, 16], sizes = [16, 8], strides = [1, 1]} : vector<16x32xf32> to vector<16x8xf32>
    %cst_42 = arith.constant dense<0.000000e+00> : vector<16x16xf32>
    %87 = tpu.matmul %85, %86, %cst_42 {dimension_numbers = #tpu.dot_dimension_numbers<[1], [1], [0], [0], [0, 0, 1, 0], [], []>} : vector<16x8xf32>, vector<16x8xf32>, vector<16x16xf32> -> vector<16x16xf32>
    %cst_43 = arith.constant 0.353553385 : f32
    %88 = vector.broadcast %cst_43 : f32 to vector<16x16xf32>
    %89 = arith.mulf %87, %88 : vector<16x16xf32>
    %90 = arith.addf %89, %11 : vector<16x16xf32>
    %cst_44 = arith.constant dense<0xFF800000> : vector<16xf32>
    %91 = vector.multi_reduction <maximumf>, %90, %cst_44 [1] : vector<16x16xf32> to vector<16xf32>
    %92 = vector.shape_cast %91 : vector<16xf32> to vector<16x1xf32>
    %93 = vector.broadcast %92 : vector<16x1xf32> to vector<16x16xf32>
    %94 = arith.subf %90, %93 : vector<16x16xf32>
    %95 = math.exp %94 : vector<16x16xf32>
    %cst_45 = arith.constant dense<0.000000e+00> : vector<16xf32>
    %96 = vector.multi_reduction <add>, %95, %cst_45 [1] : vector<16x16xf32> to vector<16xf32>
    %97 = vector.shape_cast %96 : vector<16xf32> to vector<16x1xf32>
    %98 = tpu.reciprocal %97 : vector<16x1xf32> -> vector<16x1xf32>
    %99 = vector.broadcast %98 : vector<16x1xf32> to vector<16x16xf32>
    %100 = arith.mulf %95, %99 : vector<16x16xf32>
    %101 = vector.extract_strided_slice %48 {offsets = [0, 16], sizes = [16, 8], strides = [1, 1]} : vector<16x32xf32> to vector<16x8xf32>
    %cst_46 = arith.constant dense<0.000000e+00> : vector<16x8xf32>
    %102 = tpu.matmul %100, %101, %cst_46 {dimension_numbers = #tpu.dot_dimension_numbers<[1], [0], [0], [1], [0, 0, 1, 1], [], []>} : vector<16x16xf32>, vector<16x8xf32>, vector<16x8xf32> -> vector<16x8xf32>
    %103 = vector.extract_strided_slice %46 {offsets = [0, 24], sizes = [16, 8], strides = [1, 1]} : vector<16x32xf32> to vector<16x8xf32>
    %104 = vector.extract_strided_slice %47 {offsets = [0, 24], sizes = [16, 8], strides = [1, 1]} : vector<16x32xf32> to vector<16x8xf32>
    %cst_47 = arith.constant dense<0.000000e+00> : vector<16x16xf32>
    %105 = tpu.matmul %103, %104, %cst_47 {dimension_numbers = #tpu.dot_dimension_numbers<[1], [1], [0], [0], [0, 0, 1, 0], [], []>} : vector<16x8xf32>, vector<16x8xf32>, vector<16x16xf32> -> vector<16x16xf32>
    %cst_48 = arith.constant 0.353553385 : f32
    %106 = vector.broadcast %cst_48 : f32 to vector<16x16xf32>
    %107 = arith.mulf %105, %106 : vector<16x16xf32>
    %108 = arith.addf %107, %11 : vector<16x16xf32>
    %cst_49 = arith.constant dense<0xFF800000> : vector<16xf32>
    %109 = vector.multi_reduction <maximumf>, %108, %cst_49 [1] : vector<16x16xf32> to vector<16xf32>
    %110 = vector.shape_cast %109 : vector<16xf32> to vector<16x1xf32>
    %111 = vector.broadcast %110 : vector<16x1xf32> to vector<16x16xf32>
    %112 = arith.subf %108, %111 : vector<16x16xf32>
    %113 = math.exp %112 : vector<16x16xf32>
    %cst_50 = arith.constant dense<0.000000e+00> : vector<16xf32>
    %114 = vector.multi_reduction <add>, %113, %cst_50 [1] : vector<16x16xf32> to vector<16xf32>
    %115 = vector.shape_cast %114 : vector<16xf32> to vector<16x1xf32>
    %116 = tpu.reciprocal %115 : vector<16x1xf32> -> vector<16x1xf32>
    %117 = vector.broadcast %116 : vector<16x1xf32> to vector<16x16xf32>
    %118 = arith.mulf %113, %117 : vector<16x16xf32>
    %119 = vector.extract_strided_slice %48 {offsets = [0, 24], sizes = [16, 8], strides = [1, 1]} : vector<16x32xf32> to vector<16x8xf32>
    %cst_51 = arith.constant dense<0.000000e+00> : vector<16x8xf32>
    %120 = tpu.matmul %118, %119, %cst_51 {dimension_numbers = #tpu.dot_dimension_numbers<[1], [0], [0], [1], [0, 0, 1, 1], [], []>} : vector<16x16xf32>, vector<16x8xf32>, vector<16x8xf32> -> vector<16x8xf32>
    %121 = tpu.concatenate %66, %84, %102, %120 in 1 : vector<16x8xf32>, vector<16x8xf32>, vector<16x8xf32>, vector<16x8xf32> -> vector<16x32xf32>
    %c0_52 = arith.constant 0 : index
    %c0_53 = arith.constant 0 : index
    %c0_54 = arith.constant 0 : index
    %122 = vector.load %arg11[%c0_52, %c0_53, %c0_54] : memref<2x32x32xf32, #tpu.memory_space<vmem>>, vector<1x32x32xf32>
    %123 = vector.shape_cast %122 : vector<1x32x32xf32> to vector<32x32xf32>
    %cst_55 = arith.constant dense<0.000000e+00> : vector<16x32xf32>
    %124 = tpu.matmul %121, %123, %cst_55 {dimension_numbers = #tpu.dot_dimension_numbers<[1], [0], [0], [1], [0, 0, 1, 1], [], []>} : vector<16x32xf32>, vector<32x32xf32>, vector<16x32xf32> -> vector<16x32xf32>
    %125 = arith.addf %9, %124 : vector<16x32xf32>
    %c0_56 = arith.constant 0 : index
    %c0_57 = arith.constant 0 : index
    %c0_58 = arith.constant 0 : index
    %126 = vector.load %arg12[%c0_56, %c0_57, %c0_58] : memref<2x1x32xf32, #tpu.memory_space<vmem>>, vector<1x1x32xf32>
    %127 = vector.shape_cast %126 : vector<1x1x32xf32> to vector<1x32xf32>
    %128 = vector.broadcast %127 : vector<1x32xf32> to vector<16x32xf32>
    %129 = arith.addf %125, %128 : vector<16x32xf32>
    %c0_59 = arith.constant 0 : index
    %c0_60 = arith.constant 0 : index
    %c0_61 = arith.constant 0 : index
    %130 = vector.load %arg13[%c0_59, %c0_60, %c0_61] : memref<2x1x32xf32, #tpu.memory_space<vmem>>, vector<1x1x32xf32>
    %131 = vector.shape_cast %130 : vector<1x1x32xf32> to vector<1x32xf32>
    %c0_62 = arith.constant 0 : index
    %c0_63 = arith.constant 0 : index
    %c0_64 = arith.constant 0 : index
    %132 = vector.load %arg14[%c0_62, %c0_63, %c0_64] : memref<2x1x32xf32, #tpu.memory_space<vmem>>, vector<1x1x32xf32>
    %133 = vector.shape_cast %132 : vector<1x1x32xf32> to vector<1x32xf32>
    %cst_65 = arith.constant dense<0.000000e+00> : vector<16xf32>
    %134 = vector.multi_reduction <add>, %129, %cst_65 [1] : vector<16x32xf32> to vector<16xf32>
    %135 = vector.shape_cast %134 : vector<16xf32> to vector<16x1xf32>
    %cst_66 = arith.constant 3.200000e+01 : f32
    %136 = vector.broadcast %cst_66 : f32 to vector<16x1xf32>
    %137 = arith.divf %135, %136 : vector<16x1xf32>
    %138 = vector.broadcast %137 : vector<16x1xf32> to vector<16x32xf32>
    %139 = arith.subf %129, %138 : vector<16x32xf32>
    %140 = arith.mulf %139, %139 : vector<16x32xf32>
    %cst_67 = arith.constant dense<0.000000e+00> : vector<16xf32>
    %141 = vector.multi_reduction <add>, %140, %cst_67 [1] : vector<16x32xf32> to vector<16xf32>
    %142 = vector.shape_cast %141 : vector<16xf32> to vector<16x1xf32>
    %cst_68 = arith.constant 3.200000e+01 : f32
    %143 = vector.broadcast %cst_68 : f32 to vector<16x1xf32>
    %144 = arith.divf %142, %143 : vector<16x1xf32>
    %145 = vector.broadcast %137 : vector<16x1xf32> to vector<16x32xf32>
    %146 = arith.subf %129, %145 : vector<16x32xf32>
    %cst_69 = arith.constant 9.99999974E-6 : f32
    %147 = vector.broadcast %cst_69 : f32 to vector<16x1xf32>
    %148 = arith.addf %144, %147 : vector<16x1xf32>
    %149 = math.rsqrt %148 : vector<16x1xf32>
    %150 = vector.broadcast %149 : vector<16x1xf32> to vector<16x32xf32>
    %151 = arith.mulf %146, %150 : vector<16x32xf32>
    %152 = vector.broadcast %131 : vector<1x32xf32> to vector<16x32xf32>
    %153 = arith.mulf %151, %152 : vector<16x32xf32>
    %154 = vector.broadcast %133 : vector<1x32xf32> to vector<16x32xf32>
    %155 = arith.addf %153, %154 : vector<16x32xf32>
    %c0_70 = arith.constant 0 : index
    %c0_71 = arith.constant 0 : index
    %c0_72 = arith.constant 0 : index
    %156 = vector.load %arg15[%c0_70, %c0_71, %c0_72] : memref<2x32x32xf32, #tpu.memory_space<vmem>>, vector<1x32x32xf32>
    %157 = vector.shape_cast %156 : vector<1x32x32xf32> to vector<32x32xf32>
    %cst_73 = arith.constant dense<0.000000e+00> : vector<16x32xf32>
    %158 = tpu.matmul %155, %157, %cst_73 {dimension_numbers = #tpu.dot_dimension_numbers<[1], [0], [0], [1], [0, 0, 1, 1], [], []>} : vector<16x32xf32>, vector<32x32xf32>, vector<16x32xf32> -> vector<16x32xf32>
    %c0_74 = arith.constant 0 : index
    %c0_75 = arith.constant 0 : index
    %c0_76 = arith.constant 0 : index
    %159 = vector.load %arg16[%c0_74, %c0_75, %c0_76] : memref<2x1x32xf32, #tpu.memory_space<vmem>>, vector<1x1x32xf32>
    %160 = vector.shape_cast %159 : vector<1x1x32xf32> to vector<1x32xf32>
    %161 = vector.broadcast %160 : vector<1x32xf32> to vector<16x32xf32>
    %162 = arith.addf %158, %161 : vector<16x32xf32>
    %c0_77 = arith.constant 0 : index
    %c0_78 = arith.constant 0 : index
    %c0_79 = arith.constant 0 : index
    %163 = vector.load %arg17[%c0_77, %c0_78, %c0_79] : memref<2x32x64xf32, #tpu.memory_space<vmem>>, vector<1x32x64xf32>
    %164 = vector.shape_cast %163 : vector<1x32x64xf32> to vector<32x64xf32>
    %cst_80 = arith.constant dense<0.000000e+00> : vector<32x64xf32>
    %165 = tpu.matmul %10, %164, %cst_80 {dimension_numbers = #tpu.dot_dimension_numbers<[1], [0], [0], [1], [0, 0, 1, 1], [], []>} : vector<32x32xf32>, vector<32x64xf32>, vector<32x64xf32> -> vector<32x64xf32>
    %c0_81 = arith.constant 0 : index
    %c0_82 = arith.constant 0 : index
    %c0_83 = arith.constant 0 : index
    %166 = vector.load %arg18[%c0_81, %c0_82, %c0_83] : memref<2x1x64xf32, #tpu.memory_space<vmem>>, vector<1x1x64xf32>
    %167 = vector.shape_cast %166 : vector<1x1x64xf32> to vector<1x64xf32>
    %168 = vector.broadcast %167 : vector<1x64xf32> to vector<32x64xf32>
    %169 = arith.addf %165, %168 : vector<32x64xf32>
    %170 = vector.extract_strided_slice %169 {offsets = [0, 0], sizes = [32, 32], strides = [1, 1]} : vector<32x64xf32> to vector<32x32xf32>
    %171 = vector.extract_strided_slice %169 {offsets = [0, 32], sizes = [32, 32], strides = [1, 1]} : vector<32x64xf32> to vector<32x32xf32>
    %172 = vector.extract_strided_slice %162 {offsets = [0, 0], sizes = [16, 8], strides = [1, 1]} : vector<16x32xf32> to vector<16x8xf32>
    %173 = vector.extract_strided_slice %170 {offsets = [0, 0], sizes = [32, 8], strides = [1, 1]} : vector<32x32xf32> to vector<32x8xf32>
    %cst_84 = arith.constant dense<0.000000e+00> : vector<16x32xf32>
    %174 = tpu.matmul %172, %173, %cst_84 {dimension_numbers = #tpu.dot_dimension_numbers<[1], [1], [0], [0], [0, 0, 1, 0], [], []>} : vector<16x8xf32>, vector<32x8xf32>, vector<16x32xf32> -> vector<16x32xf32>
    %cst_85 = arith.constant 0.353553385 : f32
    %175 = vector.broadcast %cst_85 : f32 to vector<16x32xf32>
    %176 = arith.mulf %174, %175 : vector<16x32xf32>
    %177 = arith.addf %176, %12 : vector<16x32xf32>
    %cst_86 = arith.constant dense<0xFF800000> : vector<16xf32>
    %178 = vector.multi_reduction <maximumf>, %177, %cst_86 [1] : vector<16x32xf32> to vector<16xf32>
    %179 = vector.shape_cast %178 : vector<16xf32> to vector<16x1xf32>
    %180 = vector.broadcast %179 : vector<16x1xf32> to vector<16x32xf32>
    %181 = arith.subf %177, %180 : vector<16x32xf32>
    %182 = math.exp %181 : vector<16x32xf32>
    %cst_87 = arith.constant dense<0.000000e+00> : vector<16xf32>
    %183 = vector.multi_reduction <add>, %182, %cst_87 [1] : vector<16x32xf32> to vector<16xf32>
    %184 = vector.shape_cast %183 : vector<16xf32> to vector<16x1xf32>
    %185 = tpu.reciprocal %184 : vector<16x1xf32> -> vector<16x1xf32>
    %186 = vector.broadcast %185 : vector<16x1xf32> to vector<16x32xf32>
    %187 = arith.mulf %182, %186 : vector<16x32xf32>
    %188 = vector.extract_strided_slice %171 {offsets = [0, 0], sizes = [32, 8], strides = [1, 1]} : vector<32x32xf32> to vector<32x8xf32>
    %cst_88 = arith.constant dense<0.000000e+00> : vector<16x8xf32>
    %189 = tpu.matmul %187, %188, %cst_88 {dimension_numbers = #tpu.dot_dimension_numbers<[1], [0], [0], [1], [0, 0, 1, 1], [], []>} : vector<16x32xf32>, vector<32x8xf32>, vector<16x8xf32> -> vector<16x8xf32>
    %190 = vector.extract_strided_slice %162 {offsets = [0, 8], sizes = [16, 8], strides = [1, 1]} : vector<16x32xf32> to vector<16x8xf32>
    %191 = vector.extract_strided_slice %170 {offsets = [0, 8], sizes = [32, 8], strides = [1, 1]} : vector<32x32xf32> to vector<32x8xf32>
    %cst_89 = arith.constant dense<0.000000e+00> : vector<16x32xf32>
    %192 = tpu.matmul %190, %191, %cst_89 {dimension_numbers = #tpu.dot_dimension_numbers<[1], [1], [0], [0], [0, 0, 1, 0], [], []>} : vector<16x8xf32>, vector<32x8xf32>, vector<16x32xf32> -> vector<16x32xf32>
    %cst_90 = arith.constant 0.353553385 : f32
    %193 = vector.broadcast %cst_90 : f32 to vector<16x32xf32>
    %194 = arith.mulf %192, %193 : vector<16x32xf32>
    %195 = arith.addf %194, %12 : vector<16x32xf32>
    %cst_91 = arith.constant dense<0xFF800000> : vector<16xf32>
    %196 = vector.multi_reduction <maximumf>, %195, %cst_91 [1] : vector<16x32xf32> to vector<16xf32>
    %197 = vector.shape_cast %196 : vector<16xf32> to vector<16x1xf32>
    %198 = vector.broadcast %197 : vector<16x1xf32> to vector<16x32xf32>
    %199 = arith.subf %195, %198 : vector<16x32xf32>
    %200 = math.exp %199 : vector<16x32xf32>
    %cst_92 = arith.constant dense<0.000000e+00> : vector<16xf32>
    %201 = vector.multi_reduction <add>, %200, %cst_92 [1] : vector<16x32xf32> to vector<16xf32>
    %202 = vector.shape_cast %201 : vector<16xf32> to vector<16x1xf32>
    %203 = tpu.reciprocal %202 : vector<16x1xf32> -> vector<16x1xf32>
    %204 = vector.broadcast %203 : vector<16x1xf32> to vector<16x32xf32>
    %205 = arith.mulf %200, %204 : vector<16x32xf32>
    %206 = vector.extract_strided_slice %171 {offsets = [0, 8], sizes = [32, 8], strides = [1, 1]} : vector<32x32xf32> to vector<32x8xf32>
    %cst_93 = arith.constant dense<0.000000e+00> : vector<16x8xf32>
    %207 = tpu.matmul %205, %206, %cst_93 {dimension_numbers = #tpu.dot_dimension_numbers<[1], [0], [0], [1], [0, 0, 1, 1], [], []>} : vector<16x32xf32>, vector<32x8xf32>, vector<16x8xf32> -> vector<16x8xf32>
    %208 = vector.extract_strided_slice %162 {offsets = [0, 16], sizes = [16, 8], strides = [1, 1]} : vector<16x32xf32> to vector<16x8xf32>
    %209 = vector.extract_strided_slice %170 {offsets = [0, 16], sizes = [32, 8], strides = [1, 1]} : vector<32x32xf32> to vector<32x8xf32>
    %cst_94 = arith.constant dense<0.000000e+00> : vector<16x32xf32>
    %210 = tpu.matmul %208, %209, %cst_94 {dimension_numbers = #tpu.dot_dimension_numbers<[1], [1], [0], [0], [0, 0, 1, 0], [], []>} : vector<16x8xf32>, vector<32x8xf32>, vector<16x32xf32> -> vector<16x32xf32>
    %cst_95 = arith.constant 0.353553385 : f32
    %211 = vector.broadcast %cst_95 : f32 to vector<16x32xf32>
    %212 = arith.mulf %210, %211 : vector<16x32xf32>
    %213 = arith.addf %212, %12 : vector<16x32xf32>
    %cst_96 = arith.constant dense<0xFF800000> : vector<16xf32>
    %214 = vector.multi_reduction <maximumf>, %213, %cst_96 [1] : vector<16x32xf32> to vector<16xf32>
    %215 = vector.shape_cast %214 : vector<16xf32> to vector<16x1xf32>
    %216 = vector.broadcast %215 : vector<16x1xf32> to vector<16x32xf32>
    %217 = arith.subf %213, %216 : vector<16x32xf32>
    %218 = math.exp %217 : vector<16x32xf32>
    %cst_97 = arith.constant dense<0.000000e+00> : vector<16xf32>
    %219 = vector.multi_reduction <add>, %218, %cst_97 [1] : vector<16x32xf32> to vector<16xf32>
    %220 = vector.shape_cast %219 : vector<16xf32> to vector<16x1xf32>
    %221 = tpu.reciprocal %220 : vector<16x1xf32> -> vector<16x1xf32>
    %222 = vector.broadcast %221 : vector<16x1xf32> to vector<16x32xf32>
    %223 = arith.mulf %218, %222 : vector<16x32xf32>
    %224 = vector.extract_strided_slice %171 {offsets = [0, 16], sizes = [32, 8], strides = [1, 1]} : vector<32x32xf32> to vector<32x8xf32>
    %cst_98 = arith.constant dense<0.000000e+00> : vector<16x8xf32>
    %225 = tpu.matmul %223, %224, %cst_98 {dimension_numbers = #tpu.dot_dimension_numbers<[1], [0], [0], [1], [0, 0, 1, 1], [], []>} : vector<16x32xf32>, vector<32x8xf32>, vector<16x8xf32> -> vector<16x8xf32>
    %226 = vector.extract_strided_slice %162 {offsets = [0, 24], sizes = [16, 8], strides = [1, 1]} : vector<16x32xf32> to vector<16x8xf32>
    %227 = vector.extract_strided_slice %170 {offsets = [0, 24], sizes = [32, 8], strides = [1, 1]} : vector<32x32xf32> to vector<32x8xf32>
    %cst_99 = arith.constant dense<0.000000e+00> : vector<16x32xf32>
    %228 = tpu.matmul %226, %227, %cst_99 {dimension_numbers = #tpu.dot_dimension_numbers<[1], [1], [0], [0], [0, 0, 1, 0], [], []>} : vector<16x8xf32>, vector<32x8xf32>, vector<16x32xf32> -> vector<16x32xf32>
    %cst_100 = arith.constant 0.353553385 : f32
    %229 = vector.broadcast %cst_100 : f32 to vector<16x32xf32>
    %230 = arith.mulf %228, %229 : vector<16x32xf32>
    %231 = arith.addf %230, %12 : vector<16x32xf32>
    %cst_101 = arith.constant dense<0xFF800000> : vector<16xf32>
    %232 = vector.multi_reduction <maximumf>, %231, %cst_101 [1] : vector<16x32xf32> to vector<16xf32>
    %233 = vector.shape_cast %232 : vector<16xf32> to vector<16x1xf32>
    %234 = vector.broadcast %233 : vector<16x1xf32> to vector<16x32xf32>
    %235 = arith.subf %231, %234 : vector<16x32xf32>
    %236 = math.exp %235 : vector<16x32xf32>
    %cst_102 = arith.constant dense<0.000000e+00> : vector<16xf32>
    %237 = vector.multi_reduction <add>, %236, %cst_102 [1] : vector<16x32xf32> to vector<16xf32>
    %238 = vector.shape_cast %237 : vector<16xf32> to vector<16x1xf32>
    %239 = tpu.reciprocal %238 : vector<16x1xf32> -> vector<16x1xf32>
    %240 = vector.broadcast %239 : vector<16x1xf32> to vector<16x32xf32>
    %241 = arith.mulf %236, %240 : vector<16x32xf32>
    %242 = vector.extract_strided_slice %171 {offsets = [0, 24], sizes = [32, 8], strides = [1, 1]} : vector<32x32xf32> to vector<32x8xf32>
    %cst_103 = arith.constant dense<0.000000e+00> : vector<16x8xf32>
    %243 = tpu.matmul %241, %242, %cst_103 {dimension_numbers = #tpu.dot_dimension_numbers<[1], [0], [0], [1], [0, 0, 1, 1], [], []>} : vector<16x32xf32>, vector<32x8xf32>, vector<16x8xf32> -> vector<16x8xf32>
    %244 = tpu.concatenate %189, %207, %225, %243 in 1 : vector<16x8xf32>, vector<16x8xf32>, vector<16x8xf32>, vector<16x8xf32> -> vector<16x32xf32>
    %c0_104 = arith.constant 0 : index
    %c0_105 = arith.constant 0 : index
    %c0_106 = arith.constant 0 : index
    %245 = vector.load %arg19[%c0_104, %c0_105, %c0_106] : memref<2x32x32xf32, #tpu.memory_space<vmem>>, vector<1x32x32xf32>
    %246 = vector.shape_cast %245 : vector<1x32x32xf32> to vector<32x32xf32>
    %cst_107 = arith.constant dense<0.000000e+00> : vector<16x32xf32>
    %247 = tpu.matmul %244, %246, %cst_107 {dimension_numbers = #tpu.dot_dimension_numbers<[1], [0], [0], [1], [0, 0, 1, 1], [], []>} : vector<16x32xf32>, vector<32x32xf32>, vector<16x32xf32> -> vector<16x32xf32>
    %248 = arith.addf %129, %247 : vector<16x32xf32>
    %c0_108 = arith.constant 0 : index
    %c0_109 = arith.constant 0 : index
    %c0_110 = arith.constant 0 : index
    %249 = vector.load %arg20[%c0_108, %c0_109, %c0_110] : memref<2x1x32xf32, #tpu.memory_space<vmem>>, vector<1x1x32xf32>
    %250 = vector.shape_cast %249 : vector<1x1x32xf32> to vector<1x32xf32>
    %251 = vector.broadcast %250 : vector<1x32xf32> to vector<16x32xf32>
    %252 = arith.addf %248, %251 : vector<16x32xf32>
    %c0_111 = arith.constant 0 : index
    %c0_112 = arith.constant 0 : index
    %c0_113 = arith.constant 0 : index
    %253 = vector.load %arg21[%c0_111, %c0_112, %c0_113] : memref<2x1x32xf32, #tpu.memory_space<vmem>>, vector<1x1x32xf32>
    %254 = vector.shape_cast %253 : vector<1x1x32xf32> to vector<1x32xf32>
    %c0_114 = arith.constant 0 : index
    %c0_115 = arith.constant 0 : index
    %c0_116 = arith.constant 0 : index
    %255 = vector.load %arg22[%c0_114, %c0_115, %c0_116] : memref<2x1x32xf32, #tpu.memory_space<vmem>>, vector<1x1x32xf32>
    %256 = vector.shape_cast %255 : vector<1x1x32xf32> to vector<1x32xf32>
    %cst_117 = arith.constant dense<0.000000e+00> : vector<16xf32>
    %257 = vector.multi_reduction <add>, %252, %cst_117 [1] : vector<16x32xf32> to vector<16xf32>
    %258 = vector.shape_cast %257 : vector<16xf32> to vector<16x1xf32>
    %cst_118 = arith.constant 3.200000e+01 : f32
    %259 = vector.broadcast %cst_118 : f32 to vector<16x1xf32>
    %260 = arith.divf %258, %259 : vector<16x1xf32>
    %261 = vector.broadcast %260 : vector<16x1xf32> to vector<16x32xf32>
    %262 = arith.subf %252, %261 : vector<16x32xf32>
    %263 = arith.mulf %262, %262 : vector<16x32xf32>
    %cst_119 = arith.constant dense<0.000000e+00> : vector<16xf32>
    %264 = vector.multi_reduction <add>, %263, %cst_119 [1] : vector<16x32xf32> to vector<16xf32>
    %265 = vector.shape_cast %264 : vector<16xf32> to vector<16x1xf32>
    %cst_120 = arith.constant 3.200000e+01 : f32
    %266 = vector.broadcast %cst_120 : f32 to vector<16x1xf32>
    %267 = arith.divf %265, %266 : vector<16x1xf32>
    %268 = vector.broadcast %260 : vector<16x1xf32> to vector<16x32xf32>
    %269 = arith.subf %252, %268 : vector<16x32xf32>
    %cst_121 = arith.constant 9.99999974E-6 : f32
    %270 = vector.broadcast %cst_121 : f32 to vector<16x1xf32>
    %271 = arith.addf %267, %270 : vector<16x1xf32>
    %272 = math.rsqrt %271 : vector<16x1xf32>
    %273 = vector.broadcast %272 : vector<16x1xf32> to vector<16x32xf32>
    %274 = arith.mulf %269, %273 : vector<16x32xf32>
    %275 = vector.broadcast %254 : vector<1x32xf32> to vector<16x32xf32>
    %276 = arith.mulf %274, %275 : vector<16x32xf32>
    %277 = vector.broadcast %256 : vector<1x32xf32> to vector<16x32xf32>
    %278 = arith.addf %276, %277 : vector<16x32xf32>
    %c0_122 = arith.constant 0 : index
    %c0_123 = arith.constant 0 : index
    %c0_124 = arith.constant 0 : index
    %279 = vector.load %arg23[%c0_122, %c0_123, %c0_124] : memref<2x32x64xf32, #tpu.memory_space<vmem>>, vector<1x32x64xf32>
    %280 = vector.shape_cast %279 : vector<1x32x64xf32> to vector<32x64xf32>
    %cst_125 = arith.constant dense<0.000000e+00> : vector<16x64xf32>
    %281 = tpu.matmul %278, %280, %cst_125 {dimension_numbers = #tpu.dot_dimension_numbers<[1], [0], [0], [1], [0, 0, 1, 1], [], []>} : vector<16x32xf32>, vector<32x64xf32>, vector<16x64xf32> -> vector<16x64xf32>
    %c0_126 = arith.constant 0 : index
    %c0_127 = arith.constant 0 : index
    %c0_128 = arith.constant 0 : index
    %282 = vector.load %arg24[%c0_126, %c0_127, %c0_128] : memref<2x1x64xf32, #tpu.memory_space<vmem>>, vector<1x1x64xf32>
    %283 = vector.shape_cast %282 : vector<1x1x64xf32> to vector<1x64xf32>
    %284 = vector.broadcast %283 : vector<1x64xf32> to vector<16x64xf32>
    %285 = arith.addf %281, %284 : vector<16x64xf32>
    %cst_129 = arith.constant 0.000000e+00 : f32
    %286 = vector.broadcast %cst_129 : f32 to vector<16x64xf32>
    %287 = arith.maximumf %285, %286 : vector<16x64xf32>
    %c0_130 = arith.constant 0 : index
    %c0_131 = arith.constant 0 : index
    %c0_132 = arith.constant 0 : index
    %288 = vector.load %arg25[%c0_130, %c0_131, %c0_132] : memref<2x64x32xf32, #tpu.memory_space<vmem>>, vector<1x64x32xf32>
    %289 = vector.shape_cast %288 : vector<1x64x32xf32> to vector<64x32xf32>
    %cst_133 = arith.constant dense<0.000000e+00> : vector<16x32xf32>
    %290 = tpu.matmul %287, %289, %cst_133 {dimension_numbers = #tpu.dot_dimension_numbers<[1], [0], [0], [1], [0, 0, 1, 1], [], []>} : vector<16x64xf32>, vector<64x32xf32>, vector<16x32xf32> -> vector<16x32xf32>
    %291 = arith.addf %252, %290 : vector<16x32xf32>
    %c0_134 = arith.constant 0 : index
    %c0_135 = arith.constant 0 : index
    %c0_136 = arith.constant 0 : index
    %292 = vector.load %arg26[%c0_134, %c0_135, %c0_136] : memref<2x1x32xf32, #tpu.memory_space<vmem>>, vector<1x1x32xf32>
    %293 = vector.shape_cast %292 : vector<1x1x32xf32> to vector<1x32xf32>
    %294 = vector.broadcast %293 : vector<1x32xf32> to vector<16x32xf32>
    %295 = arith.addf %291, %294 : vector<16x32xf32>
    %c1 = arith.constant 1 : index
    %c0_137 = arith.constant 0 : index
    %c0_138 = arith.constant 0 : index
    %296 = vector.load %arg7[%c1, %c0_137, %c0_138] : memref<2x1x32xf32, #tpu.memory_space<vmem>>, vector<1x1x32xf32>
    %297 = vector.shape_cast %296 : vector<1x1x32xf32> to vector<1x32xf32>
    %c1_139 = arith.constant 1 : index
    %c0_140 = arith.constant 0 : index
    %c0_141 = arith.constant 0 : index
    %298 = vector.load %arg8[%c1_139, %c0_140, %c0_141] : memref<2x1x32xf32, #tpu.memory_space<vmem>>, vector<1x1x32xf32>
    %299 = vector.shape_cast %298 : vector<1x1x32xf32> to vector<1x32xf32>
    %cst_142 = arith.constant dense<0.000000e+00> : vector<16xf32>
    %300 = vector.multi_reduction <add>, %295, %cst_142 [1] : vector<16x32xf32> to vector<16xf32>
    %301 = vector.shape_cast %300 : vector<16xf32> to vector<16x1xf32>
    %cst_143 = arith.constant 3.200000e+01 : f32
    %302 = vector.broadcast %cst_143 : f32 to vector<16x1xf32>
    %303 = arith.divf %301, %302 : vector<16x1xf32>
    %304 = vector.broadcast %303 : vector<16x1xf32> to vector<16x32xf32>
    %305 = arith.subf %295, %304 : vector<16x32xf32>
    %306 = arith.mulf %305, %305 : vector<16x32xf32>
    %cst_144 = arith.constant dense<0.000000e+00> : vector<16xf32>
    %307 = vector.multi_reduction <add>, %306, %cst_144 [1] : vector<16x32xf32> to vector<16xf32>
    %308 = vector.shape_cast %307 : vector<16xf32> to vector<16x1xf32>
    %cst_145 = arith.constant 3.200000e+01 : f32
    %309 = vector.broadcast %cst_145 : f32 to vector<16x1xf32>
    %310 = arith.divf %308, %309 : vector<16x1xf32>
    %311 = vector.broadcast %303 : vector<16x1xf32> to vector<16x32xf32>
    %312 = arith.subf %295, %311 : vector<16x32xf32>
    %cst_146 = arith.constant 9.99999974E-6 : f32
    %313 = vector.broadcast %cst_146 : f32 to vector<16x1xf32>
    %314 = arith.addf %310, %313 : vector<16x1xf32>
    %315 = math.rsqrt %314 : vector<16x1xf32>
    %316 = vector.broadcast %315 : vector<16x1xf32> to vector<16x32xf32>
    %317 = arith.mulf %312, %316 : vector<16x32xf32>
    %318 = vector.broadcast %297 : vector<1x32xf32> to vector<16x32xf32>
    %319 = arith.mulf %317, %318 : vector<16x32xf32>
    %320 = vector.broadcast %299 : vector<1x32xf32> to vector<16x32xf32>
    %321 = arith.addf %319, %320 : vector<16x32xf32>
    %c1_147 = arith.constant 1 : index
    %c0_148 = arith.constant 0 : index
    %c0_149 = arith.constant 0 : index
    %322 = vector.load %arg9[%c1_147, %c0_148, %c0_149] : memref<2x32x96xf32, #tpu.memory_space<vmem>>, vector<1x32x96xf32>
    %323 = vector.shape_cast %322 : vector<1x32x96xf32> to vector<32x96xf32>
    %cst_150 = arith.constant dense<0.000000e+00> : vector<16x96xf32>
    %324 = tpu.matmul %321, %323, %cst_150 {dimension_numbers = #tpu.dot_dimension_numbers<[1], [0], [0], [1], [0, 0, 1, 1], [], []>} : vector<16x32xf32>, vector<32x96xf32>, vector<16x96xf32> -> vector<16x96xf32>
    %c1_151 = arith.constant 1 : index
    %c0_152 = arith.constant 0 : index
    %c0_153 = arith.constant 0 : index
    %325 = vector.load %arg10[%c1_151, %c0_152, %c0_153] : memref<2x1x96xf32, #tpu.memory_space<vmem>>, vector<1x1x96xf32>
    %326 = vector.shape_cast %325 : vector<1x1x96xf32> to vector<1x96xf32>
    %327 = vector.broadcast %326 : vector<1x96xf32> to vector<16x96xf32>
    %328 = arith.addf %324, %327 : vector<16x96xf32>
    %329 = vector.extract_strided_slice %328 {offsets = [0, 0], sizes = [16, 32], strides = [1, 1]} : vector<16x96xf32> to vector<16x32xf32>
    %330 = vector.extract_strided_slice %328 {offsets = [0, 32], sizes = [16, 32], strides = [1, 1]} : vector<16x96xf32> to vector<16x32xf32>
    %331 = vector.extract_strided_slice %328 {offsets = [0, 64], sizes = [16, 32], strides = [1, 1]} : vector<16x96xf32> to vector<16x32xf32>
    %332 = vector.extract_strided_slice %329 {offsets = [0, 0], sizes = [16, 8], strides = [1, 1]} : vector<16x32xf32> to vector<16x8xf32>
    %333 = vector.extract_strided_slice %330 {offsets = [0, 0], sizes = [16, 8], strides = [1, 1]} : vector<16x32xf32> to vector<16x8xf32>
    %cst_154 = arith.constant dense<0.000000e+00> : vector<16x16xf32>
    %334 = tpu.matmul %332, %333, %cst_154 {dimension_numbers = #tpu.dot_dimension_numbers<[1], [1], [0], [0], [0, 0, 1, 0], [], []>} : vector<16x8xf32>, vector<16x8xf32>, vector<16x16xf32> -> vector<16x16xf32>
    %cst_155 = arith.constant 0.353553385 : f32
    %335 = vector.broadcast %cst_155 : f32 to vector<16x16xf32>
    %336 = arith.mulf %334, %335 : vector<16x16xf32>
    %337 = arith.addf %336, %11 : vector<16x16xf32>
    %cst_156 = arith.constant dense<0xFF800000> : vector<16xf32>
    %338 = vector.multi_reduction <maximumf>, %337, %cst_156 [1] : vector<16x16xf32> to vector<16xf32>
    %339 = vector.shape_cast %338 : vector<16xf32> to vector<16x1xf32>
    %340 = vector.broadcast %339 : vector<16x1xf32> to vector<16x16xf32>
    %341 = arith.subf %337, %340 : vector<16x16xf32>
    %342 = math.exp %341 : vector<16x16xf32>
    %cst_157 = arith.constant dense<0.000000e+00> : vector<16xf32>
    %343 = vector.multi_reduction <add>, %342, %cst_157 [1] : vector<16x16xf32> to vector<16xf32>
    %344 = vector.shape_cast %343 : vector<16xf32> to vector<16x1xf32>
    %345 = tpu.reciprocal %344 : vector<16x1xf32> -> vector<16x1xf32>
    %346 = vector.broadcast %345 : vector<16x1xf32> to vector<16x16xf32>
    %347 = arith.mulf %342, %346 : vector<16x16xf32>
    %348 = vector.extract_strided_slice %331 {offsets = [0, 0], sizes = [16, 8], strides = [1, 1]} : vector<16x32xf32> to vector<16x8xf32>
    %cst_158 = arith.constant dense<0.000000e+00> : vector<16x8xf32>
    %349 = tpu.matmul %347, %348, %cst_158 {dimension_numbers = #tpu.dot_dimension_numbers<[1], [0], [0], [1], [0, 0, 1, 1], [], []>} : vector<16x16xf32>, vector<16x8xf32>, vector<16x8xf32> -> vector<16x8xf32>
    %350 = vector.extract_strided_slice %329 {offsets = [0, 8], sizes = [16, 8], strides = [1, 1]} : vector<16x32xf32> to vector<16x8xf32>
    %351 = vector.extract_strided_slice %330 {offsets = [0, 8], sizes = [16, 8], strides = [1, 1]} : vector<16x32xf32> to vector<16x8xf32>
    %cst_159 = arith.constant dense<0.000000e+00> : vector<16x16xf32>
    %352 = tpu.matmul %350, %351, %cst_159 {dimension_numbers = #tpu.dot_dimension_numbers<[1], [1], [0], [0], [0, 0, 1, 0], [], []>} : vector<16x8xf32>, vector<16x8xf32>, vector<16x16xf32> -> vector<16x16xf32>
    %cst_160 = arith.constant 0.353553385 : f32
    %353 = vector.broadcast %cst_160 : f32 to vector<16x16xf32>
    %354 = arith.mulf %352, %353 : vector<16x16xf32>
    %355 = arith.addf %354, %11 : vector<16x16xf32>
    %cst_161 = arith.constant dense<0xFF800000> : vector<16xf32>
    %356 = vector.multi_reduction <maximumf>, %355, %cst_161 [1] : vector<16x16xf32> to vector<16xf32>
    %357 = vector.shape_cast %356 : vector<16xf32> to vector<16x1xf32>
    %358 = vector.broadcast %357 : vector<16x1xf32> to vector<16x16xf32>
    %359 = arith.subf %355, %358 : vector<16x16xf32>
    %360 = math.exp %359 : vector<16x16xf32>
    %cst_162 = arith.constant dense<0.000000e+00> : vector<16xf32>
    %361 = vector.multi_reduction <add>, %360, %cst_162 [1] : vector<16x16xf32> to vector<16xf32>
    %362 = vector.shape_cast %361 : vector<16xf32> to vector<16x1xf32>
    %363 = tpu.reciprocal %362 : vector<16x1xf32> -> vector<16x1xf32>
    %364 = vector.broadcast %363 : vector<16x1xf32> to vector<16x16xf32>
    %365 = arith.mulf %360, %364 : vector<16x16xf32>
    %366 = vector.extract_strided_slice %331 {offsets = [0, 8], sizes = [16, 8], strides = [1, 1]} : vector<16x32xf32> to vector<16x8xf32>
    %cst_163 = arith.constant dense<0.000000e+00> : vector<16x8xf32>
    %367 = tpu.matmul %365, %366, %cst_163 {dimension_numbers = #tpu.dot_dimension_numbers<[1], [0], [0], [1], [0, 0, 1, 1], [], []>} : vector<16x16xf32>, vector<16x8xf32>, vector<16x8xf32> -> vector<16x8xf32>
    %368 = vector.extract_strided_slice %329 {offsets = [0, 16], sizes = [16, 8], strides = [1, 1]} : vector<16x32xf32> to vector<16x8xf32>
    %369 = vector.extract_strided_slice %330 {offsets = [0, 16], sizes = [16, 8], strides = [1, 1]} : vector<16x32xf32> to vector<16x8xf32>
    %cst_164 = arith.constant dense<0.000000e+00> : vector<16x16xf32>
    %370 = tpu.matmul %368, %369, %cst_164 {dimension_numbers = #tpu.dot_dimension_numbers<[1], [1], [0], [0], [0, 0, 1, 0], [], []>} : vector<16x8xf32>, vector<16x8xf32>, vector<16x16xf32> -> vector<16x16xf32>
    %cst_165 = arith.constant 0.353553385 : f32
    %371 = vector.broadcast %cst_165 : f32 to vector<16x16xf32>
    %372 = arith.mulf %370, %371 : vector<16x16xf32>
    %373 = arith.addf %372, %11 : vector<16x16xf32>
    %cst_166 = arith.constant dense<0xFF800000> : vector<16xf32>
    %374 = vector.multi_reduction <maximumf>, %373, %cst_166 [1] : vector<16x16xf32> to vector<16xf32>
    %375 = vector.shape_cast %374 : vector<16xf32> to vector<16x1xf32>
    %376 = vector.broadcast %375 : vector<16x1xf32> to vector<16x16xf32>
    %377 = arith.subf %373, %376 : vector<16x16xf32>
    %378 = math.exp %377 : vector<16x16xf32>
    %cst_167 = arith.constant dense<0.000000e+00> : vector<16xf32>
    %379 = vector.multi_reduction <add>, %378, %cst_167 [1] : vector<16x16xf32> to vector<16xf32>
    %380 = vector.shape_cast %379 : vector<16xf32> to vector<16x1xf32>
    %381 = tpu.reciprocal %380 : vector<16x1xf32> -> vector<16x1xf32>
    %382 = vector.broadcast %381 : vector<16x1xf32> to vector<16x16xf32>
    %383 = arith.mulf %378, %382 : vector<16x16xf32>
    %384 = vector.extract_strided_slice %331 {offsets = [0, 16], sizes = [16, 8], strides = [1, 1]} : vector<16x32xf32> to vector<16x8xf32>
    %cst_168 = arith.constant dense<0.000000e+00> : vector<16x8xf32>
    %385 = tpu.matmul %383, %384, %cst_168 {dimension_numbers = #tpu.dot_dimension_numbers<[1], [0], [0], [1], [0, 0, 1, 1], [], []>} : vector<16x16xf32>, vector<16x8xf32>, vector<16x8xf32> -> vector<16x8xf32>
    %386 = vector.extract_strided_slice %329 {offsets = [0, 24], sizes = [16, 8], strides = [1, 1]} : vector<16x32xf32> to vector<16x8xf32>
    %387 = vector.extract_strided_slice %330 {offsets = [0, 24], sizes = [16, 8], strides = [1, 1]} : vector<16x32xf32> to vector<16x8xf32>
    %cst_169 = arith.constant dense<0.000000e+00> : vector<16x16xf32>
    %388 = tpu.matmul %386, %387, %cst_169 {dimension_numbers = #tpu.dot_dimension_numbers<[1], [1], [0], [0], [0, 0, 1, 0], [], []>} : vector<16x8xf32>, vector<16x8xf32>, vector<16x16xf32> -> vector<16x16xf32>
    %cst_170 = arith.constant 0.353553385 : f32
    %389 = vector.broadcast %cst_170 : f32 to vector<16x16xf32>
    %390 = arith.mulf %388, %389 : vector<16x16xf32>
    %391 = arith.addf %390, %11 : vector<16x16xf32>
    %cst_171 = arith.constant dense<0xFF800000> : vector<16xf32>
    %392 = vector.multi_reduction <maximumf>, %391, %cst_171 [1] : vector<16x16xf32> to vector<16xf32>
    %393 = vector.shape_cast %392 : vector<16xf32> to vector<16x1xf32>
    %394 = vector.broadcast %393 : vector<16x1xf32> to vector<16x16xf32>
    %395 = arith.subf %391, %394 : vector<16x16xf32>
    %396 = math.exp %395 : vector<16x16xf32>
    %cst_172 = arith.constant dense<0.000000e+00> : vector<16xf32>
    %397 = vector.multi_reduction <add>, %396, %cst_172 [1] : vector<16x16xf32> to vector<16xf32>
    %398 = vector.shape_cast %397 : vector<16xf32> to vector<16x1xf32>
    %399 = tpu.reciprocal %398 : vector<16x1xf32> -> vector<16x1xf32>
    %400 = vector.broadcast %399 : vector<16x1xf32> to vector<16x16xf32>
    %401 = arith.mulf %396, %400 : vector<16x16xf32>
    %402 = vector.extract_strided_slice %331 {offsets = [0, 24], sizes = [16, 8], strides = [1, 1]} : vector<16x32xf32> to vector<16x8xf32>
    %cst_173 = arith.constant dense<0.000000e+00> : vector<16x8xf32>
    %403 = tpu.matmul %401, %402, %cst_173 {dimension_numbers = #tpu.dot_dimension_numbers<[1], [0], [0], [1], [0, 0, 1, 1], [], []>} : vector<16x16xf32>, vector<16x8xf32>, vector<16x8xf32> -> vector<16x8xf32>
    %404 = tpu.concatenate %349, %367, %385, %403 in 1 : vector<16x8xf32>, vector<16x8xf32>, vector<16x8xf32>, vector<16x8xf32> -> vector<16x32xf32>
    %c1_174 = arith.constant 1 : index
    %c0_175 = arith.constant 0 : index
    %c0_176 = arith.constant 0 : index
    %405 = vector.load %arg11[%c1_174, %c0_175, %c0_176] : memref<2x32x32xf32, #tpu.memory_space<vmem>>, vector<1x32x32xf32>
    %406 = vector.shape_cast %405 : vector<1x32x32xf32> to vector<32x32xf32>
    %cst_177 = arith.constant dense<0.000000e+00> : vector<16x32xf32>
    %407 = tpu.matmul %404, %406, %cst_177 {dimension_numbers = #tpu.dot_dimension_numbers<[1], [0], [0], [1], [0, 0, 1, 1], [], []>} : vector<16x32xf32>, vector<32x32xf32>, vector<16x32xf32> -> vector<16x32xf32>
    %408 = arith.addf %295, %407 : vector<16x32xf32>
    %c1_178 = arith.constant 1 : index
    %c0_179 = arith.constant 0 : index
    %c0_180 = arith.constant 0 : index
    %409 = vector.load %arg12[%c1_178, %c0_179, %c0_180] : memref<2x1x32xf32, #tpu.memory_space<vmem>>, vector<1x1x32xf32>
    %410 = vector.shape_cast %409 : vector<1x1x32xf32> to vector<1x32xf32>
    %411 = vector.broadcast %410 : vector<1x32xf32> to vector<16x32xf32>
    %412 = arith.addf %408, %411 : vector<16x32xf32>
    %c1_181 = arith.constant 1 : index
    %c0_182 = arith.constant 0 : index
    %c0_183 = arith.constant 0 : index
    %413 = vector.load %arg13[%c1_181, %c0_182, %c0_183] : memref<2x1x32xf32, #tpu.memory_space<vmem>>, vector<1x1x32xf32>
    %414 = vector.shape_cast %413 : vector<1x1x32xf32> to vector<1x32xf32>
    %c1_184 = arith.constant 1 : index
    %c0_185 = arith.constant 0 : index
    %c0_186 = arith.constant 0 : index
    %415 = vector.load %arg14[%c1_184, %c0_185, %c0_186] : memref<2x1x32xf32, #tpu.memory_space<vmem>>, vector<1x1x32xf32>
    %416 = vector.shape_cast %415 : vector<1x1x32xf32> to vector<1x32xf32>
    %cst_187 = arith.constant dense<0.000000e+00> : vector<16xf32>
    %417 = vector.multi_reduction <add>, %412, %cst_187 [1] : vector<16x32xf32> to vector<16xf32>
    %418 = vector.shape_cast %417 : vector<16xf32> to vector<16x1xf32>
    %cst_188 = arith.constant 3.200000e+01 : f32
    %419 = vector.broadcast %cst_188 : f32 to vector<16x1xf32>
    %420 = arith.divf %418, %419 : vector<16x1xf32>
    %421 = vector.broadcast %420 : vector<16x1xf32> to vector<16x32xf32>
    %422 = arith.subf %412, %421 : vector<16x32xf32>
    %423 = arith.mulf %422, %422 : vector<16x32xf32>
    %cst_189 = arith.constant dense<0.000000e+00> : vector<16xf32>
    %424 = vector.multi_reduction <add>, %423, %cst_189 [1] : vector<16x32xf32> to vector<16xf32>
    %425 = vector.shape_cast %424 : vector<16xf32> to vector<16x1xf32>
    %cst_190 = arith.constant 3.200000e+01 : f32
    %426 = vector.broadcast %cst_190 : f32 to vector<16x1xf32>
    %427 = arith.divf %425, %426 : vector<16x1xf32>
    %428 = vector.broadcast %420 : vector<16x1xf32> to vector<16x32xf32>
    %429 = arith.subf %412, %428 : vector<16x32xf32>
    %cst_191 = arith.constant 9.99999974E-6 : f32
    %430 = vector.broadcast %cst_191 : f32 to vector<16x1xf32>
    %431 = arith.addf %427, %430 : vector<16x1xf32>
    %432 = math.rsqrt %431 : vector<16x1xf32>
    %433 = vector.broadcast %432 : vector<16x1xf32> to vector<16x32xf32>
    %434 = arith.mulf %429, %433 : vector<16x32xf32>
    %435 = vector.broadcast %414 : vector<1x32xf32> to vector<16x32xf32>
    %436 = arith.mulf %434, %435 : vector<16x32xf32>
    %437 = vector.broadcast %416 : vector<1x32xf32> to vector<16x32xf32>
    %438 = arith.addf %436, %437 : vector<16x32xf32>
    %c1_192 = arith.constant 1 : index
    %c0_193 = arith.constant 0 : index
    %c0_194 = arith.constant 0 : index
    %439 = vector.load %arg15[%c1_192, %c0_193, %c0_194] : memref<2x32x32xf32, #tpu.memory_space<vmem>>, vector<1x32x32xf32>
    %440 = vector.shape_cast %439 : vector<1x32x32xf32> to vector<32x32xf32>
    %cst_195 = arith.constant dense<0.000000e+00> : vector<16x32xf32>
    %441 = tpu.matmul %438, %440, %cst_195 {dimension_numbers = #tpu.dot_dimension_numbers<[1], [0], [0], [1], [0, 0, 1, 1], [], []>} : vector<16x32xf32>, vector<32x32xf32>, vector<16x32xf32> -> vector<16x32xf32>
    %c1_196 = arith.constant 1 : index
    %c0_197 = arith.constant 0 : index
    %c0_198 = arith.constant 0 : index
    %442 = vector.load %arg16[%c1_196, %c0_197, %c0_198] : memref<2x1x32xf32, #tpu.memory_space<vmem>>, vector<1x1x32xf32>
    %443 = vector.shape_cast %442 : vector<1x1x32xf32> to vector<1x32xf32>
    %444 = vector.broadcast %443 : vector<1x32xf32> to vector<16x32xf32>
    %445 = arith.addf %441, %444 : vector<16x32xf32>
    %c1_199 = arith.constant 1 : index
    %c0_200 = arith.constant 0 : index
    %c0_201 = arith.constant 0 : index
    %446 = vector.load %arg17[%c1_199, %c0_200, %c0_201] : memref<2x32x64xf32, #tpu.memory_space<vmem>>, vector<1x32x64xf32>
    %447 = vector.shape_cast %446 : vector<1x32x64xf32> to vector<32x64xf32>
    %cst_202 = arith.constant dense<0.000000e+00> : vector<32x64xf32>
    %448 = tpu.matmul %10, %447, %cst_202 {dimension_numbers = #tpu.dot_dimension_numbers<[1], [0], [0], [1], [0, 0, 1, 1], [], []>} : vector<32x32xf32>, vector<32x64xf32>, vector<32x64xf32> -> vector<32x64xf32>
    %c1_203 = arith.constant 1 : index
    %c0_204 = arith.constant 0 : index
    %c0_205 = arith.constant 0 : index
    %449 = vector.load %arg18[%c1_203, %c0_204, %c0_205] : memref<2x1x64xf32, #tpu.memory_space<vmem>>, vector<1x1x64xf32>
    %450 = vector.shape_cast %449 : vector<1x1x64xf32> to vector<1x64xf32>
    %451 = vector.broadcast %450 : vector<1x64xf32> to vector<32x64xf32>
    %452 = arith.addf %448, %451 : vector<32x64xf32>
    %453 = vector.extract_strided_slice %452 {offsets = [0, 0], sizes = [32, 32], strides = [1, 1]} : vector<32x64xf32> to vector<32x32xf32>
    %454 = vector.extract_strided_slice %452 {offsets = [0, 32], sizes = [32, 32], strides = [1, 1]} : vector<32x64xf32> to vector<32x32xf32>
    %455 = vector.extract_strided_slice %445 {offsets = [0, 0], sizes = [16, 8], strides = [1, 1]} : vector<16x32xf32> to vector<16x8xf32>
    %456 = vector.extract_strided_slice %453 {offsets = [0, 0], sizes = [32, 8], strides = [1, 1]} : vector<32x32xf32> to vector<32x8xf32>
    %cst_206 = arith.constant dense<0.000000e+00> : vector<16x32xf32>
    %457 = tpu.matmul %455, %456, %cst_206 {dimension_numbers = #tpu.dot_dimension_numbers<[1], [1], [0], [0], [0, 0, 1, 0], [], []>} : vector<16x8xf32>, vector<32x8xf32>, vector<16x32xf32> -> vector<16x32xf32>
    %cst_207 = arith.constant 0.353553385 : f32
    %458 = vector.broadcast %cst_207 : f32 to vector<16x32xf32>
    %459 = arith.mulf %457, %458 : vector<16x32xf32>
    %460 = arith.addf %459, %12 : vector<16x32xf32>
    %cst_208 = arith.constant dense<0xFF800000> : vector<16xf32>
    %461 = vector.multi_reduction <maximumf>, %460, %cst_208 [1] : vector<16x32xf32> to vector<16xf32>
    %462 = vector.shape_cast %461 : vector<16xf32> to vector<16x1xf32>
    %463 = vector.broadcast %462 : vector<16x1xf32> to vector<16x32xf32>
    %464 = arith.subf %460, %463 : vector<16x32xf32>
    %465 = math.exp %464 : vector<16x32xf32>
    %cst_209 = arith.constant dense<0.000000e+00> : vector<16xf32>
    %466 = vector.multi_reduction <add>, %465, %cst_209 [1] : vector<16x32xf32> to vector<16xf32>
    %467 = vector.shape_cast %466 : vector<16xf32> to vector<16x1xf32>
    %468 = tpu.reciprocal %467 : vector<16x1xf32> -> vector<16x1xf32>
    %469 = vector.broadcast %468 : vector<16x1xf32> to vector<16x32xf32>
    %470 = arith.mulf %465, %469 : vector<16x32xf32>
    %471 = vector.extract_strided_slice %454 {offsets = [0, 0], sizes = [32, 8], strides = [1, 1]} : vector<32x32xf32> to vector<32x8xf32>
    %cst_210 = arith.constant dense<0.000000e+00> : vector<16x8xf32>
    %472 = tpu.matmul %470, %471, %cst_210 {dimension_numbers = #tpu.dot_dimension_numbers<[1], [0], [0], [1], [0, 0, 1, 1], [], []>} : vector<16x32xf32>, vector<32x8xf32>, vector<16x8xf32> -> vector<16x8xf32>
    %473 = vector.extract_strided_slice %445 {offsets = [0, 8], sizes = [16, 8], strides = [1, 1]} : vector<16x32xf32> to vector<16x8xf32>
    %474 = vector.extract_strided_slice %453 {offsets = [0, 8], sizes = [32, 8], strides = [1, 1]} : vector<32x32xf32> to vector<32x8xf32>
    %cst_211 = arith.constant dense<0.000000e+00> : vector<16x32xf32>
    %475 = tpu.matmul %473, %474, %cst_211 {dimension_numbers = #tpu.dot_dimension_numbers<[1], [1], [0], [0], [0, 0, 1, 0], [], []>} : vector<16x8xf32>, vector<32x8xf32>, vector<16x32xf32> -> vector<16x32xf32>
    %cst_212 = arith.constant 0.353553385 : f32
    %476 = vector.broadcast %cst_212 : f32 to vector<16x32xf32>
    %477 = arith.mulf %475, %476 : vector<16x32xf32>
    %478 = arith.addf %477, %12 : vector<16x32xf32>
    %cst_213 = arith.constant dense<0xFF800000> : vector<16xf32>
    %479 = vector.multi_reduction <maximumf>, %478, %cst_213 [1] : vector<16x32xf32> to vector<16xf32>
    %480 = vector.shape_cast %479 : vector<16xf32> to vector<16x1xf32>
    %481 = vector.broadcast %480 : vector<16x1xf32> to vector<16x32xf32>
    %482 = arith.subf %478, %481 : vector<16x32xf32>
    %483 = math.exp %482 : vector<16x32xf32>
    %cst_214 = arith.constant dense<0.000000e+00> : vector<16xf32>
    %484 = vector.multi_reduction <add>, %483, %cst_214 [1] : vector<16x32xf32> to vector<16xf32>
    %485 = vector.shape_cast %484 : vector<16xf32> to vector<16x1xf32>
    %486 = tpu.reciprocal %485 : vector<16x1xf32> -> vector<16x1xf32>
    %487 = vector.broadcast %486 : vector<16x1xf32> to vector<16x32xf32>
    %488 = arith.mulf %483, %487 : vector<16x32xf32>
    %489 = vector.extract_strided_slice %454 {offsets = [0, 8], sizes = [32, 8], strides = [1, 1]} : vector<32x32xf32> to vector<32x8xf32>
    %cst_215 = arith.constant dense<0.000000e+00> : vector<16x8xf32>
    %490 = tpu.matmul %488, %489, %cst_215 {dimension_numbers = #tpu.dot_dimension_numbers<[1], [0], [0], [1], [0, 0, 1, 1], [], []>} : vector<16x32xf32>, vector<32x8xf32>, vector<16x8xf32> -> vector<16x8xf32>
    %491 = vector.extract_strided_slice %445 {offsets = [0, 16], sizes = [16, 8], strides = [1, 1]} : vector<16x32xf32> to vector<16x8xf32>
    %492 = vector.extract_strided_slice %453 {offsets = [0, 16], sizes = [32, 8], strides = [1, 1]} : vector<32x32xf32> to vector<32x8xf32>
    %cst_216 = arith.constant dense<0.000000e+00> : vector<16x32xf32>
    %493 = tpu.matmul %491, %492, %cst_216 {dimension_numbers = #tpu.dot_dimension_numbers<[1], [1], [0], [0], [0, 0, 1, 0], [], []>} : vector<16x8xf32>, vector<32x8xf32>, vector<16x32xf32> -> vector<16x32xf32>
    %cst_217 = arith.constant 0.353553385 : f32
    %494 = vector.broadcast %cst_217 : f32 to vector<16x32xf32>
    %495 = arith.mulf %493, %494 : vector<16x32xf32>
    %496 = arith.addf %495, %12 : vector<16x32xf32>
    %cst_218 = arith.constant dense<0xFF800000> : vector<16xf32>
    %497 = vector.multi_reduction <maximumf>, %496, %cst_218 [1] : vector<16x32xf32> to vector<16xf32>
    %498 = vector.shape_cast %497 : vector<16xf32> to vector<16x1xf32>
    %499 = vector.broadcast %498 : vector<16x1xf32> to vector<16x32xf32>
    %500 = arith.subf %496, %499 : vector<16x32xf32>
    %501 = math.exp %500 : vector<16x32xf32>
    %cst_219 = arith.constant dense<0.000000e+00> : vector<16xf32>
    %502 = vector.multi_reduction <add>, %501, %cst_219 [1] : vector<16x32xf32> to vector<16xf32>
    %503 = vector.shape_cast %502 : vector<16xf32> to vector<16x1xf32>
    %504 = tpu.reciprocal %503 : vector<16x1xf32> -> vector<16x1xf32>
    %505 = vector.broadcast %504 : vector<16x1xf32> to vector<16x32xf32>
    %506 = arith.mulf %501, %505 : vector<16x32xf32>
    %507 = vector.extract_strided_slice %454 {offsets = [0, 16], sizes = [32, 8], strides = [1, 1]} : vector<32x32xf32> to vector<32x8xf32>
    %cst_220 = arith.constant dense<0.000000e+00> : vector<16x8xf32>
    %508 = tpu.matmul %506, %507, %cst_220 {dimension_numbers = #tpu.dot_dimension_numbers<[1], [0], [0], [1], [0, 0, 1, 1], [], []>} : vector<16x32xf32>, vector<32x8xf32>, vector<16x8xf32> -> vector<16x8xf32>
    %509 = vector.extract_strided_slice %445 {offsets = [0, 24], sizes = [16, 8], strides = [1, 1]} : vector<16x32xf32> to vector<16x8xf32>
    %510 = vector.extract_strided_slice %453 {offsets = [0, 24], sizes = [32, 8], strides = [1, 1]} : vector<32x32xf32> to vector<32x8xf32>
    %cst_221 = arith.constant dense<0.000000e+00> : vector<16x32xf32>
    %511 = tpu.matmul %509, %510, %cst_221 {dimension_numbers = #tpu.dot_dimension_numbers<[1], [1], [0], [0], [0, 0, 1, 0], [], []>} : vector<16x8xf32>, vector<32x8xf32>, vector<16x32xf32> -> vector<16x32xf32>
    %cst_222 = arith.constant 0.353553385 : f32
    %512 = vector.broadcast %cst_222 : f32 to vector<16x32xf32>
    %513 = arith.mulf %511, %512 : vector<16x32xf32>
    %514 = arith.addf %513, %12 : vector<16x32xf32>
    %cst_223 = arith.constant dense<0xFF800000> : vector<16xf32>
    %515 = vector.multi_reduction <maximumf>, %514, %cst_223 [1] : vector<16x32xf32> to vector<16xf32>
    %516 = vector.shape_cast %515 : vector<16xf32> to vector<16x1xf32>
    %517 = vector.broadcast %516 : vector<16x1xf32> to vector<16x32xf32>
    %518 = arith.subf %514, %517 : vector<16x32xf32>
    %519 = math.exp %518 : vector<16x32xf32>
    %cst_224 = arith.constant dense<0.000000e+00> : vector<16xf32>
    %520 = vector.multi_reduction <add>, %519, %cst_224 [1] : vector<16x32xf32> to vector<16xf32>
    %521 = vector.shape_cast %520 : vector<16xf32> to vector<16x1xf32>
    %522 = tpu.reciprocal %521 : vector<16x1xf32> -> vector<16x1xf32>
    %523 = vector.broadcast %522 : vector<16x1xf32> to vector<16x32xf32>
    %524 = arith.mulf %519, %523 : vector<16x32xf32>
    %525 = vector.extract_strided_slice %454 {offsets = [0, 24], sizes = [32, 8], strides = [1, 1]} : vector<32x32xf32> to vector<32x8xf32>
    %cst_225 = arith.constant dense<0.000000e+00> : vector<16x8xf32>
    %526 = tpu.matmul %524, %525, %cst_225 {dimension_numbers = #tpu.dot_dimension_numbers<[1], [0], [0], [1], [0, 0, 1, 1], [], []>} : vector<16x32xf32>, vector<32x8xf32>, vector<16x8xf32> -> vector<16x8xf32>
    %527 = tpu.concatenate %472, %490, %508, %526 in 1 : vector<16x8xf32>, vector<16x8xf32>, vector<16x8xf32>, vector<16x8xf32> -> vector<16x32xf32>
    %c1_226 = arith.constant 1 : index
    %c0_227 = arith.constant 0 : index
    %c0_228 = arith.constant 0 : index
    %528 = vector.load %arg19[%c1_226, %c0_227, %c0_228] : memref<2x32x32xf32, #tpu.memory_space<vmem>>, vector<1x32x32xf32>
    %529 = vector.shape_cast %528 : vector<1x32x32xf32> to vector<32x32xf32>
    %cst_229 = arith.constant dense<0.000000e+00> : vector<16x32xf32>
    %530 = tpu.matmul %527, %529, %cst_229 {dimension_numbers = #tpu.dot_dimension_numbers<[1], [0], [0], [1], [0, 0, 1, 1], [], []>} : vector<16x32xf32>, vector<32x32xf32>, vector<16x32xf32> -> vector<16x32xf32>
    %531 = arith.addf %412, %530 : vector<16x32xf32>
    %c1_230 = arith.constant 1 : index
    %c0_231 = arith.constant 0 : index
    %c0_232 = arith.constant 0 : index
    %532 = vector.load %arg20[%c1_230, %c0_231, %c0_232] : memref<2x1x32xf32, #tpu.memory_space<vmem>>, vector<1x1x32xf32>
    %533 = vector.shape_cast %532 : vector<1x1x32xf32> to vector<1x32xf32>
    %534 = vector.broadcast %533 : vector<1x32xf32> to vector<16x32xf32>
    %535 = arith.addf %531, %534 : vector<16x32xf32>
    %c1_233 = arith.constant 1 : index
    %c0_234 = arith.constant 0 : index
    %c0_235 = arith.constant 0 : index
    %536 = vector.load %arg21[%c1_233, %c0_234, %c0_235] : memref<2x1x32xf32, #tpu.memory_space<vmem>>, vector<1x1x32xf32>
    %537 = vector.shape_cast %536 : vector<1x1x32xf32> to vector<1x32xf32>
    %c1_236 = arith.constant 1 : index
    %c0_237 = arith.constant 0 : index
    %c0_238 = arith.constant 0 : index
    %538 = vector.load %arg22[%c1_236, %c0_237, %c0_238] : memref<2x1x32xf32, #tpu.memory_space<vmem>>, vector<1x1x32xf32>
    %539 = vector.shape_cast %538 : vector<1x1x32xf32> to vector<1x32xf32>
    %cst_239 = arith.constant dense<0.000000e+00> : vector<16xf32>
    %540 = vector.multi_reduction <add>, %535, %cst_239 [1] : vector<16x32xf32> to vector<16xf32>
    %541 = vector.shape_cast %540 : vector<16xf32> to vector<16x1xf32>
    %cst_240 = arith.constant 3.200000e+01 : f32
    %542 = vector.broadcast %cst_240 : f32 to vector<16x1xf32>
    %543 = arith.divf %541, %542 : vector<16x1xf32>
    %544 = vector.broadcast %543 : vector<16x1xf32> to vector<16x32xf32>
    %545 = arith.subf %535, %544 : vector<16x32xf32>
    %546 = arith.mulf %545, %545 : vector<16x32xf32>
    %cst_241 = arith.constant dense<0.000000e+00> : vector<16xf32>
    %547 = vector.multi_reduction <add>, %546, %cst_241 [1] : vector<16x32xf32> to vector<16xf32>
    %548 = vector.shape_cast %547 : vector<16xf32> to vector<16x1xf32>
    %cst_242 = arith.constant 3.200000e+01 : f32
    %549 = vector.broadcast %cst_242 : f32 to vector<16x1xf32>
    %550 = arith.divf %548, %549 : vector<16x1xf32>
    %551 = vector.broadcast %543 : vector<16x1xf32> to vector<16x32xf32>
    %552 = arith.subf %535, %551 : vector<16x32xf32>
    %cst_243 = arith.constant 9.99999974E-6 : f32
    %553 = vector.broadcast %cst_243 : f32 to vector<16x1xf32>
    %554 = arith.addf %550, %553 : vector<16x1xf32>
    %555 = math.rsqrt %554 : vector<16x1xf32>
    %556 = vector.broadcast %555 : vector<16x1xf32> to vector<16x32xf32>
    %557 = arith.mulf %552, %556 : vector<16x32xf32>
    %558 = vector.broadcast %537 : vector<1x32xf32> to vector<16x32xf32>
    %559 = arith.mulf %557, %558 : vector<16x32xf32>
    %560 = vector.broadcast %539 : vector<1x32xf32> to vector<16x32xf32>
    %561 = arith.addf %559, %560 : vector<16x32xf32>
    %c1_244 = arith.constant 1 : index
    %c0_245 = arith.constant 0 : index
    %c0_246 = arith.constant 0 : index
    %562 = vector.load %arg23[%c1_244, %c0_245, %c0_246] : memref<2x32x64xf32, #tpu.memory_space<vmem>>, vector<1x32x64xf32>
    %563 = vector.shape_cast %562 : vector<1x32x64xf32> to vector<32x64xf32>
    %cst_247 = arith.constant dense<0.000000e+00> : vector<16x64xf32>
    %564 = tpu.matmul %561, %563, %cst_247 {dimension_numbers = #tpu.dot_dimension_numbers<[1], [0], [0], [1], [0, 0, 1, 1], [], []>} : vector<16x32xf32>, vector<32x64xf32>, vector<16x64xf32> -> vector<16x64xf32>
    %c1_248 = arith.constant 1 : index
    %c0_249 = arith.constant 0 : index
    %c0_250 = arith.constant 0 : index
    %565 = vector.load %arg24[%c1_248, %c0_249, %c0_250] : memref<2x1x64xf32, #tpu.memory_space<vmem>>, vector<1x1x64xf32>
    %566 = vector.shape_cast %565 : vector<1x1x64xf32> to vector<1x64xf32>
    %567 = vector.broadcast %566 : vector<1x64xf32> to vector<16x64xf32>
    %568 = arith.addf %564, %567 : vector<16x64xf32>
    %cst_251 = arith.constant 0.000000e+00 : f32
    %569 = vector.broadcast %cst_251 : f32 to vector<16x64xf32>
    %570 = arith.maximumf %568, %569 : vector<16x64xf32>
    %c1_252 = arith.constant 1 : index
    %c0_253 = arith.constant 0 : index
    %c0_254 = arith.constant 0 : index
    %571 = vector.load %arg25[%c1_252, %c0_253, %c0_254] : memref<2x64x32xf32, #tpu.memory_space<vmem>>, vector<1x64x32xf32>
    %572 = vector.shape_cast %571 : vector<1x64x32xf32> to vector<64x32xf32>
    %cst_255 = arith.constant dense<0.000000e+00> : vector<16x32xf32>
    %573 = tpu.matmul %570, %572, %cst_255 {dimension_numbers = #tpu.dot_dimension_numbers<[1], [0], [0], [1], [0, 0, 1, 1], [], []>} : vector<16x64xf32>, vector<64x32xf32>, vector<16x32xf32> -> vector<16x32xf32>
    %574 = arith.addf %535, %573 : vector<16x32xf32>
    %c1_256 = arith.constant 1 : index
    %c0_257 = arith.constant 0 : index
    %c0_258 = arith.constant 0 : index
    %575 = vector.load %arg26[%c1_256, %c0_257, %c0_258] : memref<2x1x32xf32, #tpu.memory_space<vmem>>, vector<1x1x32xf32>
    %576 = vector.shape_cast %575 : vector<1x1x32xf32> to vector<1x32xf32>
    %577 = vector.broadcast %576 : vector<1x32xf32> to vector<16x32xf32>
    %578 = arith.addf %574, %577 : vector<16x32xf32>
    %c0_259 = arith.constant 0 : index
    %c0_260 = arith.constant 0 : index
    %579 = vector.load %arg27[%c0_259, %c0_260] : memref<1x32xf32, #tpu.memory_space<vmem>>, vector<1x32xf32>
    %c0_261 = arith.constant 0 : index
    %c0_262 = arith.constant 0 : index
    %580 = vector.load %arg28[%c0_261, %c0_262] : memref<1x32xf32, #tpu.memory_space<vmem>>, vector<1x32xf32>
    %cst_263 = arith.constant dense<0.000000e+00> : vector<16xf32>
    %581 = vector.multi_reduction <add>, %578, %cst_263 [1] : vector<16x32xf32> to vector<16xf32>
    %582 = vector.shape_cast %581 : vector<16xf32> to vector<16x1xf32>
    %cst_264 = arith.constant 3.200000e+01 : f32
    %583 = vector.broadcast %cst_264 : f32 to vector<16x1xf32>
    %584 = arith.divf %582, %583 : vector<16x1xf32>
    %585 = vector.broadcast %584 : vector<16x1xf32> to vector<16x32xf32>
    %586 = arith.subf %578, %585 : vector<16x32xf32>
    %587 = arith.mulf %586, %586 : vector<16x32xf32>
    %cst_265 = arith.constant dense<0.000000e+00> : vector<16xf32>
    %588 = vector.multi_reduction <add>, %587, %cst_265 [1] : vector<16x32xf32> to vector<16xf32>
    %589 = vector.shape_cast %588 : vector<16xf32> to vector<16x1xf32>
    %cst_266 = arith.constant 3.200000e+01 : f32
    %590 = vector.broadcast %cst_266 : f32 to vector<16x1xf32>
    %591 = arith.divf %589, %590 : vector<16x1xf32>
    %592 = vector.broadcast %584 : vector<16x1xf32> to vector<16x32xf32>
    %593 = arith.subf %578, %592 : vector<16x32xf32>
    %cst_267 = arith.constant 9.99999974E-6 : f32
    %594 = vector.broadcast %cst_267 : f32 to vector<16x1xf32>
    %595 = arith.addf %591, %594 : vector<16x1xf32>
    %596 = math.rsqrt %595 : vector<16x1xf32>
    %597 = vector.broadcast %596 : vector<16x1xf32> to vector<16x32xf32>
    %598 = arith.mulf %593, %597 : vector<16x32xf32>
    %599 = vector.broadcast %579 : vector<1x32xf32> to vector<16x32xf32>
    %600 = arith.mulf %598, %599 : vector<16x32xf32>
    %601 = vector.broadcast %580 : vector<1x32xf32> to vector<16x32xf32>
    %602 = arith.addf %600, %601 : vector<16x32xf32>
    %c0_268 = arith.constant 0 : index
    %c0_269 = arith.constant 0 : index
    %603 = vector.load %arg29[%c0_268, %c0_269] : memref<32x16xf32, #tpu.memory_space<vmem>>, vector<32x16xf32>
    %cst_270 = arith.constant dense<0.000000e+00> : vector<16x16xf32>
    %604 = tpu.matmul %602, %603, %cst_270 {dimension_numbers = #tpu.dot_dimension_numbers<[1], [0], [0], [1], [0, 0, 1, 1], [], []>} : vector<16x32xf32>, vector<32x16xf32>, vector<16x16xf32> -> vector<16x16xf32>
    %c0_271 = arith.constant 0 : index
    %c0_272 = arith.constant 0 : index
    %605 = vector.load %arg30[%c0_271, %c0_272] : memref<1x16xf32, #tpu.memory_space<vmem>>, vector<1x16xf32>
    %606 = vector.broadcast %605 : vector<1x16xf32> to vector<16x16xf32>
    %607 = arith.addf %604, %606 : vector<16x16xf32>
    %c0_273 = arith.constant 0 : index
    %c0_274 = arith.constant 0 : index
    %608 = vector.load %arg31[%c0_273, %c0_274] : memref<16x16xf32, #tpu.memory_space<vmem>>, vector<16x16xf32>
    tpu.vector_store %arg31[%c0_273, %c0_274], %607 {strides = array<i32>} : memref<16x16xf32, #tpu.memory_space<vmem>>, vector<16x16xf32>,
    return
  }
}

</mosaic_0001>

<bundles_post_ra>
// kernel: tpu_custom_call.1
= control target key start
LH: loop header
LB: loop body
LE: loop exit
PB: predicated region body
PF: predicated region fallthrough
CT: control target
= control target key end

     0   :  { %s8470_s6 = smov 1   ;;  %s8471_s10 = smov 2   ;;  %s9693_s0 = inlined_call_operand.smem [shape: u32[32], index: -1, kind: input, shape index: {}] }
   0x1   :  { %s8557_s5 = sld [smem:[%s9693_s0]]   ;;  %s8472_s14 = smov 3  }
   0x2   :  { %s8562_s9 = sld [smem:[%s9693_s0 + %s8470_s6]]   ;;  %s8473_s18 = smov 4  }
   0x3   :  { %s8567_s13 = sld [smem:[%s9693_s0 + %s8471_s10]]   ;;  %s8474_s22 = smov 5  }
   0x4   :  { %s8572_s17 = sld [smem:[%s9693_s0 + %s8472_s14]]   ;;  %s8475_s26 = smov 6  }
   0x5   :  { %s8577_s21 = sld [smem:[%s9693_s0 + %s8473_s18]]   ;;  %s8476_s30 = smov 7  }
   0x6   :  { %s8582_s25 = sld [smem:[%s9693_s0 + %s8474_s22]]   ;;  %s8477_s4 = smov 8  }
   0x7   :  { %9708 = sst [smem:[#allocation68_spill]] %s8557_s5  ;;  %s8478_s10 = smov 9  }
   0x8   :  { %s8587_s29 = sld [smem:[%s9693_s0 + %s8475_s26]]   ;;  %s8479_s15 = smov 10  }
   0x9   :  { %9709 = sst [smem:[#allocation69_spill]] %s8567_s13  ;;  %s8480_s20 = smov 11  }
   0xa   :  { %s8592_s3 = sld [smem:[%s9693_s0 + %s8476_s30]]   ;;  %s8481_s26 = smov 12  }
   0xb   :  { %9710 = sst [smem:[#allocation70_spill]] %s8577_s21  ;;  %s8482_s1 = smov 13  }
   0xc   :  { %s8597_s8 = sld [smem:[%s9693_s0 + %s8477_s4]]   ;;  %s8483_s7 = smov 14  }
   0xd   :  { %s8602_s14 = sld [smem:[%s9693_s0 + %s8478_s10]]   ;;  %s8485_s22 = smov 16  }
   0xe   :  { %9711 = sst [smem:[#allocation71_spill]] %s8587_s29  ;;  %s8486_s28 = smov 17  }
   0xf   :  { %s8607_s19 = sld [smem:[%s9693_s0 + %s8479_s15]]   ;;  %s8484_s15 = smov 15  }
  0x10   :  { %s8612_s24 = sld [smem:[%s9693_s0 + %s8480_s20]]  }
  0x11   :  { %s8617_s30 = sld [smem:[%s9693_s0 + %s8481_s26]]  }
  0x12   :  { %9712 = sst [smem:[#allocation72_spill]] %s8597_s8 }
  0x13   :  { %s8622_s6 = sld [smem:[%s9693_s0 + %s8482_s1]]  }
  0x14   :  { %s8627_s12 = sld [smem:[%s9693_s0 + %s8483_s7]]   ;;  %s8487_s7 = smov 18  }
  0x15   :  { %9713 = sst [smem:[#allocation73_spill]] %s8607_s19 }
  0x16   :  { %s8632_s20 = sld [smem:[%s9693_s0 + %s8484_s15]]   ;;  %s8488_s15 = smov 19  }
  0x17   :  { %9714 = sst [smem:[#allocation74_spill]] %s8617_s30 }
  0x18   :  { %s8637_s27 = sld [smem:[%s9693_s0 + %s8485_s22]]   ;;  %s8489_s22 = smov 20  }
  0x19   :  { %s8642_s4 = sld [smem:[%s9693_s0 + %s8486_s28]]   ;;  %s8490_s28 = smov 21  }
  0x1a   :  { %9715 = sst [smem:[#allocation75_spill]] %s8627_s12 }
  0x1b   :  { %s8647_s12 = sld [smem:[%s9693_s0 + %s8487_s7]]   ;;  %s8491_s7 = smov 22  }
  0x1c   :  { %s8652_s30 = sld [smem:[%s9693_s0 + %s8488_s15]]   ;;  %s8492_s15 = smov 23  }
  0x1d   :  { %s8662_s19 = sld [smem:[%s9693_s0 + %s8490_s28]]   ;;  %s8494_s28 = smov 25  }
  0x1e   :  { %9716 = sst [smem:[#allocation76_spill]] %s8637_s27 }
  0x1f   :  { %s8657_s27 = sld [smem:[%s9693_s0 + %s8489_s22]]   ;;  %s8493_s22 = smov 24  }
  0x20   :  { %s8672_s8 = sld [smem:[%s9693_s0 + %s8492_s15]]   ;;  %s8496_s15 = smov 27  }
  0x21   :  { %9717 = sst [smem:[#allocation77_spill]] %s8647_s12 }
  0x22   :  { %s8667_s12 = sld [smem:[%s9693_s0 + %s8491_s7]]   ;;  %s8495_s7 = smov 26  }
  0x23   :  { %s8682_s29 = sld [smem:[%s9693_s0 + %s8494_s28]]   ;;  %s8498_s28 = smov 29  }
  0x24   :  { %s8692_s21 = sld [smem:[%s9693_s0 + %s8496_s15]]   ;;  %s8500_s15 = smov 31  }
  0x25   :  { %9718 = sst [smem:[#allocation78_spill]] %s8657_s27 }
  0x26   :  { %s8677_s27 = sld [smem:[%s9693_s0 + %s8493_s22]]   ;;  %s8497_s22 = smov 28  }
  0x27   :  { %s8702_s13 = sld [smem:[%s9693_s0 + %s8498_s28]]  }
  0x28   :  { %9719 = sst [smem:[#allocation79_spill]] %s8667_s12 }
  0x29   :  { %s8687_s12 = sld [smem:[%s9693_s0 + %s8495_s7]]   ;;  %s8499_s7 = smov 30  }
  0x2a   :  { %s8712_s5 = sld [smem:[%s9693_s0 + %s8500_s15]]  }
  0x2c   :  { %9720 = sst [smem:[#allocation80_spill]] %s8677_s27 }
  0x2d   :  { %s8697_s27 = sld [smem:[%s9693_s0 + %s8497_s22]]  }
  0x2f   :  { %9721 = sst [smem:[#allocation81_spill]] %s8687_s12 }
  0x30   :  { %s8707_s12 = sld [smem:[%s9693_s0 + %s8499_s7]]  }
  0x31   :  { %68 = vsyncpa [#allocation3], 0 }
  0x32   :  { %69 = vsyncpa [#allocation6], 0 }
  0x33   :  { %70 = vsyncpa [#allocation9], 0 }
  0x34   :  { %71 = vsyncpa [#allocation12], 0 }
  0x35   :  { %72 = vsyncpa [#allocation15], 0 }
  0x36   :  { %73 = vsyncpa [#allocation18], 0 }
  0x37   :  { %74 = vsyncpa [#allocation21], 0 }
  0x38   :  { %75 = vsyncpa [#allocation24], 0 }
  0x39   :  { %76 = vsyncpa [#allocation27], 0 }
  0x3a   :  { %77 = vsyncpa [#allocation30], 0 }
  0x3b   :  { %78 = vsyncpa [#allocation33], 0 }
  0x3c   :  { %79 = vsyncpa [#allocation36], 0 }
  0x3d   :  { %80 = vsyncpa [#allocation39], 0 }
  0x3e   :  { %81 = vsyncpa [#allocation42], 0 }
  0x3f   :  { %82 = vsyncpa [#allocation45], 0 }
  0x40   :  { %83 = vsyncpa [#allocation48], 0 }
  0x41   :  { %84 = vsyncpa [#allocation4], 0  ;;  %s8501_s0 = smov [#allocation5]   ;;  %s8502_s23 = smov [#allocation8]  }
  0x42   :  { %s102_s22 = sshll.u32 %s8501_s0, 4  ;;  %s126_s26 = sshll.u32 %s8502_s23, 4  ;;  %s103_s22 = int_to_ptr.vmem [resolvable:$true] %s102_s22  ;;  %s8714_s26 = int_to_ptr.vmem [resolvable:$true] %s126_s26 }
  0x43   :  { %s7732_s28 = scalar_lea.hbm %s8562_s9, 512 }
  0x44   :  { %p7733_p0 = scmp.ne.s32.totalorder %s8562_s9, %s7732_s28  ;;  %p7736_p1 = scmp.lt.u32.totalorder %s7732_s28, %s8562_s9 }
  0x46   :  { %p7738_p2 = pnand %p7736_p1, %p7733_p0 }
  0x48   :  { %7741 = shalt.err (!%p7738_p2)
}
  0x49   :  { %s7742_s1 = scalar_lea.vmem %s103_s22, 512  ;;  %p7747_p4 = scmp.lt.s32.totalorder %s103_s22, %s103_s22 }
  0x4a   :  { %p7743_p3 = scmp.ne.s32.totalorder %s103_s22, %s7742_s1  ;;  %p7748_p5 = scmp.lt.s32.totalorder %s7742_s1, %s7742_s1 }
  0x4c   :  { %p7749_p6 = por %p7748_p5, %p7747_p4 }
  0x4e   :  { %p7750_p7 = pnand %p7749_p6, %p7743_p3 }
  0x50   :  { %7753 = shalt.err (!%p7750_p7)
}
  0x51   :  { %s8503_s2 = smov 128   ;;  %s8504_s7 = smov 8  }
  0x52   :  { %108 = dma.hbm_to_vmem [thread:$0]  %s8562_s9, 512, %s103_s22, [#allocation6], %s8503_s2, %s8503_s2, %s8504_s7  }
  0x53   :  { %s7754_s10 = scalar_lea.hbm %s8572_s17, 256 }
  0x54   :  { %p7755_p8 = scmp.ne.s32.totalorder %s8572_s17, %s7754_s10  ;;  %p7758_p9 = scmp.lt.u32.totalorder %s7754_s10, %s8572_s17 }
  0x56   :  { %p7760_p10 = pnand %p7758_p9, %p7755_p8 }
  0x58   :  { %7763 = shalt.err (!%p7760_p10)
}
  0x59   :  { %s7764_s11 = scalar_lea.vmem %s8714_s26, 256  ;;  %p7769_p12 = scmp.lt.s32.totalorder %s8714_s26, %s8714_s26 }
  0x5a   :  { %p7765_p11 = scmp.ne.s32.totalorder %s8714_s26, %s7764_s11  ;;  %p7770_p13 = scmp.lt.s32.totalorder %s7764_s11, %s7764_s11 }
  0x5c   :  { %p7771_p0 = por %p7770_p13, %p7769_p12 }
  0x5e   :  { %p7772_p1 = pnand %p7771_p0, %p7765_p11 }
  0x60   :  { %7775 = shalt.err (!%p7772_p1)
}
  0x61   :  { %132 = dma.hbm_to_vmem [thread:$0]  %s8572_s17, 256, %s8714_s26, [#allocation9], %s8503_s2, %s8503_s2, %s8504_s7  }
  0x62   :  { %s8505_s9 = smov [#allocation11]   ;;  %s8506_s16 = smov [#allocation14]  }
  0x63   :  { %s151_s15 = sshll.u32 %s8505_s9, 4  ;;  %s172_s18 = sshll.u32 %s8506_s16, 4  ;;  %s152_s15 = int_to_ptr.vmem [resolvable:$true] %s151_s15  ;;  %s8735_s18 = int_to_ptr.vmem [resolvable:$true] %s172_s18 }
  0x64   :  { %s7776_s0 = scalar_lea.hbm %s8582_s25, 16 }
  0x65   :  { %p7777_p2 = scmp.ne.s32.totalorder %s8582_s25, %s7776_s0  ;;  %p7780_p3 = scmp.lt.u32.totalorder %s7776_s0, %s8582_s25 }
  0x67   :  { %p7782_p4 = pnand %p7780_p3, %p7777_p2 }
  0x69   :  { %7785 = shalt.err (!%p7782_p4)
}
  0x6a   :  { %s7786_s22 = scalar_lea.vmem %s152_s15, 16  ;;  %s7790_s23 = scalar_lea.vmem %s152_s15, 32 }
  0x6b   :  { %p7787_p5 = scmp.ne.s32.totalorder %s152_s15, %s7786_s22  ;;  %p7791_p6 = scmp.lt.s32.totalorder %s152_s15, %s152_s15 }
  0x6c   :  { %p7792_p7 = scmp.lt.s32.totalorder %s7790_s23, %s7786_s22 }
  0x6e   :  { %p7793_p8 = por %p7792_p7, %p7791_p6 }
  0x70   :  { %p7794_p9 = pnand %p7793_p8, %p7787_p5 }
  0x72   :  { %7797 = shalt.err (!%p7794_p9)
}
  0x73   :  { %154 = dma.hbm_to_vmem [thread:$0]  %s8582_s25, 16, %s152_s15, [#allocation12]  }
  0x74   :  { %s7798_s17 = scalar_lea.hbm %s8592_s3, 32 }
  0x75   :  { %p7799_p10 = scmp.ne.s32.totalorder %s8592_s3, %s7798_s17  ;;  %p7802_p11 = scmp.lt.u32.totalorder %s7798_s17, %s8592_s3 }
  0x77   :  { %p7804_p12 = pnand %p7802_p11, %p7799_p10 }
  0x79   :  { %7807 = shalt.err (!%p7804_p12)
}
  0x7a   :  { %s7808_s26 = scalar_lea.vmem %s8735_s18, 32  ;;  %p7813_p0 = scmp.lt.s32.totalorder %s8735_s18, %s8735_s18 }
  0x7b   :  { %p7809_p13 = scmp.ne.s32.totalorder %s8735_s18, %s7808_s26  ;;  %p7814_p1 = scmp.lt.s32.totalorder %s7808_s26, %s7808_s26 }
  0x7d   :  { %p7815_p2 = por %p7814_p1, %p7813_p0 }
  0x7f   :  { %p7816_p3 = pnand %p7815_p2, %p7809_p13 }
  0x81   :  { %7819 = shalt.err (!%p7816_p3)
}
  0x82   :  { %s8507_s28 = smov 16   ;;  %s8508_s25 = smov 1  }
  0x83   :  { %178 = dma.hbm_to_vmem [thread:$0]  %s8592_s3, 32, %s8735_s18, [#allocation15], %s8507_s28, %s8507_s28, %s8508_s25  }
  0x84   :  { %s8509_s1 = smov [#allocation17]   ;;  %s8510_s11 = smov [#allocation20]  }
  0x85   :  { %s196_s10 = sshll.u32 %s8509_s1, 4  ;;  %s220_s9 = sshll.u32 %s8510_s11, 4  ;;  %s197_s10 = int_to_ptr.vmem [resolvable:$true] %s196_s10  ;;  %s8753_s9 = int_to_ptr.vmem [resolvable:$true] %s220_s9 }
  0x86   :  { %s7820_s15 = scalar_lea.hbm %s8602_s14, 1024 }
  0x87   :  { %p7821_p4 = scmp.ne.s32.totalorder %s8602_s14, %s7820_s15  ;;  %p7824_p5 = scmp.lt.u32.totalorder %s7820_s15, %s8602_s14 }
  0x89   :  { %p7826_p6 = pnand %p7824_p5, %p7821_p4 }
  0x8b   :  { %7829 = shalt.err (!%p7826_p6)
}
  0x8c   :  { %s7830_s16 = scalar_lea.vmem %s197_s10, 1024  ;;  %p7835_p8 = scmp.lt.s32.totalorder %s197_s10, %s197_s10 }
  0x8d   :  { %p7831_p7 = scmp.ne.s32.totalorder %s197_s10, %s7830_s16  ;;  %p7836_p9 = scmp.lt.s32.totalorder %s7830_s16, %s7830_s16 }
  0x8f   :  { %p7837_p10 = por %p7836_p9, %p7835_p8 }
  0x91   :  { %p7838_p11 = pnand %p7837_p10, %p7831_p7 }
  0x93   :  { %7841 = shalt.err (!%p7838_p11)
}
  0x94   :  { %202 = dma.hbm_to_vmem [thread:$0]  %s8602_s14, 1024, %s197_s10, [#allocation18], %s8503_s2, %s8503_s2, %s8504_s7  }
  0x95   :  { %s7842_s3 = scalar_lea.hbm %s8612_s24, 1024 }
  0x96   :  { %p7843_p12 = scmp.ne.s32.totalorder %s8612_s24, %s7842_s3  ;;  %p7846_p13 = scmp.lt.u32.totalorder %s7842_s3, %s8612_s24 }
  0x98   :  { %p7848_p0 = pnand %p7846_p13, %p7843_p12 }
  0x9a   :  { %7851 = shalt.err (!%p7848_p0)
}
  0x9b   :  { %s7852_s18 = scalar_lea.vmem %s8753_s9, 1024  ;;  %p7857_p2 = scmp.lt.s32.totalorder %s8753_s9, %s8753_s9 }
  0x9c   :  { %p7853_p1 = scmp.ne.s32.totalorder %s8753_s9, %s7852_s18  ;;  %p7858_p3 = scmp.lt.s32.totalorder %s7852_s18, %s7852_s18 }
  0x9e   :  { %p7859_p4 = por %p7858_p3, %p7857_p2 }
  0xa0   :  { %p7860_p5 = pnand %p7859_p4, %p7853_p1 }
  0xa2   :  { %7863 = shalt.err (!%p7860_p5)
}
  0xa3   :  { %226 = dma.hbm_to_vmem [thread:$0]  %s8612_s24, 1024, %s8753_s9, [#allocation21], %s8503_s2, %s8503_s2, %s8504_s7  }
  0xa4   :  { %s8511_s14 = smov [#allocation23]   ;;  %s8512_s22 = smov [#allocation26]  }
  0xa5   :  { %s244_s0 = sshll.u32 %s8511_s14, 4  ;;  %s268_s23 = sshll.u32 %s8512_s22, 4  ;;  %s245_s0 = int_to_ptr.vmem [resolvable:$true] %s244_s0  ;;  %s8774_s23 = int_to_ptr.vmem [resolvable:$true] %s268_s23 }
  0xa6   :  { %s7864_s17 = scalar_lea.hbm %s8622_s6, 32 }
  0xa7   :  { %p7865_p6 = scmp.ne.s32.totalorder %s8622_s6, %s7864_s17  ;;  %p7868_p7 = scmp.lt.u32.totalorder %s7864_s17, %s8622_s6 }
  0xa9   :  { %p7870_p8 = pnand %p7868_p7, %p7865_p6 }
  0xab   :  { %7873 = shalt.err (!%p7870_p8)
}
  0xac   :  { %s7874_s26 = scalar_lea.vmem %s245_s0, 32  ;;  %p7879_p10 = scmp.lt.s32.totalorder %s245_s0, %s245_s0 }
  0xad   :  { %p7875_p9 = scmp.ne.s32.totalorder %s245_s0, %s7874_s26  ;;  %p7880_p11 = scmp.lt.s32.totalorder %s7874_s26, %s7874_s26 }
  0xaf   :  { %p7881_p12 = por %p7880_p11, %p7879_p10 }
  0xb1   :  { %p7882_p13 = pnand %p7881_p12, %p7875_p9 }
  0xb3   :  { %7885 = shalt.err (!%p7882_p13)
}
  0xb4   :  { %250 = dma.hbm_to_vmem [thread:$0]  %s8622_s6, 32, %s245_s0, [#allocation24], %s8507_s28, %s8507_s28, %s8508_s25  }
  0xb5   :  { %s7886_s24 = scalar_lea.hbm %s8632_s20, 1024 }
  0xb6   :  { %p7887_p0 = scmp.ne.s32.totalorder %s8632_s20, %s7886_s24  ;;  %p7890_p1 = scmp.lt.u32.totalorder %s7886_s24, %s8632_s20 }
  0xb8   :  { %p7892_p2 = pnand %p7890_p1, %p7887_p0 }
  0xba   :  { %7895 = shalt.err (!%p7892_p2)
}
  0xbb   :  { %s7896_s1 = scalar_lea.vmem %s8774_s23, 1024  ;;  %p7901_p4 = scmp.lt.s32.totalorder %s8774_s23, %s8774_s23 }
  0xbc   :  { %p7897_p3 = scmp.ne.s32.totalorder %s8774_s23, %s7896_s1  ;;  %p7902_p5 = scmp.lt.s32.totalorder %s7896_s1, %s7896_s1 }
  0xbe   :  { %p7903_p6 = por %p7902_p5, %p7901_p4 }
  0xc0   :  { %p7904_p7 = pnand %p7903_p6, %p7897_p3 }
  0xc2   :  { %7907 = shalt.err (!%p7904_p7)
}
  0xc3   :  { %274 = dma.hbm_to_vmem [thread:$0]  %s8632_s20, 1024, %s8774_s23, [#allocation27], %s8503_s2, %s8503_s2, %s8504_s7  }
  0xc4   :  { %s8513_s6 = smov [#allocation29]   ;;  %s8514_s11 = smov [#allocation32]  }
  0xc5   :  { %s292_s10 = sshll.u32 %s8513_s6, 4  ;;  %s316_s9 = sshll.u32 %s8514_s11, 4  ;;  %s293_s10 = int_to_ptr.vmem [resolvable:$true] %s292_s10  ;;  %s8795_s9 = int_to_ptr.vmem [resolvable:$true] %s316_s9 }
  0xc6   :  { %s7908_s15 = scalar_lea.hbm %s8642_s4, 1024 }
  0xc7   :  { %p7909_p8 = scmp.ne.s32.totalorder %s8642_s4, %s7908_s15  ;;  %p7912_p9 = scmp.lt.u32.totalorder %s7908_s15, %s8642_s4 }
  0xc9   :  { %p7914_p10 = pnand %p7912_p9, %p7909_p8 }
  0xcb   :  { %7917 = shalt.err (!%p7914_p10)
}
  0xcc   :  { %s7918_s16 = scalar_lea.vmem %s293_s10, 1024  ;;  %p7923_p12 = scmp.lt.s32.totalorder %s293_s10, %s293_s10 }
  0xcd   :  { %p7919_p11 = scmp.ne.s32.totalorder %s293_s10, %s7918_s16  ;;  %p7924_p13 = scmp.lt.s32.totalorder %s7918_s16, %s7918_s16 }
  0xcf   :  { %p7925_p0 = por %p7924_p13, %p7923_p12 }
  0xd1   :  { %p7926_p1 = pnand %p7925_p0, %p7919_p11 }
  0xd3   :  { %7929 = shalt.err (!%p7926_p1)
}
  0xd4   :  { %298 = dma.hbm_to_vmem [thread:$0]  %s8642_s4, 1024, %s293_s10, [#allocation30], %s8503_s2, %s8503_s2, %s8504_s7  }
  0xd5   :  { %s7930_s20 = scalar_lea.hbm %s8652_s30, 1024 }
  0xd6   :  { %p7931_p2 = scmp.ne.s32.totalorder %s8652_s30, %s7930_s20  ;;  %p7934_p3 = scmp.lt.u32.totalorder %s7930_s20, %s8652_s30 }
  0xd8   :  { %p7936_p4 = pnand %p7934_p3, %p7931_p2 }
  0xda   :  { %7939 = shalt.err (!%p7936_p4)
}
  0xdb   :  { %s7940_s3 = scalar_lea.vmem %s8795_s9, 1024  ;;  %p7945_p6 = scmp.lt.s32.totalorder %s8795_s9, %s8795_s9 }
  0xdc   :  { %p7941_p5 = scmp.ne.s32.totalorder %s8795_s9, %s7940_s3  ;;  %p7946_p7 = scmp.lt.s32.totalorder %s7940_s3, %s7940_s3 }
  0xde   :  { %p7947_p8 = por %p7946_p7, %p7945_p6 }
  0xe0   :  { %p7948_p9 = pnand %p7947_p8, %p7941_p5 }
  0xe2   :  { %7951 = shalt.err (!%p7948_p9)
}
  0xe3   :  { %322 = dma.hbm_to_vmem [thread:$0]  %s8652_s30, 1024, %s8795_s9, [#allocation33], %s8503_s2, %s8503_s2, %s8504_s7  }
  0xe4   :  { %s8515_s4 = smov [#allocation35]   ;;  %s8516_s14 = smov [#allocation38]  }
  0xe5   :  { %s340_s18 = sshll.u32 %s8515_s4, 4  ;;  %s364_s0 = sshll.u32 %s8516_s14, 4  ;;  %s341_s18 = int_to_ptr.vmem [resolvable:$true] %s340_s18  ;;  %s8816_s0 = int_to_ptr.vmem [resolvable:$true] %s364_s0 }
  0xe6   :  { %s7952_s22 = scalar_lea.hbm %s8662_s19, 32 }
  0xe7   :  { %p7953_p10 = scmp.ne.s32.totalorder %s8662_s19, %s7952_s22  ;;  %p7956_p11 = scmp.lt.u32.totalorder %s7952_s22, %s8662_s19 }
  0xe9   :  { %p7958_p12 = pnand %p7956_p11, %p7953_p10 }
  0xeb   :  { %7961 = shalt.err (!%p7958_p12)
}
  0xec   :  { %s7962_s23 = scalar_lea.vmem %s341_s18, 32  ;;  %p7967_p0 = scmp.lt.s32.totalorder %s341_s18, %s341_s18 }
  0xed   :  { %p7963_p13 = scmp.ne.s32.totalorder %s341_s18, %s7962_s23  ;;  %p7968_p1 = scmp.lt.s32.totalorder %s7962_s23, %s7962_s23 }
  0xef   :  { %p7969_p2 = por %p7968_p1, %p7967_p0 }
  0xf1   :  { %p7970_p3 = pnand %p7969_p2, %p7963_p13 }
  0xf3   :  { %7973 = shalt.err (!%p7970_p3)
}
  0xf4   :  { %346 = dma.hbm_to_vmem [thread:$0]  %s8662_s19, 32, %s341_s18, [#allocation36], %s8507_s28, %s8507_s28, %s8508_s25  }
  0xf5   :  { %s7974_s30 = scalar_lea.hbm %s8672_s8, 1024 }
  0xf6   :  { %p7975_p4 = scmp.ne.s32.totalorder %s8672_s8, %s7974_s30  ;;  %p7978_p5 = scmp.lt.u32.totalorder %s7974_s30, %s8672_s8 }
  0xf8   :  { %p7980_p6 = pnand %p7978_p5, %p7975_p4 }
  0xfa   :  { %7983 = shalt.err (!%p7980_p6)
}
  0xfb   :  { %s7984_s17 = scalar_lea.vmem %s8816_s0, 1024  ;;  %p7989_p8 = scmp.lt.s32.totalorder %s8816_s0, %s8816_s0 }
  0xfc   :  { %p7985_p7 = scmp.ne.s32.totalorder %s8816_s0, %s7984_s17  ;;  %p7990_p9 = scmp.lt.s32.totalorder %s7984_s17, %s7984_s17 }
  0xfe   :  { %p7991_p10 = por %p7990_p9, %p7989_p8 }
 0x100   :  { %p7992_p11 = pnand %p7991_p10, %p7985_p7 }
 0x102   :  { %7995 = shalt.err (!%p7992_p11)
}
 0x103   :  { %370 = dma.hbm_to_vmem [thread:$0]  %s8672_s8, 1024, %s8816_s0, [#allocation39], %s8503_s2, %s8503_s2, %s8504_s7  }
 0x104   :  { %s8517_s19 = smov [#allocation41]   ;;  %s8518_s24 = smov [#allocation44]  }
 0x105   :  { %s388_s26 = sshll.u32 %s8517_s19, 4  ;;  %s413_s1 = sshll.u32 %s8518_s24, 4  ;;  %s389_s26 = int_to_ptr.vmem [resolvable:$true] %s388_s26  ;;  %s414_s1 = int_to_ptr.vmem [resolvable:$true] %s413_s1 }
 0x106   :  { %s7996_s6 = scalar_lea.hbm %s8682_s29, 2048 }
 0x107   :  { %p7997_p12 = scmp.ne.s32.totalorder %s8682_s29, %s7996_s6  ;;  %p8000_p13 = scmp.lt.u32.totalorder %s7996_s6, %s8682_s29 }
 0x109   :  { %p8002_p0 = pnand %p8000_p13, %p7997_p12 }
 0x10b   :  { %8005 = shalt.err (!%p8002_p0)
}
 0x10c   :  { %s8006_s10 = scalar_lea.vmem %s389_s26, 2048  ;;  %p8011_p2 = scmp.lt.s32.totalorder %s389_s26, %s389_s26 }
 0x10d   :  { %p8007_p1 = scmp.ne.s32.totalorder %s389_s26, %s8006_s10  ;;  %p8012_p3 = scmp.lt.s32.totalorder %s8006_s10, %s8006_s10 }
 0x10f   :  { %p8013_p4 = por %p8012_p3, %p8011_p2 }
 0x111   :  { %p8014_p5 = pnand %p8013_p4, %p8007_p1 }
 0x113   :  { %8017 = shalt.err (!%p8014_p5)
}
 0x114   :  { %394 = dma.hbm_to_vmem [thread:$0]  %s8682_s29, 2048, %s389_s26, [#allocation42], %s8503_s2, %s8503_s2, %s8504_s7  }
 0x115   :  { %s8018_s8 = scalar_lea.hbm %s8692_s21, 16 }
 0x116   :  { %p8019_p6 = scmp.ne.s32.totalorder %s8692_s21, %s8018_s8  ;;  %p8022_p7 = scmp.lt.u32.totalorder %s8018_s8, %s8692_s21 }
 0x118   :  { %p8024_p8 = pnand %p8022_p7, %p8019_p6 }
 0x11a   :  { %8027 = shalt.err (!%p8024_p8)
}
 0x11b   :  { %s8028_s11 = scalar_lea.vmem %s414_s1, 16  ;;  %s8032_s9 = scalar_lea.vmem %s414_s1, 32 }
 0x11c   :  { %p8029_p9 = scmp.ne.s32.totalorder %s414_s1, %s8028_s11  ;;  %p8033_p10 = scmp.lt.s32.totalorder %s414_s1, %s414_s1 }
 0x11d   :  { %p8034_p11 = scmp.lt.s32.totalorder %s8032_s9, %s8028_s11 }
 0x11f   :  { %p8035_p12 = por %p8034_p11, %p8033_p10 }
 0x121   :  { %p8036_p13 = pnand %p8035_p12, %p8029_p9 }
 0x123   :  { %8039 = shalt.err (!%p8036_p13)
}
 0x124   :  { %416 = dma.hbm_to_vmem [thread:$0]  %s8692_s21, 16, %s414_s1, [#allocation45]  }
 0x125   :  { %s8519_s15 = smov [#allocation47]   ;;  %s8520_s16 = smov [#allocation2]  }
 0x126   :  { %s432_s29 = sshll.u32 %s8519_s15, 4  ;;  %s90_s20 = sshll.u32 %s8520_s16, 4  ;;  %s433_s29 = int_to_ptr.vmem [resolvable:$true] %s432_s29  ;;  %s8848_s20 = int_to_ptr.vmem [resolvable:$true] %s90_s20 }
 0x127   :  { %s8040_s3 = scalar_lea.hbm %s8702_s13, 512 }
 0x128   :  { %p8041_p0 = scmp.ne.s32.totalorder %s8702_s13, %s8040_s3  ;;  %p8044_p1 = scmp.lt.u32.totalorder %s8040_s3, %s8702_s13 }
 0x12a   :  { %p8046_p2 = pnand %p8044_p1, %p8041_p0 }
 0x12c   :  { %8049 = shalt.err (!%p8046_p2)
}
 0x12d   :  { %s8050_s4 = scalar_lea.vmem %s433_s29, 512  ;;  %p8055_p4 = scmp.lt.s32.totalorder %s433_s29, %s433_s29 }
 0x12e   :  { %p8051_p3 = scmp.ne.s32.totalorder %s433_s29, %s8050_s4  ;;  %p8056_p5 = scmp.lt.s32.totalorder %s8050_s4, %s8050_s4 }
 0x130   :  { %p8057_p6 = por %p8056_p5, %p8055_p4 }
 0x132   :  { %p8058_p7 = pnand %p8057_p6, %p8051_p3 }
 0x134   :  { %8061 = shalt.err (!%p8058_p7)
}
 0x135   :  { %s9722_s21 = sld [smem:[#allocation68_spill]] }
 0x136   :  { %438 = dma.hbm_to_vmem [thread:$0]  %s8702_s13, 512, %s433_s29, [#allocation48], %s8503_s2, %s8503_s2, %s8504_s7  }
 0x13b   :  { %s8062_s18 = scalar_lea.hbm %s9722_s21, 256 }
 0x13c   :  { %p8063_p8 = scmp.ne.s32.totalorder %s9722_s21, %s8062_s18  ;;  %p8066_p9 = scmp.lt.u32.totalorder %s8062_s18, %s9722_s21 }
 0x13e   :  { %p8068_p10 = pnand %p8066_p9, %p8063_p8 }
 0x140   :  { %8071 = shalt.err (!%p8068_p10)
}
 0x141   :  { %s8072_s14 = scalar_lea.vmem %s8848_s20, 256  ;;  %p8077_p12 = scmp.lt.s32.totalorder %s8848_s20, %s8848_s20 }
 0x142   :  { %p8073_p11 = scmp.ne.s32.totalorder %s8848_s20, %s8072_s14  ;;  %p8078_p13 = scmp.lt.s32.totalorder %s8072_s14, %s8072_s14 }
 0x144   :  { %p8079_p0 = por %p8078_p13, %p8077_p12 }
 0x146   :  { %p8080_p1 = pnand %p8079_p0, %p8073_p11 }
 0x148   :  { %8083 = shalt.err (!%p8080_p1)
}
 0x149   :  { %s9723_s13 = sld [smem:[#allocation69_spill]]  ;;  %s8521_s0 = smov [#allocation7]  }
 0x14a   :  { %96 = dma.hbm_to_vmem [thread:$0]  %s9722_s21, 256, %s8848_s20, [#allocation3], %s8503_s2, %s8503_s2, %s8504_s7  }
 0x14b   :  { %s114_s22 = sshll.u32 %s8521_s0, 4  ;;  %s8522_s23 = smov [#allocation10]   ;;  %s115_s22 = int_to_ptr.vmem [resolvable:$true] %s114_s22 }
 0x14c   :  { %s138_s30 = sshll.u32 %s8522_s23, 4  ;;  %s8869_s30 = int_to_ptr.vmem [resolvable:$true] %s138_s30 }
 0x14f   :  { %s8084_s17 = scalar_lea.hbm %s9723_s13, 256 }
 0x150   :  { %p8085_p2 = scmp.ne.s32.totalorder %s9723_s13, %s8084_s17  ;;  %p8088_p3 = scmp.lt.u32.totalorder %s8084_s17, %s9723_s13 }
 0x152   :  { %p8090_p4 = pnand %p8088_p3, %p8085_p2 }
 0x154   :  { %8093 = shalt.err (!%p8090_p4)
}
 0x155   :  { %s8094_s19 = scalar_lea.vmem %s115_s22, 256  ;;  %p8099_p6 = scmp.lt.s32.totalorder %s115_s22, %s115_s22 }
 0x156   :  { %p8095_p5 = scmp.ne.s32.totalorder %s115_s22, %s8094_s19  ;;  %p8100_p7 = scmp.lt.s32.totalorder %s8094_s19, %s8094_s19 }
 0x158   :  { %p8101_p8 = por %p8100_p7, %p8099_p6 }
 0x15a   :  { %p8102_p9 = pnand %p8101_p8, %p8095_p5 }
 0x15c   :  { %8105 = shalt.err (!%p8102_p9)
}
 0x15d   :  { %s9724_s26 = sld [smem:[#allocation70_spill]] }
 0x15e   :  { %120 = dma.hbm_to_vmem [thread:$0]  %s9723_s13, 256, %s115_s22, [#allocation6], %s8503_s2, %s8503_s2, %s8504_s7  }
 0x163   :  { %s8106_s24 = scalar_lea.hbm %s9724_s26, 256 }
 0x164   :  { %p8107_p10 = scmp.ne.s32.totalorder %s9724_s26, %s8106_s24  ;;  %p8110_p11 = scmp.lt.u32.totalorder %s8106_s24, %s9724_s26 }
 0x166   :  { %p8112_p12 = pnand %p8110_p11, %p8107_p10 }
 0x168   :  { %8115 = shalt.err (!%p8112_p12)
}
 0x169   :  { %s8116_s1 = scalar_lea.vmem %s8869_s30, 256  ;;  %p8121_p0 = scmp.lt.s32.totalorder %s8869_s30, %s8869_s30 }
 0x16a   :  { %p8117_p13 = scmp.ne.s32.totalorder %s8869_s30, %s8116_s1  ;;  %p8122_p1 = scmp.lt.s32.totalorder %s8116_s1, %s8116_s1 }
 0x16c   :  { %p8123_p2 = por %p8122_p1, %p8121_p0 }
 0x16e   :  { %p8124_p3 = pnand %p8123_p2, %p8117_p13 }
 0x170   :  { %8127 = shalt.err (!%p8124_p3)
}
 0x171   :  { %s9725_s6 = sld [smem:[#allocation71_spill]]  ;;  %s8523_s10 = smov [#allocation13]  }
 0x172   :  { %144 = dma.hbm_to_vmem [thread:$0]  %s9724_s26, 256, %s8869_s30, [#allocation9], %s8503_s2, %s8503_s2, %s8504_s7  }
 0x173   :  { %s160_s8 = sshll.u32 %s8523_s10, 4  ;;  %s8524_s11 = smov [#allocation16]   ;;  %s161_s8 = int_to_ptr.vmem [resolvable:$true] %s160_s8 }
 0x174   :  { %s184_s9 = sshll.u32 %s8524_s11, 4  ;;  %s8890_s9 = int_to_ptr.vmem [resolvable:$true] %s184_s9 }
 0x177   :  { %s8128_s15 = scalar_lea.hbm %s9725_s6, 256 }
 0x178   :  { %p8129_p4 = scmp.ne.s32.totalorder %s9725_s6, %s8128_s15  ;;  %p8132_p5 = scmp.lt.u32.totalorder %s8128_s15, %s9725_s6 }
 0x17a   :  { %p8134_p6 = pnand %p8132_p5, %p8129_p4 }
 0x17c   :  { %8137 = shalt.err (!%p8134_p6)
}
 0x17d   :  { %s8138_s29 = scalar_lea.vmem %s161_s8, 256  ;;  %p8143_p8 = scmp.lt.s32.totalorder %s161_s8, %s161_s8 }
 0x17e   :  { %p8139_p7 = scmp.ne.s32.totalorder %s161_s8, %s8138_s29  ;;  %p8144_p9 = scmp.lt.s32.totalorder %s8138_s29, %s8138_s29 }
 0x180   :  { %p8145_p10 = por %p8144_p9, %p8143_p8 }
 0x182   :  { %p8146_p11 = pnand %p8145_p10, %p8139_p7 }
 0x184   :  { %8149 = shalt.err (!%p8146_p11)
}
 0x185   :  { %s9726_s16 = sld [smem:[#allocation72_spill]] }
 0x186   :  { %166 = dma.hbm_to_vmem [thread:$0]  %s9725_s6, 256, %s161_s8, [#allocation12], %s8503_s2, %s8503_s2, %s8504_s7  }
 0x18b   :  { %s8150_s20 = scalar_lea.hbm %s9726_s16, 32 }
 0x18c   :  { %p8151_p12 = scmp.ne.s32.totalorder %s9726_s16, %s8150_s20  ;;  %p8154_p13 = scmp.lt.u32.totalorder %s8150_s20, %s9726_s16 }
 0x18e   :  { %p8156_p0 = pnand %p8154_p13, %p8151_p12 }
 0x190   :  { %8159 = shalt.err (!%p8156_p0)
}
 0x191   :  { %s8160_s3 = scalar_lea.vmem %s8890_s9, 32  ;;  %p8165_p2 = scmp.lt.s32.totalorder %s8890_s9, %s8890_s9 }
 0x192   :  { %p8161_p1 = scmp.ne.s32.totalorder %s8890_s9, %s8160_s3  ;;  %p8166_p3 = scmp.lt.s32.totalorder %s8160_s3, %s8160_s3 }
 0x194   :  { %p8167_p4 = por %p8166_p3, %p8165_p2 }
 0x196   :  { %p8168_p5 = pnand %p8167_p4, %p8161_p1 }
 0x198   :  { %8171 = shalt.err (!%p8168_p5)
}
 0x199   :  { %s9727_s4 = sld [smem:[#allocation73_spill]]  ;;  %s8525_s21 = smov [#allocation19]  }
 0x19a   :  { %190 = dma.hbm_to_vmem [thread:$0]  %s9726_s16, 32, %s8890_s9, [#allocation15], %s8507_s28, %s8507_s28, %s8508_s25  }
 0x19b   :  { %s208_s18 = sshll.u32 %s8525_s21, 4  ;;  %s8526_s14 = smov [#allocation22]   ;;  %s209_s18 = int_to_ptr.vmem [resolvable:$true] %s208_s18 }
 0x19c   :  { %s232_s13 = sshll.u32 %s8526_s14, 4  ;;  %s8911_s13 = int_to_ptr.vmem [resolvable:$true] %s232_s13 }
 0x19f   :  { %s8172_s0 = scalar_lea.hbm %s9727_s4, 32 }
 0x1a0   :  { %p8173_p6 = scmp.ne.s32.totalorder %s9727_s4, %s8172_s0  ;;  %p8176_p7 = scmp.lt.u32.totalorder %s8172_s0, %s9727_s4 }
 0x1a2   :  { %p8178_p8 = pnand %p8176_p7, %p8173_p6 }
 0x1a4   :  { %8181 = shalt.err (!%p8178_p8)
}
 0x1a5   :  { %s8182_s22 = scalar_lea.vmem %s209_s18, 32  ;;  %p8187_p10 = scmp.lt.s32.totalorder %s209_s18, %s209_s18 }
 0x1a6   :  { %p8183_p9 = scmp.ne.s32.totalorder %s209_s18, %s8182_s22  ;;  %p8188_p11 = scmp.lt.s32.totalorder %s8182_s22, %s8182_s22 }
 0x1a8   :  { %p8189_p12 = por %p8188_p11, %p8187_p10 }
 0x1aa   :  { %p8190_p13 = pnand %p8189_p12, %p8183_p9 }
 0x1ac   :  { %8193 = shalt.err (!%p8190_p13)
}
 0x1ad   :  { %s9728_s23 = sld [smem:[#allocation74_spill]] }
 0x1ae   :  { %214 = dma.hbm_to_vmem [thread:$0]  %s9727_s4, 32, %s209_s18, [#allocation18], %s8507_s28, %s8507_s28, %s8508_s25  }
 0x1b3   :  { %s8194_s30 = scalar_lea.hbm %s9728_s23, 32 }
 0x1b4   :  { %p8195_p0 = scmp.ne.s32.totalorder %s9728_s23, %s8194_s30  ;;  %p8198_p1 = scmp.lt.u32.totalorder %s8194_s30, %s9728_s23 }
 0x1b6   :  { %p8200_p2 = pnand %p8198_p1, %p8195_p0 }
 0x1b8   :  { %8203 = shalt.err (!%p8200_p2)
}
 0x1b9   :  { %s8204_s17 = scalar_lea.vmem %s8911_s13, 32  ;;  %p8209_p4 = scmp.lt.s32.totalorder %s8911_s13, %s8911_s13 }
 0x1ba   :  { %p8205_p3 = scmp.ne.s32.totalorder %s8911_s13, %s8204_s17  ;;  %p8210_p5 = scmp.lt.s32.totalorder %s8204_s17, %s8204_s17 }
 0x1bc   :  { %p8211_p6 = por %p8210_p5, %p8209_p4 }
 0x1be   :  { %p8212_p7 = pnand %p8211_p6, %p8205_p3 }
 0x1c0   :  { %8215 = shalt.err (!%p8212_p7)
}
 0x1c1   :  { %s9729_s19 = sld [smem:[#allocation75_spill]]  ;;  %s8527_s26 = smov [#allocation25]  }
 0x1c2   :  { %238 = dma.hbm_to_vmem [thread:$0]  %s9728_s23, 32, %s8911_s13, [#allocation21], %s8507_s28, %s8507_s28, %s8508_s25  }
 0x1c3   :  { %s256_s24 = sshll.u32 %s8527_s26, 4  ;;  %s8528_s1 = smov [#allocation28]   ;;  %s257_s24 = int_to_ptr.vmem [resolvable:$true] %s256_s24 }
 0x1c4   :  { %s280_s6 = sshll.u32 %s8528_s1, 4  ;;  %s8932_s6 = int_to_ptr.vmem [resolvable:$true] %s280_s6 }
 0x1c7   :  { %s8216_s10 = scalar_lea.hbm %s9729_s19, 32 }
 0x1c8   :  { %p8217_p8 = scmp.ne.s32.totalorder %s9729_s19, %s8216_s10  ;;  %p8220_p9 = scmp.lt.u32.totalorder %s8216_s10, %s9729_s19 }
 0x1ca   :  { %p8222_p10 = pnand %p8220_p9, %p8217_p8 }
 0x1cc   :  { %8225 = shalt.err (!%p8222_p10)
}
 0x1cd   :  { %s8226_s8 = scalar_lea.vmem %s257_s24, 32  ;;  %p8231_p12 = scmp.lt.s32.totalorder %s257_s24, %s257_s24 }
 0x1ce   :  { %p8227_p11 = scmp.ne.s32.totalorder %s257_s24, %s8226_s8  ;;  %p8232_p13 = scmp.lt.s32.totalorder %s8226_s8, %s8226_s8 }
 0x1d0   :  { %p8233_p0 = por %p8232_p13, %p8231_p12 }
 0x1d2   :  { %p8234_p1 = pnand %p8233_p0, %p8227_p11 }
 0x1d4   :  { %8237 = shalt.err (!%p8234_p1)
}
 0x1d5   :  { %s9730_s11 = sld [smem:[#allocation76_spill]] }
 0x1d6   :  { %262 = dma.hbm_to_vmem [thread:$0]  %s9729_s19, 32, %s257_s24, [#allocation24], %s8507_s28, %s8507_s28, %s8508_s25  }
 0x1db   :  { %s8238_s9 = scalar_lea.hbm %s9730_s11, 32 }
 0x1dc   :  { %p8239_p2 = scmp.ne.s32.totalorder %s9730_s11, %s8238_s9  ;;  %p8242_p3 = scmp.lt.u32.totalorder %s8238_s9, %s9730_s11 }
 0x1de   :  { %p8244_p4 = pnand %p8242_p3, %p8239_p2 }
 0x1e0   :  { %8247 = shalt.err (!%p8244_p4)
}
 0x1e1   :  { %s8248_s15 = scalar_lea.vmem %s8932_s6, 32  ;;  %p8253_p6 = scmp.lt.s32.totalorder %s8932_s6, %s8932_s6 }
 0x1e2   :  { %p8249_p5 = scmp.ne.s32.totalorder %s8932_s6, %s8248_s15  ;;  %p8254_p7 = scmp.lt.s32.totalorder %s8248_s15, %s8248_s15 }
 0x1e4   :  { %p8255_p8 = por %p8254_p7, %p8253_p6 }
 0x1e6   :  { %p8256_p9 = pnand %p8255_p8, %p8249_p5 }
 0x1e8   :  { %8259 = shalt.err (!%p8256_p9)
}
 0x1e9   :  { %s9731_s29 = sld [smem:[#allocation77_spill]]  ;;  %s8529_s16 = smov [#allocation31]  }
 0x1ea   :  { %286 = dma.hbm_to_vmem [thread:$0]  %s9730_s11, 32, %s8932_s6, [#allocation27], %s8507_s28, %s8507_s28, %s8508_s25  }
 0x1eb   :  { %s304_s20 = sshll.u32 %s8529_s16, 4  ;;  %s8530_s3 = smov [#allocation34]   ;;  %s305_s20 = int_to_ptr.vmem [resolvable:$true] %s304_s20 }
 0x1ec   :  { %s328_s4 = sshll.u32 %s8530_s3, 4  ;;  %s8953_s4 = int_to_ptr.vmem [resolvable:$true] %s328_s4 }
 0x1ef   :  { %s8260_s21 = scalar_lea.hbm %s9731_s29, 32 }
 0x1f0   :  { %p8261_p10 = scmp.ne.s32.totalorder %s9731_s29, %s8260_s21  ;;  %p8264_p11 = scmp.lt.u32.totalorder %s8260_s21, %s9731_s29 }
 0x1f2   :  { %p8266_p12 = pnand %p8264_p11, %p8261_p10 }
 0x1f4   :  { %8269 = shalt.err (!%p8266_p12)
}
 0x1f5   :  { %s8270_s18 = scalar_lea.vmem %s305_s20, 32  ;;  %p8275_p0 = scmp.lt.s32.totalorder %s305_s20, %s305_s20 }
 0x1f6   :  { %p8271_p13 = scmp.ne.s32.totalorder %s305_s20, %s8270_s18  ;;  %p8276_p1 = scmp.lt.s32.totalorder %s8270_s18, %s8270_s18 }
 0x1f8   :  { %p8277_p2 = por %p8276_p1, %p8275_p0 }
 0x1fa   :  { %p8278_p3 = pnand %p8277_p2, %p8271_p13 }
 0x1fc   :  { %8281 = shalt.err (!%p8278_p3)
}
 0x1fd   :  { %s9732_s14 = sld [smem:[#allocation78_spill]] }
 0x1fe   :  { %310 = dma.hbm_to_vmem [thread:$0]  %s9731_s29, 32, %s305_s20, [#allocation30], %s8507_s28, %s8507_s28, %s8508_s25  }
 0x203   :  { %s8282_s13 = scalar_lea.hbm %s9732_s14, 32 }
 0x204   :  { %p8283_p4 = scmp.ne.s32.totalorder %s9732_s14, %s8282_s13  ;;  %p8286_p5 = scmp.lt.u32.totalorder %s8282_s13, %s9732_s14 }
 0x206   :  { %p8288_p6 = pnand %p8286_p5, %p8283_p4 }
 0x208   :  { %8291 = shalt.err (!%p8288_p6)
}
 0x209   :  { %s8292_s0 = scalar_lea.vmem %s8953_s4, 32  ;;  %p8297_p8 = scmp.lt.s32.totalorder %s8953_s4, %s8953_s4 }
 0x20a   :  { %p8293_p7 = scmp.ne.s32.totalorder %s8953_s4, %s8292_s0  ;;  %p8298_p9 = scmp.lt.s32.totalorder %s8292_s0, %s8292_s0 }
 0x20c   :  { %p8299_p10 = por %p8298_p9, %p8297_p8 }
 0x20e   :  { %p8300_p11 = pnand %p8299_p10, %p8293_p7 }
 0x210   :  { %8303 = shalt.err (!%p8300_p11)
}
 0x211   :  { %s9733_s22 = sld [smem:[#allocation79_spill]]  ;;  %s8531_s23 = smov [#allocation37]  }
 0x212   :  { %334 = dma.hbm_to_vmem [thread:$0]  %s9732_s14, 32, %s8953_s4, [#allocation33], %s8507_s28, %s8507_s28, %s8508_s25  }
 0x213   :  { %s352_s30 = sshll.u32 %s8531_s23, 4  ;;  %s8532_s17 = smov [#allocation40]   ;;  %s353_s30 = int_to_ptr.vmem [resolvable:$true] %s352_s30 }
 0x214   :  { %s376_s19 = sshll.u32 %s8532_s17, 4  ;;  %s8974_s19 = int_to_ptr.vmem [resolvable:$true] %s376_s19 }
 0x217   :  { %s8304_s26 = scalar_lea.hbm %s9733_s22, 32 }
 0x218   :  { %p8305_p12 = scmp.ne.s32.totalorder %s9733_s22, %s8304_s26  ;;  %p8308_p13 = scmp.lt.u32.totalorder %s8304_s26, %s9733_s22 }
 0x21a   :  { %p8310_p0 = pnand %p8308_p13, %p8305_p12 }
 0x21c   :  { %8313 = shalt.err (!%p8310_p0)
}
 0x21d   :  { %s8314_s24 = scalar_lea.vmem %s353_s30, 32  ;;  %p8319_p2 = scmp.lt.s32.totalorder %s353_s30, %s353_s30 }
 0x21e   :  { %p8315_p1 = scmp.ne.s32.totalorder %s353_s30, %s8314_s24  ;;  %p8320_p3 = scmp.lt.s32.totalorder %s8314_s24, %s8314_s24 }
 0x220   :  { %p8321_p4 = por %p8320_p3, %p8319_p2 }
 0x222   :  { %p8322_p5 = pnand %p8321_p4, %p8315_p1 }
 0x224   :  { %8325 = shalt.err (!%p8322_p5)
}
 0x225   :  { %s9734_s1 = sld [smem:[#allocation80_spill]] }
 0x226   :  { %358 = dma.hbm_to_vmem [thread:$0]  %s9733_s22, 32, %s353_s30, [#allocation36], %s8507_s28, %s8507_s28, %s8508_s25  }
 0x22b   :  { %s8326_s6 = scalar_lea.hbm %s9734_s1, 32 }
 0x22c   :  { %p8327_p6 = scmp.ne.s32.totalorder %s9734_s1, %s8326_s6  ;;  %p8330_p7 = scmp.lt.u32.totalorder %s8326_s6, %s9734_s1 }
 0x22e   :  { %p8332_p8 = pnand %p8330_p7, %p8327_p6 }
 0x230   :  { %8335 = shalt.err (!%p8332_p8)
}
 0x231   :  { %s8336_s10 = scalar_lea.vmem %s8974_s19, 32  ;;  %p8341_p10 = scmp.lt.s32.totalorder %s8974_s19, %s8974_s19 }
 0x232   :  { %p8337_p9 = scmp.ne.s32.totalorder %s8974_s19, %s8336_s10  ;;  %p8342_p11 = scmp.lt.s32.totalorder %s8336_s10, %s8336_s10 }
 0x234   :  { %p8343_p12 = por %p8342_p11, %p8341_p10 }
 0x236   :  { %p8344_p13 = pnand %p8343_p12, %p8337_p9 }
 0x238   :  { %8347 = shalt.err (!%p8344_p13)
}
 0x239   :  { %s9735_s8 = sld [smem:[#allocation81_spill]]  ;;  %s8533_s11 = smov [#allocation43]  }
 0x23a   :  { %382 = dma.hbm_to_vmem [thread:$0]  %s9734_s1, 32, %s8974_s19, [#allocation39], %s8507_s28, %s8507_s28, %s8508_s25  }
 0x23b   :  { %s400_s9 = sshll.u32 %s8533_s11, 4  ;;  %s8534_s15 = smov [#allocation46]   ;;  %s401_s9 = int_to_ptr.vmem [resolvable:$true] %s400_s9 }
 0x23c   :  { %s423_s29 = sshll.u32 %s8534_s15, 4  ;;  %s424_s29 = int_to_ptr.vmem [resolvable:$true] %s423_s29 }
 0x23f   :  { %s8348_s16 = scalar_lea.hbm %s9735_s8, 32 }
 0x240   :  { %p8349_p0 = scmp.ne.s32.totalorder %s9735_s8, %s8348_s16  ;;  %p8352_p1 = scmp.lt.u32.totalorder %s8348_s16, %s9735_s8 }
 0x242   :  { %p8354_p2 = pnand %p8352_p1, %p8349_p0 }
 0x244   :  { %8357 = shalt.err (!%p8354_p2)
}
 0x245   :  { %s8358_s20 = scalar_lea.vmem %s401_s9, 32  ;;  %p8363_p4 = scmp.lt.s32.totalorder %s401_s9, %s401_s9 }
 0x246   :  { %p8359_p3 = scmp.ne.s32.totalorder %s401_s9, %s8358_s20  ;;  %p8364_p5 = scmp.lt.s32.totalorder %s8358_s20, %s8358_s20 }
 0x248   :  { %p8365_p6 = por %p8364_p5, %p8363_p4 }
 0x24a   :  { %p8366_p7 = pnand %p8365_p6, %p8359_p3 }
 0x24c   :  { %8369 = shalt.err (!%p8366_p7)
}
 0x24d   :  { %406 = dma.hbm_to_vmem [thread:$0]  %s9735_s8, 32, %s401_s9, [#allocation42], %s8507_s28, %s8507_s28, %s8508_s25  }
 0x24e   :  { %s8370_s3 = scalar_lea.hbm %s8697_s27, 16 }
 0x24f   :  { %p8371_p8 = scmp.ne.s32.totalorder %s8697_s27, %s8370_s3  ;;  %p8374_p9 = scmp.lt.u32.totalorder %s8370_s3, %s8697_s27 }
 0x251   :  { %p8376_p10 = pnand %p8374_p9, %p8371_p8 }
 0x253   :  { %8379 = shalt.err (!%p8376_p10)
}
 0x254   :  { %s8380_s4 = scalar_lea.vmem %s424_s29, 16  ;;  %s8384_s21 = scalar_lea.vmem %s424_s29, 32 }
 0x255   :  { %p8381_p11 = scmp.ne.s32.totalorder %s424_s29, %s8380_s4  ;;  %p8385_p12 = scmp.lt.s32.totalorder %s424_s29, %s424_s29 }
 0x256   :  { %p8386_p13 = scmp.lt.s32.totalorder %s8384_s21, %s8380_s4 }
 0x258   :  { %p8387_p0 = por %p8386_p13, %p8385_p12 }
 0x25a   :  { %p8388_p1 = pnand %p8387_p0, %p8381_p11 }
 0x25c   :  { %8391 = shalt.err (!%p8388_p1)
}
 0x25d   :  { %426 = dma.hbm_to_vmem [thread:$0]  %s8697_s27, 16, %s424_s29, [#allocation45]  }
 0x25e   :  { %s8535_s18 = smov [#allocation49]   ;;  %s8392_s14 = scalar_lea.hbm %s8707_s12, 16 }
 0x25f   :  { %s445_s25 = sshll.u32 %s8535_s18, 4  ;;  %p8393_p2 = scmp.ne.s32.totalorder %s8707_s12, %s8392_s14  ;;  %s446_s25 = int_to_ptr.vmem [resolvable:$true] %s445_s25 }
 0x260   :  { %p8396_p3 = scmp.lt.u32.totalorder %s8392_s14, %s8707_s12 }
 0x262   :  { %p8398_p4 = pnand %p8396_p3, %p8393_p2 }
 0x264   :  { %8401 = shalt.err (!%p8398_p4)
}
 0x265   :  { %s8402_s13 = scalar_lea.vmem %s446_s25, 16  ;;  %s8406_s0 = scalar_lea.vmem %s446_s25, 32 }
 0x266   :  { %p8403_p5 = scmp.ne.s32.totalorder %s446_s25, %s8402_s13  ;;  %p8407_p6 = scmp.lt.s32.totalorder %s446_s25, %s446_s25 }
 0x267   :  { %p8408_p7 = scmp.lt.s32.totalorder %s8406_s0, %s8402_s13 }
 0x269   :  { %p8409_p8 = por %p8408_p7, %p8407_p6 }
 0x26b   :  { %p8410_p9 = pnand %p8409_p8, %p8403_p5 }
 0x26d   :  { %8413 = shalt.err (!%p8410_p9)
}
 0x26e   :  { %448 = dma.hbm_to_vmem [thread:$0]  %s8707_s12, 16, %s446_s25, [#allocation48]  }
 0x26f   :  { %8436 = dma.done.wait [#allocation3], 256  }
 0x270   :  { %8437 = vsyncadd [#allocation3], 4294967040 }
 0x271   :  { %8438 = dma.done.wait [#allocation6], 768  }
 0x272   :  { %8439 = vsyncadd [#allocation6], 4294966528 }
 0x273   :  { %8440 = dma.done.wait [#allocation9], 512  }
 0x274   :  { %8441 = vsyncadd [#allocation9], 4294966784 }
 0x275   :  { %8442 = dma.done.wait [#allocation12], 272  }
 0x276   :  { %8443 = vsyncadd [#allocation12], 4294967024 }
 0x277   :  { %8444 = dma.done.wait [#allocation15], 64  }
 0x278   :  { %8445 = vsyncadd [#allocation15], 4294967232 }
 0x279   :  { %8446 = dma.done.wait [#allocation18], 1056  }
 0x27a   :  { %8447 = vsyncadd [#allocation18], 4294966240 }
 0x27b   :  { %8448 = dma.done.wait [#allocation21], 1056  }
 0x27c   :  { %8449 = vsyncadd [#allocation21], 4294966240 }
 0x27d   :  { %8450 = dma.done.wait [#allocation24], 64  }
 0x27e   :  { %8451 = vsyncadd [#allocation24], 4294967232 }
 0x27f   :  { %8452 = dma.done.wait [#allocation27], 1056  }
 0x280   :  { %8453 = vsyncadd [#allocation27], 4294966240 }
 0x281   :  { %8454 = dma.done.wait [#allocation30], 1056  }
 0x282   :  { %8455 = vsyncadd [#allocation30], 4294966240 }
 0x283   :  { %8456 = dma.done.wait [#allocation33], 1056  }
 0x284   :  { %8457 = vsyncadd [#allocation33], 4294966240 }
 0x285   :  { %8458 = dma.done.wait [#allocation36], 64  }
 0x286   :  { %8459 = vsyncadd [#allocation36], 4294967232 }
 0x287   :  { %8460 = dma.done.wait [#allocation39], 1056  }
 0x288   :  { %8461 = vsyncadd [#allocation39], 4294966240 }
 0x289   :  { %8462 = dma.done.wait [#allocation42], 2080  }
 0x28a   :  { %8463 = vsyncadd [#allocation42], 4294965216 }
 0x28b   :  { %8464 = dma.done.wait [#allocation45], 32  }
 0x28c   :  { %8465 = vsyncadd [#allocation45], 4294967264 }
 0x28d   :  { %8466 = dma.done.wait [#allocation48], 528  }
 0x28e   :  { %8467 = vsyncadd [#allocation48], 4294966768  ;;  %vm553_vm0 = vcmask 130048   ;;  %v544_v0 = vld [vmem:[#allocation10] sm:$0xff]  ;;  %v545_v1 = vld [vmem:[#allocation10 + $0x8] sm:$0xff]  ;;  %vm651_vm1 = vcmask 261120  }
 0x28f   :  { %v542_v2 = vld [vmem:[#allocation2] sm:$0xff]  ;;  %v6889_v3 = vpack.c.bf16 %v545_v1, %v544_v0  ;;  %v543_v4 = vld [vmem:[#allocation2 + $0x8] sm:$0xff]  ;;  %v695_v28 = vld [vmem:[#allocation17] sm:$0xff]  ;;  %vm793_vm2 = vcmask 64512   ;;  %s8536_s12 = smov 88   ;;  %s8537_s27 = smov 96  }
 0x290   :  { %6411 = vmatprep.mubr.msk.f32.mxu0 %vm553_vm0, %v542_v2  ;;  %v5963_v5 = vld [vmem:[#allocation11] ss:$0 sm:$0xff]  ;;  %v637_v10 = vld [vmem:[#allocation13] sm:$0xff]  ;;  %v638_v13 = vld [vmem:[#allocation13 + $0x8] sm:$0xff]  ;;  %s8538_s22 = smov 120   ;;  %s8539_s23 = smov 56  }
 0x291   :  { %6890 = vmatprep.subr.bf16.mxu0 %v6889_v3  ;;  %v696_v29 = vld [vmem:[#allocation17 + $0x8] sm:$0xff]  ;;  %v697_v30 = vld [vmem:[#allocation17 + $0x10] sm:$0xff]  ;;  %v698_v32 = vld [vmem:[#allocation17 + $0x18] sm:$0xff]  ;;  %s8540_s30 = smov 64   ;;  %s8541_s17 = smov 80   ;;  %vm1630_vm4 = vcmask 195584  }
 0x292   :  { %6892 = vmatpush3.bf16.msra.mxu0 %v6889_v3  ;;  %v6893_v31 = vpack.c.bf16 %v696_v29, %v695_v28  ;;  %v6897_v33 = vpack.c.bf16 %v698_v32, %v697_v30  ;;  %v5966_v41 = vld [vmem:[#allocation14] ss:$0 sm:$0xff]  ;;  %v5967_v43 = vld [vmem:[#allocation16] ss:$0 sm:$0xff]  ;;  %v5968_v50 = vld [vmem:[#allocation19] ss:$0 sm:$0xff] }
 0x293   :  { %vm9046_vm3 = vmpackc.low %vm793_vm2, %vm793_vm2  ;;  %s8542_s19 = smov 112   ;;  %s8543_s26 = smov 48   ;;  %vm3111_vm5 = vcmask 523264  }
 0x294   :  { %6894 = vmatprep.subr.bf16.mxu1 %v6893_v31  ;;  %s8544_s24 = smov 104   ;;  %s8545_s1 = smov 72  }
 0x295   :  { %6412 = vmatmul.mubr.msk.f32.vlgmr.msra.gmra.mrb[0].mxu0 %vm553_vm0, %v543_v4  ;;  %6896 = vmatpush3.bf16.msra.mxu1 %v6893_v31  ;;  %v9062_v4 = vld [vmem:[#allocation7 + $0x8] sm:$0xff]  ;;  %s8546_s6 = smov 40   ;;  %s8547_s10 = smov 24  }
 0x296   :  { %6898 = vmatprep.subr.bf16.mxu1 %v6897_v33 }
 0x299   :  { %6900 = vmatpush3.bf16.msra.mxu1 %v6897_v33 }
 0x368   :  { %v6413_v6 = vpop.f32.mrb[0].mxu0 }
 0x369   :  { %v632_v7 = vadd.f32 %v6413_v6, %v5963_v5  ;;  %v626_v8 = vpop.f32.mrb[1].mxu0 }
 0x36a   :  { %v627_v9 = vadd.f32 %v5963_v5, %v626_v8 }
 0x36b   :  { %v636_v11 = vmul.f32 5.656854, %v632_v7  ;;  %v9064_v7 = vld [vmem:[#allocation7] sm:$0xff] }
 0x36c   :  { %v635_v12 = vmul.f32 5.656854, %v627_v9 }
 0x36d   :  { %v9014_v15 = vadd.f32 %v638_v13, %v636_v11 }
 0x36e   :  { %v9012_v14 = vadd.f32 %v637_v10, %v635_v12 }
 0x36f   :  { %v655_v17 = vsel %vm651_vm1, %v9014_v15, 0.0 }
 0x370   :  { %v652_v16 = vsel %vm651_vm1, %v9012_v14, 0.0 }
 0x371   :  { %653 = vadd.xlane.f32.xlu0 %v652_v16 }
 0x375   :  { %656 = vadd.xlane.f32.xlu0 %v655_v17 }
 0x3fe   :  { %v654_v18 = vpop.xlane.xlu0 %653 }
 0x3ff   :  { %v659_v19 = vmul.f32 0.03125, %v654_v18 }
 0x401   :  { %v661_v20 = vsub.f32 %v9012_v14, %v659_v19 }
 0x402   :  { %v657_v21 = vpop.xlane.xlu0 %656 }
 0x403   :  { %v660_v22 = vmul.f32 0.03125, %v657_v21  ;;  %v663_v23 = vmul.f32 %v661_v20, %v661_v20 }
 0x405   :  { %v662_v24 = vsub.f32 %v9014_v15, %v660_v22  ;;  %v665_v25 = vsel %vm651_vm1, %v663_v23, 0.0 }
 0x406   :  { %666 = vadd.xlane.f32.xlu1 %v665_v25 }
 0x407   :  { %v664_v26 = vmul.f32 %v662_v24, %v662_v24 }
 0x409   :  { %v668_v27 = vsel %vm651_vm1, %v664_v26, 0.0 }
 0x40a   :  { %669 = vadd.xlane.f32.xlu1 %v668_v27 }
 0x493   :  { %v667_v34 = vpop.xlane.xlu1 %666 }
 0x494   :  { %v671_v35 = vmul.f32 0.03125, %v667_v34 }
 0x496   :  { %v673_v36 = vadd.f32 1e-05, %v671_v35 }
 0x497   :  { %v670_v37 = vpop.xlane.xlu1 %669 }
 0x498   :  { %7568 = vrsqrt.f32 %v673_v36  ;;  %v672_v38 = vmul.f32 0.03125, %v670_v37 }
 0x49a   :  { %v674_v39 = vadd.f32 1e-05, %v672_v38 }
 0x49c   :  { %7570 = vrsqrt.f32 %v674_v39 }
 0x4a2   :  { %v7569_v40 = vpop.eup %7568 }
 0x4a3   :  { %v677_v42 = vmul.f32 %v7569_v40, %v661_v20 }
 0x4a5   :  { %v685_v44 = vmul.f32 %v5966_v41, %v677_v42 }
 0x4a6   :  { %v7571_v45 = vpop.eup %7570 }
 0x4a7   :  { %v678_v46 = vmul.f32 %v7571_v45, %v662_v24  ;;  %v693_v47 = vadd.f32 %v5967_v43, %v685_v44 }
 0x4a9   :  { %v686_v48 = vmul.f32 %v5966_v41, %v678_v46  ;;  %6422 = vmatprep.mubr.msk.f32.mxu1 %vm651_vm1, %v693_v47 }
 0x4ab   :  { %v694_v49 = vadd.f32 %v5967_v43, %v686_v48 }
 0x4ad   :  { %6423 = vmatmul.mubr.msk.f32.vlgmr.msra.gmra.mrb[0].mxu1 %vm651_vm1, %v694_v49 }
 0x580   :  { %v6424_v51 = vpop.f32.mrb[0].mxu1 }
 0x581   :  { %v9026_v52 = vadd.f32 %v6424_v51, %v5968_v50  ;;  %v778_v53 = vpop.f32.mrb[1].mxu1 }
 0x582   :  { %v9028_v54 = vadd.f32 %v5968_v50, %v778_v53 }
 0x584   :  { %6429 = vmatprep.mubr.msk.f32.mxu0 %vm793_vm2, %v9028_v54  ;;  %v9034_v55 = vpack.i.bf16 %v9026_v52, %v9028_v54 }
 0x586   :  { %7354 = vrot.lane.b32.xlu1 %v9034_v55, %s8536_s12  ;;  %7349 = vrot.lane.b32.xlu0 %v9034_v55, %s8537_s27 }
 0x58a   :  { %990 = vrot.lane.b32.xlu1 %v9028_v54, %s8538_s22 }
 0x58e   :  { %992 = vrot.lane.b32.xlu1 %v9026_v52, %s8538_s22 }
 0x5f8   :  { %v7355_v56 = vpop.permute.xlu1 %7354  ;;  %v7350_v57 = vpop.permute.xlu0 %7349 }
 0x5f9   :  { %v7357_v58 = vunpack.i.h.bf16 %v7355_v56  ;;  %v7356_v59 = vunpack.i.l.bf16 %v7355_v56  ;;  %v7352_v60 = vunpack.i.h.bf16 %v7350_v57  ;;  %v7351_v61 = vunpack.i.l.bf16 %v7350_v57 }
 0x5fb   :  { %v6901_v63 = vpack.c.bf16 %v7352_v60, %v7351_v61  ;;  %v6911_v0 = vpack.c.bf16 %v7357_v58, %v7356_v59 }
 0x5fc   :  { %v991_v1 = vpop.permute.xlu1 %990 }
 0x5fd   :  { %6903 = vmatprep.subr.msk.bf16.mxu0 %vm9046_vm3, %v6901_v63 }
 0x5fe   :  { %6906 = vmatpush3.bf16.xpose.msk.msra.mxu0 %vm9046_vm3, %v6901_v63 }
 0x5ff   :  { %6913 = vmatprep.subr.msk.bf16.mxu0 %vm9046_vm3, %v6911_v0 }
 0x600   :  { %v993_v2 = vpop.permute.xlu1 %992 }
 0x605   :  { %6430 = vmatmul.mubr.msk.f32.vlgmr.msra.gmra.mrb[2].mxu0 %vm793_vm2, %v9026_v52 }
 0x606   :  { %6916 = vmatpush3.bf16.xpose.msk.msra.mxu0 %vm9046_vm3, %v6911_v0  ;;  %6443 = vmatprep.mubr.msk.f32.mxu0 %vm793_vm2, %v991_v1 }
 0x60d   :  { %6444 = vmatmul.mubr.msk.f32.vlgmr.msra.gmra.mrb[4].mxu0 %vm793_vm2, %v993_v2 }
 0x6d8   :  { %v6431_v3 = vpop.f32.mrb[2].mxu0 }
 0x6d9   :  { %v878_v5 = vmul.f32 0.35355338, %v6431_v3  ;;  %v868_v6 = vpop.f32.mrb[3].mxu0 }
 0x6da   :  { %v877_v8 = vmul.f32 0.35355338, %v868_v6 }
 0x6db   :  { %v880_v9 = vadd.f32 %v878_v5, %v9062_v4 }
 0x6dc   :  { %v879_v10 = vadd.f32 %v877_v8, %v9064_v7 }
 0x6dd   :  { %v884_v11 = vsel %vm553_vm0, %v880_v9, -inf }
 0x6de   :  { %885 = vmax.xlane.f32.xlu1 %v884_v11  ;;  %v881_v12 = vsel %vm553_vm0, %v879_v10, -inf }
 0x6df   :  { %882 = vmax.xlane.f32.xlu0 %v881_v12 }
 0x6e0   :  { %v6445_v13 = vpop.f32.mrb[4].mxu0 }
 0x6e1   :  { %v1072_v16 = vpop.f32.mrb[5].mxu0  ;;  %v1082_v17 = vmul.f32 0.35355338, %v6445_v13 }
 0x6e2   :  { %v1081_v18 = vmul.f32 0.35355338, %v1072_v16 }
 0x6e3   :  { %v1084_v21 = vadd.f32 %v1082_v17, %v9062_v4 }
 0x6e4   :  { %v1083_v19 = vadd.f32 %v1081_v18, %v9064_v7 }
 0x6e5   :  { %v1088_v22 = vsel %vm553_vm0, %v1084_v21, -inf }
 0x6e6   :  { %v1085_v20 = vsel %vm553_vm0, %v1083_v19, -inf }
 0x6e7   :  { %1086 = vmax.xlane.f32.xlu0 %v1085_v20 }
 0x6eb   :  { %1089 = vmax.xlane.f32.xlu0 %v1088_v22 }
 0x76b   :  { %v886_v23 = vpop.xlane.xlu1 %885 }
 0x76c   :  { %v888_v24 = vsub.f32 %v880_v9, %v886_v23  ;;  %v883_v25 = vpop.xlane.xlu0 %882 }
 0x76d   :  { %v887_v26 = vsub.f32 %v879_v10, %v883_v25 }
 0x76e   :  { %v891_v27 = vmul.f32 1.442695, %v888_v24 }
 0x76f   :  { %v889_v28 = vmul.f32 1.442695, %v887_v26 }
 0x770   :  { %7572 = vpow2.f32 %v891_v27 }
 0x771   :  { %7574 = vpow2.f32 %v889_v28 }
 0x774   :  { %v1087_v29 = vpop.xlane.xlu0 %1086 }
 0x775   :  { %v1091_v30 = vsub.f32 %v1083_v19, %v1087_v29 }
 0x777   :  { %v1093_v31 = vmul.f32 1.442695, %v1091_v30 }
 0x778   :  { %v1090_v32 = vpop.xlane.xlu0 %1089 }
 0x779   :  { %7576 = vpow2.f32 %v1093_v31  ;;  %v1092_v33 = vsub.f32 %v1084_v21, %v1090_v32 }
 0x77a   :  { %v7573_v34 = vpop.eup %7572 }
 0x77b   :  { %v7575_v35 = vpop.eup %7574  ;;  %v1095_v36 = vmul.f32 1.442695, %v1092_v33  ;;  %v896_v37 = vsel %vm553_vm0, %v7573_v34, 0.0 }
 0x77c   :  { %897 = vadd.xlane.f32.xlu1 %v896_v37  ;;  %v893_v38 = vsel %vm553_vm0, %v7575_v35, 0.0 }
 0x77d   :  { %7578 = vpow2.f32 %v1095_v36  ;;  %894 = vadd.xlane.f32.xlu0 %v893_v38 }
 0x783   :  { %v7577_v39 = vpop.eup %7576 }
 0x784   :  { %v1097_v40 = vsel %vm553_vm0, %v7577_v39, 0.0 }
 0x785   :  { %1098 = vadd.xlane.f32.xlu0 %v1097_v40 }
 0x787   :  { %v7579_v41 = vpop.eup %7578 }
 0x788   :  { %v1100_v42 = vsel %vm553_vm0, %v7579_v41, 0.0 }
 0x789   :  { %1101 = vadd.xlane.f32.xlu1 %v1100_v42 }
 0x79a   :  { %7364 = vrot.lane.b32.xlu1 %v9034_v55, %s8539_s23 }
 0x79b   :  { %7359 = vrot.lane.b32.xlu0 %v9034_v55, %s8540_s30 }
 0x79e   :  { %7369 = vrot.lane.b32.xlu1 %v9034_v55, %s8541_s17 }
 0x79f   :  { %1196 = vrot.lane.b32.xlu0 %v9026_v52, %s8542_s19 }
 0x7a2   :  { %1194 = vrot.lane.b32.xlu1 %v9028_v54, %s8542_s19 }
 0x809   :  { %v898_v44 = vpop.xlane.xlu1 %897 }
 0x80a   :  { %v895_v43 = vpop.xlane.xlu0 %894 }
 0x80b   :  { %7580 = vrcp.f32 %v895_v43 }
 0x80c   :  { %7582 = vrcp.f32 %v898_v44 }
 0x812   :  { %v1099_v45 = vpop.xlane.xlu0 %1098 }
 0x813   :  { %7584 = vrcp.f32 %v1099_v45 }
 0x815   :  { %v7581_v46 = vpop.eup %7580 }
 0x816   :  { %v1102_v47 = vpop.xlane.xlu1 %1101  ;;  %v7360_v48 = vpop.permute.xlu0 %7359  ;;  %v901_v49 = vmul.f32 %v7581_v46, %v7575_v35 }
 0x817   :  { %7586 = vrcp.f32 %v1102_v47  ;;  %v7362_v50 = vunpack.i.h.bf16 %v7360_v48  ;;  %v7361_v51 = vunpack.i.l.bf16 %v7360_v48  ;;  %v7583_v56 = vpop.eup %7582 }
 0x818   :  { %6436 = vmatprep.mubr.msk.f32.mxu1 %vm553_vm0, %v901_v49  ;;  %v902_v61 = vmul.f32 %v7583_v56, %v7573_v34 }
 0x819   :  { %v6907_v53 = vpack.c.bf16 %v7362_v50, %v7361_v51 }
 0x81a   :  { %v7365_v57 = vpop.permute.xlu1 %7364  ;;  %v1197_v10 = vpop.permute.xlu0 %1196 }
 0x81b   :  { %v7367_v58 = vunpack.i.h.bf16 %v7365_v57  ;;  %v7366_v59 = vunpack.i.l.bf16 %v7365_v57  ;;  %6908 = vmatprep.subr.bf16.mxu1 %v6907_v53 }
 0x81c   :  { %6910 = vmatpush3.bf16.msra.mxu1 %v6907_v53 }
 0x81d   :  { %v7585_v60 = vpop.eup %7584  ;;  %v6917_v63 = vpack.c.bf16 %v7367_v58, %v7366_v59 }
 0x81e   :  { %v7370_v0 = vpop.permute.xlu1 %7369  ;;  %v1105_v1 = vmul.f32 %v7585_v60, %v7577_v39 }
 0x81f   :  { %v7372_v2 = vunpack.i.h.bf16 %v7370_v0  ;;  %v7371_v3 = vunpack.i.l.bf16 %v7370_v0  ;;  %6437 = vmatmul.mubr.msk.f32.vlgmr.msra.gmra.mrb[2].mxu1 %vm553_vm0, %v902_v61  ;;  %6918 = vmatprep.subr.bf16.mxu1 %v6917_v63 }
 0x820   :  { %6920 = vmatpush3.bf16.msra.mxu1 %v6917_v63  ;;  %6450 = vmatprep.mubr.msk.f32.mxu1 %vm553_vm0, %v1105_v1 }
 0x821   :  { %v7587_v5 = vpop.eup %7586  ;;  %v6921_v6 = vpack.c.bf16 %v7372_v2, %v7371_v3 }
 0x822   :  { %v1106_v8 = vmul.f32 %v7587_v5, %v7579_v41  ;;  %v1195_v9 = vpop.permute.xlu1 %1194 }
 0x823   :  { %6923 = vmatprep.subr.msk.bf16.mxu1 %vm9046_vm3, %v6921_v6 }
 0x824   :  { %6451 = vmatmul.mubr.msk.f32.vlgmr.msra.gmra.mrb[4].mxu1 %vm553_vm0, %v1106_v8 }
 0x825   :  { %6457 = vmatprep.mubr.msk.f32.mxu1 %vm793_vm2, %v1195_v9 }
 0x829   :  { %6926 = vmatpush3.bf16.xpose.msk.msra.mxu1 %vm9046_vm3, %v6921_v6 }
 0x830   :  { %6458 = vmatmul.mubr.msk.f32.vlgmr.msra.gmra.mrb[6].mxu1 %vm793_vm2, %v1197_v10 }
 0x8f2   :  { %v9098_v11 = vpop.f32.mrb[2].mxu1 }
 0x8f3   :  { %v9100_v12 = vpop.f32.mrb[3].mxu1 }
 0x8f7   :  { %v9102_v13 = vpop.f32.mrb[4].mxu1 }
 0x8f8   :  { %v9104_v16 = vpop.f32.mrb[5].mxu1 }
 0x903   :  { %v6459_v17 = vpop.f32.mrb[6].mxu1 }
 0x904   :  { %v1286_v18 = vmul.f32 0.35355338, %v6459_v17  ;;  %v1276_v19 = vpop.f32.mrb[7].mxu1 }
 0x905   :  { %v1285_v20 = vmul.f32 0.35355338, %v1276_v19 }
 0x906   :  { %v1288_v21 = vadd.f32 %v1286_v18, %v9062_v4 }
 0x907   :  { %v1287_v22 = vadd.f32 %v1285_v20, %v9064_v7 }
 0x908   :  { %v1292_v23 = vsel %vm553_vm0, %v1288_v21, -inf }
 0x909   :  { %1293 = vmax.xlane.f32.xlu0 %v1292_v23  ;;  %v1289_v24 = vsel %vm553_vm0, %v1287_v22, -inf  ;;  %v1633_v23 = vld [vmem:[#allocation20] sm:$0xff] }
 0x90a   :  { %1290 = vmax.xlane.f32.xlu1 %v1289_v24  ;;  %v1634_v24 = vld [vmem:[#allocation20 + $0x8] sm:$0xff] }
 0x91b   :  { %7374 = vrot.lane.b32.xlu1 %v9034_v55, %s8543_s26 }
 0x91f   :  { %1398 = vrot.lane.b32.xlu1 %v9028_v54, %s8544_s24 }
 0x923   :  { %1400 = vrot.lane.b32.xlu1 %v9026_v52, %s8544_s24 }
 0x996   :  { %v1294_v25 = vpop.xlane.xlu0 %1293 }
 0x997   :  { %v1296_v26 = vsub.f32 %v1288_v21, %v1294_v25  ;;  %v1291_v27 = vpop.xlane.xlu1 %1290  ;;  %v1635_v25 = vld [vmem:[#allocation20 + $0x10] sm:$0xff] }
 0x998   :  { %v1295_v28 = vsub.f32 %v1287_v22, %v1291_v27  ;;  %v1636_v27 = vld [vmem:[#allocation20 + $0x18] sm:$0xff] }
 0x999   :  { %v1299_v29 = vmul.f32 1.442695, %v1296_v26  ;;  %v6941_v26 = vpack.c.bf16 %v1634_v24, %v1633_v23  ;;  %v5999_v24 = vld [vmem:[#allocation25] ss:$0 sm:$0xff] }
 0x99a   :  { %v1297_v30 = vmul.f32 1.442695, %v1295_v28  ;;  %v6945_v28 = vpack.c.bf16 %v1636_v27, %v1635_v25 }
 0x99b   :  { %7588 = vpow2.f32 %v1299_v29  ;;  %v7375_v31 = vpop.permute.xlu1 %7374 }
 0x99c   :  { %v7377_v32 = vunpack.i.h.bf16 %v7375_v31  ;;  %v7376_v33 = vunpack.i.l.bf16 %v7375_v31  ;;  %7590 = vpow2.f32 %v1297_v30 }
 0x99e   :  { %v6927_v34 = vpack.c.bf16 %v7377_v32, %v7376_v33 }
 0x99f   :  { %v1399_v47 = vpop.permute.xlu1 %1398 }
 0x9a0   :  { %6928 = vmatprep.subr.bf16.mxu0 %v6927_v34 }
 0x9a1   :  { %6930 = vmatpush3.bf16.msra.mxu0 %v6927_v34 }
 0x9a3   :  { %v1401_v48 = vpop.permute.xlu1 %1400 }
 0x9a5   :  { %v7589_v35 = vpop.eup %7588 }
 0x9a6   :  { %v1304_v54 = vsel %vm553_vm0, %v7589_v35, 0.0  ;;  %v7591_v36 = vpop.eup %7590 }
 0x9a7   :  { %1305 = vadd.xlane.f32.xlu0 %v1304_v54  ;;  %v1301_v52 = vsel %vm553_vm0, %v7591_v36, 0.0 }
 0x9ab   :  { %1302 = vadd.xlane.f32.xlu0 %v1301_v52 }
 0x9c1   :  { %7379 = vrot.lane.b32.xlu0 %v9034_v55, %s8545_s1 }
 0xa34   :  { %v1306_v37 = vpop.xlane.xlu0 %1305 }
 0xa35   :  { %7592 = vrcp.f32 %v1306_v37 }
 0xa38   :  { %v1303_v38 = vpop.xlane.xlu0 %1302 }
 0xa39   :  { %7594 = vrcp.f32 %v1303_v38 }
 0xa3c   :  { %v7380_v39 = vpop.permute.xlu0 %7379 }
 0xa3d   :  { %v7382_v40 = vunpack.i.h.bf16 %v7380_v39  ;;  %v7381_v41 = vunpack.i.l.bf16 %v7380_v39 }
 0xa3f   :  { %v6931_v42 = vpack.c.bf16 %v7382_v40, %v7381_v41  ;;  %v7593_v43 = vpop.eup %7592 }
 0xa40   :  { %v1310_v46 = vmul.f32 %v7593_v43, %v7589_v35 }
 0xa41   :  { %6933 = vmatprep.subr.msk.bf16.mxu0 %vm9046_vm3, %v6931_v42 }
 0xa43   :  { %v7595_v44 = vpop.eup %7594 }
 0xa44   :  { %v1309_v45 = vmul.f32 %v7595_v44, %v7591_v36 }
 0xa46   :  { %6464 = vmatprep.mubr.msk.f32.mxu0 %vm553_vm0, %v1309_v45 }
 0xa47   :  { %6465 = vmatmul.mubr.msk.f32.vlgmr.msra.gmra.mrb[6].mxu0 %vm553_vm0, %v1310_v46 }
 0xa48   :  { %6936 = vmatpush3.bf16.xpose.msk.msra.mxu0 %vm9046_vm3, %v6931_v42  ;;  %6471 = vmatprep.mubr.msk.f32.mxu0 %vm793_vm2, %v1399_v47  ;;  %v1865_v47 = vld [vmem:[#allocation29] sm:$0xff] }
 0xa4f   :  { %6472 = vmatmul.mubr.msk.f32.vlgmr.msra.gmra.mrb[8].mxu0 %vm793_vm2, %v1401_v48  ;;  %v1866_v48 = vld [vmem:[#allocation29 + $0x8] sm:$0xff] }
 0xb1a   :  { %v6466_v49 = vpop.f32.mrb[6].mxu0 }
 0xb1b   :  { %v1389_v50 = vpop.f32.mrb[7].mxu0 }
 0xb22   :  { %v6473_v51 = vpop.f32.mrb[8].mxu0 }
 0xb23   :  { %v1490_v53 = vmul.f32 0.35355338, %v6473_v51  ;;  %v1480_v56 = vpop.f32.mrb[9].mxu0 }
 0xb24   :  { %v1489_v57 = vmul.f32 0.35355338, %v1480_v56 }
 0xb25   :  { %v1492_v58 = vadd.f32 %v1490_v53, %v9062_v4 }
 0xb26   :  { %v1491_v59 = vadd.f32 %v1489_v57, %v9064_v7 }
 0xb27   :  { %v1496_v60 = vsel %vm553_vm0, %v1492_v58, -inf }
 0xb28   :  { %1497 = vmax.xlane.f32.xlu0 %v1496_v60  ;;  %v1493_v61 = vsel %vm553_vm0, %v1491_v59, -inf }
 0xb29   :  { %1494 = vmax.xlane.f32.xlu1 %v1493_v61  ;;  %v1867_v61 = vld [vmem:[#allocation29 + $0x10] sm:$0xff] }
 0xb3a   :  { %7384 = vrot.lane.b32.xlu1 %v9034_v55, %s8546_s6 }
 0xb3e   :  { %1606 = vrot.lane.b32.xlu1 %v9102_v13, %s8504_s7 }
 0xb42   :  { %1612 = vrot.lane.b32.xlu1 %v1389_v50, %s8507_s28 }
 0xb46   :  { %1614 = vrot.lane.b32.xlu1 %v6466_v49, %s8507_s28  ;;  %v6957_v49 = vpack.c.bf16 %v1866_v48, %v1865_v47  ;;  %v9196_v47 = vld [vmem:[#allocation8 + $0x8] sm:$0xff] }
 0xbb5   :  { %v1498_v4 = vpop.xlane.xlu0 %1497 }
 0xbb6   :  { %v1500_v63 = vsub.f32 %v1492_v58, %v1498_v4  ;;  %v1495_v7 = vpop.xlane.xlu1 %1494  ;;  %v1868_v4 = vld [vmem:[#allocation29 + $0x18] sm:$0xff] }
 0xbb7   :  { %v1499_v0 = vsub.f32 %v1491_v59, %v1495_v7  ;;  %v641_v7 = vld [vmem:[#allocation5] sm:$0xff] }
 0xbb8   :  { %v1503_v1 = vmul.f32 1.442695, %v1500_v63  ;;  %v6961_v63 = vpack.c.bf16 %v1868_v4, %v1867_v61 }
 0xbb9   :  { %v1501_v2 = vmul.f32 1.442695, %v1499_v0  ;;  %v642_v0 = vld [vmem:[#allocation5 + $0x8] sm:$0xff] }
 0xbba   :  { %v7385_v3 = vpop.permute.xlu1 %7384 }
 0xbbb   :  { %7596 = vpow2.f32 %v1501_v2  ;;  %v7387_v5 = vunpack.i.h.bf16 %v7385_v3  ;;  %v7386_v6 = vunpack.i.l.bf16 %v7385_v3  ;;  %v644_v2 = vld [vmem:[#allocation5 + $0x18] sm:$0xff]  ;;  %v1773_v3 = vld [vmem:[#allocation26] sm:$0xff] }
 0xbbc   :  { %7598 = vpow2.f32 %v1503_v1  ;;  %v643_v1 = vld [vmem:[#allocation5 + $0x10] sm:$0xff] }
 0xbbd   :  { %v6937_v8 = vpack.c.bf16 %v7387_v5, %v7386_v6  ;;  %v1774_v5 = vld [vmem:[#allocation26 + $0x8] sm:$0xff]  ;;  %v1775_v6 = vld [vmem:[#allocation26 + $0x10] sm:$0xff] }
 0xbbe   :  { %v1607_v30 = vpop.permute.xlu1 %1606 }
 0xbbf   :  { %6938 = vmatprep.subr.bf16.mxu1 %v6937_v8  ;;  %v1627_v54 = vsel %vm793_vm2, %v9098_v11, %v1607_v30  ;;  %v6003_v30 = vld [vmem:[#allocation31] ss:$0 sm:$0xff] }
 0xbc0   :  { %6940 = vmatpush3.bf16.msra.mxu1 %v6937_v8  ;;  %v1776_v8 = vld [vmem:[#allocation26 + $0x18] sm:$0xff] }
 0xbc1   :  { %6942 = vmatprep.subr.bf16.mxu1 %v6941_v26 }
 0xbc2   :  { %v1613_v31 = vpop.permute.xlu1 %1612 }
 0xbc5   :  { %v7597_v55 = vpop.eup %7596 }
 0xbc6   :  { %v1505_v9 = vsel %vm553_vm0, %v7597_v55, 0.0  ;;  %v7599_v10 = vpop.eup %7598  ;;  %v1615_v33 = vpop.permute.xlu1 %1614 }
 0xbc7   :  { %1506 = vadd.xlane.f32.xlu0 %v1505_v9  ;;  %v1508_v13 = vsel %vm553_vm0, %v7599_v10, 0.0  ;;  %v1629_v37 = vsel %vm553_vm0, %v1627_v54, %v1615_v33  ;;  %v6953_v9 = vpack.c.bf16 %v1776_v8, %v1775_v6 }
 0xbcb   :  { %1509 = vadd.xlane.f32.xlu0 %v1508_v13 }
 0xbe1   :  { %1604 = vrot.lane.b32.xlu0 %v9104_v16, %s8504_s7 }
 0xc54   :  { %v1507_v17 = vpop.xlane.xlu0 %1506 }
 0xc55   :  { %7600 = vrcp.f32 %v1507_v17 }
 0xc58   :  { %v1510_v18 = vpop.xlane.xlu0 %1509 }
 0xc59   :  { %7602 = vrcp.f32 %v1510_v18 }
 0xc5c   :  { %v1605_v32 = vpop.permute.xlu0 %1604 }
 0xc5d   :  { %v1626_v34 = vsel %vm793_vm2, %v9100_v12, %v1605_v32  ;;  %v5997_v12 = vld [vmem:[#allocation22] ss:$0 sm:$0xff] }
 0xc5e   :  { %v1628_v36 = vsel %vm553_vm0, %v1626_v34, %v1613_v31 }
 0xc5f   :  { %v7601_v19 = vpop.eup %7600 }
 0xc60   :  { %v1513_v20 = vmul.f32 %v7601_v19, %v7597_v55  ;;  %v6949_v55 = vpack.c.bf16 %v1774_v5, %v1773_v3 }
 0xc62   :  { %6478 = vmatprep.mubr.msk.f32.mxu1 %vm553_vm0, %v1513_v20  ;;  %6950 = vmatprep.subr.bf16.mxu0 %v6949_v55 }
 0xc63   :  { %v7603_v21 = vpop.eup %7602  ;;  %6952 = vmatpush3.bf16.msra.mxu0 %v6949_v55 }
 0xc64   :  { %v1514_v22 = vmul.f32 %v7603_v21, %v7599_v10  ;;  %6954 = vmatprep.subr.bf16.mxu0 %v6953_v9 }
 0xc66   :  { %6479 = vmatmul.mubr.msk.f32.vlgmr.msra.gmra.mrb[8].mxu1 %vm553_vm0, %v1514_v22  ;;  %v5998_v22 = vld [vmem:[#allocation23] ss:$0 sm:$0xff] }
 0xc67   :  { %6944 = vmatpush3.bf16.msra.mxu1 %v6941_v26  ;;  %6956 = vmatpush3.bf16.msra.mxu0 %v6953_v9 }
 0xc68   :  { %6946 = vmatprep.subr.bf16.mxu1 %v6945_v28 }
 0xc6b   :  { %6948 = vmatpush3.bf16.msra.mxu1 %v6945_v28 }
 0xc6c   :  { %6958 = vmatprep.subr.bf16.mxu1 %v6957_v49 }
 0xd39   :  { %v6480_v16 = vpop.f32.mrb[8].mxu1 }
 0xd3a   :  { %1622 = vrot.lane.b32.xlu1 %v6480_v16, %s8547_s10  ;;  %v1593_v29 = vpop.f32.mrb[9].mxu1 }
 0xd3b   :  { %1620 = vrot.lane.b32.xlu0 %v1593_v29, %s8547_s10 }
 0xdac   :  { %v1623_v35 = vpop.permute.xlu1 %1622 }
 0xdad   :  { %v1621_v52 = vpop.permute.xlu0 %1620  ;;  %v1632_v39 = vsel %vm1630_vm4, %v1629_v37, %v1623_v35 }
 0xdae   :  { %v1631_v38 = vsel %vm1630_vm4, %v1628_v36, %v1621_v52 }
 0xdaf   :  { %6489 = vmatprep.mubr.msk.f32.mxu1 %vm651_vm1, %v1631_v38 }
 0xdb0   :  { %6490 = vmatmul.mubr.msk.f32.vlgmr.msra.gmra.mrb[10].mxu1 %vm651_vm1, %v1632_v39 }
 0xdb1   :  { %6960 = vmatpush3.bf16.msra.mxu1 %v6957_v49  ;;  %6511 = vmatprep.mubr.msk.f32.mxu1 %vm651_vm1, %v641_v7 }
 0xdb2   :  { %6962 = vmatprep.subr.bf16.mxu1 %v6961_v63 }
 0xdb5   :  { %6964 = vmatpush3.bf16.msra.mxu1 %v6961_v63 }
 0xdb8   :  { %6512 = vmatmul.mubr.msk.f32.vlgmr.msra.gmra.mrb[12].mxu1 %vm651_vm1, %v642_v0 }
 0xdb9   :  { %6514 = vmatprep.mubr.msk.f32.mxu1 %vm651_vm1, %v643_v1 }
 0xdbc   :  { %6515 = vmatmul.mubr.msk.f32.gmra.mrb[14].mxu1 %vm651_vm1, %v644_v2 }
 0xe83   :  { %v6491_v40 = vpop.f32.mrb[10].mxu1 }
 0xe84   :  { %v1719_v41 = vadd.f32 %v6491_v40, %v9014_v15  ;;  %v1709_v42 = vpop.f32.mrb[11].mxu1 }
 0xe85   :  { %v1718_v11 = vadd.f32 %v1709_v42, %v9012_v14 }
 0xe86   :  { %v9158_v43 = vadd.f32 %v5997_v12, %v1719_v41 }
 0xe87   :  { %v9160_v44 = vadd.f32 %v5997_v12, %v1718_v11  ;;  %v6000_v12 = vld [vmem:[#allocation28] ss:$0 sm:$0xff] }
 0xe88   :  { %v1734_v45 = vsel %vm651_vm1, %v9158_v43, 0.0 }
 0xe89   :  { %1735 = vadd.xlane.f32.xlu1 %v1734_v45  ;;  %v1731_v46 = vsel %vm651_vm1, %v9160_v44, 0.0 }
 0xe8a   :  { %1732 = vadd.xlane.f32.xlu0 %v1731_v46 }
 0xe8b   :  { %v6513_v31 = vpop.f32.mrb[12].mxu1 }
 0xe8c   :  { %v1960_v32 = vadd.f32 %v6513_v31, %v6003_v30  ;;  %v1954_v33 = vpop.f32.mrb[13].mxu1 }
 0xe8d   :  { %v1955_v34 = vadd.f32 %v6003_v30, %v1954_v33 }
 0xe8f   :  { %v6965_v35 = vpack.c.bf16 %v1960_v32, %v1955_v34  ;;  %v6516_v54 = vpop.f32.mrb[14].mxu1  ;;  %v9176_v37 = vpack.i.bf16 %v1960_v32, %v1955_v34 }
 0xe90   :  { %v1970_v36 = vadd.f32 %v6516_v54, %v6003_v30  ;;  %v1964_v52 = vpop.f32.mrb[15].mxu1 }
 0xe91   :  { %6967 = vmatprep.subr.msk.bf16.mxu0 %vm9046_vm3, %v6965_v35  ;;  %v1965_v38 = vadd.f32 %v6003_v30, %v1964_v52 }
 0xe93   :  { %v6971_v39 = vpack.c.bf16 %v1970_v36, %v1965_v38  ;;  %v9184_v40 = vpack.i.bf16 %v1970_v36, %v1965_v38 }
 0xf16   :  { %v1736_v15 = vpop.xlane.xlu1 %1735 }
 0xf17   :  { %v1738_v50 = vmul.f32 0.03125, %v1736_v15  ;;  %v1733_v14 = vpop.xlane.xlu0 %1732  ;;  %v9198_v15 = vld [vmem:[#allocation8] sm:$0xff] }
 0xf18   :  { %v1737_v51 = vmul.f32 0.03125, %v1733_v14 }
 0xf19   :  { %v1740_v53 = vsub.f32 %v9158_v43, %v1738_v50 }
 0xf1a   :  { %v1739_v56 = vsub.f32 %v9160_v44, %v1737_v51 }
 0xf1b   :  { %v1742_v59 = vmul.f32 %v1740_v53, %v1740_v53 }
 0xf1c   :  { %v1741_v57 = vmul.f32 %v1739_v56, %v1739_v56 }
 0xf1d   :  { %v1746_v60 = vsel %vm651_vm1, %v1742_v59, 0.0 }
 0xf1e   :  { %v1743_v58 = vsel %vm651_vm1, %v1741_v57, 0.0 }
 0xf1f   :  { %1744 = vadd.xlane.f32.xlu0 %v1743_v58 }
 0xf23   :  { %1747 = vadd.xlane.f32.xlu0 %v1746_v60 }
 0xfac   :  { %v1745_v10 = vpop.xlane.xlu0 %1744 }
 0xfad   :  { %v1749_v13 = vmul.f32 0.03125, %v1745_v10 }
 0xfaf   :  { %v1751_v17 = vadd.f32 1e-05, %v1749_v13 }
 0xfb0   :  { %v1748_v18 = vpop.xlane.xlu0 %1747 }
 0xfb1   :  { %7604 = vrsqrt.f32 %v1751_v17  ;;  %v1750_v19 = vmul.f32 0.03125, %v1748_v18 }
 0xfb3   :  { %v1752_v20 = vadd.f32 1e-05, %v1750_v19 }
 0xfb5   :  { %7606 = vrsqrt.f32 %v1752_v20 }
 0xfbb   :  { %v7605_v21 = vpop.eup %7604 }
 0xfbc   :  { %v1755_v23 = vmul.f32 %v7605_v21, %v1739_v56 }
 0xfbe   :  { %v1763_v25 = vmul.f32 %v5998_v22, %v1755_v23 }
 0xfbf   :  { %v7607_v26 = vpop.eup %7606 }
 0xfc0   :  { %v1756_v27 = vmul.f32 %v7607_v26, %v1740_v53  ;;  %v1771_v28 = vadd.f32 %v5999_v24, %v1763_v25 }
 0xfc2   :  { %v1764_v16 = vmul.f32 %v5998_v22, %v1756_v27  ;;  %6500 = vmatprep.mubr.msk.f32.mxu0 %vm651_vm1, %v1771_v28 }
 0xfc4   :  { %v1772_v29 = vadd.f32 %v5999_v24, %v1764_v16 }
 0xfc6   :  { %6501 = vmatmul.mubr.msk.f32.vlgmr.msra.gmra.mrb[10].mxu0 %vm651_vm1, %v1772_v29 }
 0xfc7   :  { %6970 = vmatpush3.bf16.xpose.msk.msra.mxu0 %vm9046_vm3, %v6965_v35 }
 0xfc8   :  { %6973 = vmatprep.subr.msk.bf16.mxu0 %vm9046_vm3, %v6971_v39 }
 0xfcf   :  { %6976 = vmatpush3.bf16.xpose.msk.msra.mxu0 %vm9046_vm3, %v6971_v39 }
0x1099   :  { %v6502_v41 = vpop.f32.mrb[10].mxu0 }
0x109a   :  { %v1856_v42 = vpop.f32.mrb[11].mxu0  ;;  %v9190_v45 = vadd.f32 %v6502_v41, %v6000_v12 }
0x109b   :  { %v9188_v11 = vadd.f32 %v6000_v12, %v1856_v42 }
0x109d   :  { %6525 = vmatprep.mubr.msk.f32.mxu0 %vm793_vm2, %v9188_v11 }
0x109e   :  { %6526 = vmatmul.mubr.msk.f32.vlgmr.msra.gmra.mrb[12].mxu0 %vm793_vm2, %v9190_v45 }
0x1171   :  { %v6527_v46 = vpop.f32.mrb[12].mxu0 }
0x1172   :  { %v2067_v48 = vmul.f32 0.35355338, %v6527_v46  ;;  %v2057_v49 = vpop.f32.mrb[13].mxu0 }
0x1173   :  { %v2066_v50 = vmul.f32 0.35355338, %v2057_v49 }
0x1174   :  { %v2069_v14 = vadd.f32 %v2067_v48, %v9196_v47 }
0x1175   :  { %v2068_v51 = vadd.f32 %v2066_v50, %v9198_v15 }
0x1176   :  { %v2073_v53 = vsel %vm651_vm1, %v2069_v14, -inf }
0x1177   :  { %2074 = vmax.xlane.f32.xlu1 %v2073_v53  ;;  %v2070_v56 = vsel %vm651_vm1, %v2068_v51, -inf }
0x1178   :  { %2071 = vmax.xlane.f32.xlu0 %v2070_v56 }
0x1204   :  { %v2075_v57 = vpop.xlane.xlu1 %2074 }
0x1205   :  { %v2077_v58 = vsub.f32 %v2069_v14, %v2075_v57  ;;  %v2072_v59 = vpop.xlane.xlu0 %2071 }
0x1206   :  { %v2076_v60 = vsub.f32 %v2068_v51, %v2072_v59 }
0x1207   :  { %v2080_v61 = vmul.f32 1.442695, %v2077_v58 }
0x1208   :  { %v2078_v4 = vmul.f32 1.442695, %v2076_v60 }
0x1209   :  { %7608 = vpow2.f32 %v2080_v61 }
0x120a   :  { %7610 = vpow2.f32 %v2078_v4 }
0x1213   :  { %v7609_v63 = vpop.eup %7608 }
0x1214   :  { %v7611_v7 = vpop.eup %7610  ;;  %v2085_v0 = vsel %vm651_vm1, %v7609_v63, 0.0 }
0x1215   :  { %2086 = vadd.xlane.f32.xlu1 %v2085_v0  ;;  %v2082_v1 = vsel %vm651_vm1, %v7611_v7, 0.0 }
0x1216   :  { %2083 = vadd.xlane.f32.xlu0 %v2082_v1 }
0x1226   :  { %7394 = vrot.lane.b32.xlu1 %v9184_v40, %s8537_s27 }
0x122a   :  { %7399 = vrot.lane.b32.xlu1 %v9176_v37, %s8538_s22 }
0x122c   :  { %7389 = vrot.lane.b32.xlu0 %v9176_v37, %s8537_s27 }
0x122e   :  { %7404 = vrot.lane.b32.xlu1 %v9184_v40, %s8538_s22 }
0x1230   :  { %2185 = vrot.lane.b32.xlu0 %v9188_v11, %s8538_s22 }
0x1232   :  { %2187 = vrot.lane.b32.xlu1 %v9190_v45, %s8538_s22 }
0x12a2   :  { %v2087_v2 = vpop.xlane.xlu1 %2086 }
0x12a3   :  { %v2084_v3 = vpop.xlane.xlu0 %2083 }
0x12a4   :  { %7612 = vrcp.f32 %v2084_v3 }
0x12a5   :  { %7614 = vrcp.f32 %v2087_v2 }
0x12a6   :  { %v7395_v5 = vpop.permute.xlu1 %7394 }
0x12a7   :  { %v7390_v6 = vpop.permute.xlu0 %7389  ;;  %v7397_v8 = vunpack.i.h.bf16 %v7395_v5  ;;  %v7396_v55 = vunpack.i.l.bf16 %v7395_v5 }
0x12a8   :  { %v7392_v9 = vunpack.i.h.bf16 %v7390_v6  ;;  %v7391_v10 = vunpack.i.l.bf16 %v7390_v6 }
0x12a9   :  { %v6981_v20 = vpack.c.bf16 %v7397_v8, %v7396_v55 }
0x12aa   :  { %v7400_v13 = vpop.permute.xlu1 %7399  ;;  %v6977_v17 = vpack.c.bf16 %v7392_v9, %v7391_v10 }
0x12ab   :  { %v7402_v18 = vunpack.i.h.bf16 %v7400_v13  ;;  %v7401_v19 = vunpack.i.l.bf16 %v7400_v13  ;;  %v2186_v27 = vpop.permute.xlu0 %2185 }
0x12ac   :  { %6978 = vmatprep.subr.bf16.mxu1 %v6977_v17 }
0x12ad   :  { %6980 = vmatpush3.bf16.msra.mxu1 %v6977_v17  ;;  %v6985_v24 = vpack.c.bf16 %v7402_v18, %v7401_v19 }
0x12ae   :  { %v7613_v21 = vpop.eup %7612  ;;  %6982 = vmatprep.subr.bf16.mxu1 %v6981_v20  ;;  %v7405_v26 = vpop.permute.xlu1 %7404 }
0x12af   :  { %v7615_v22 = vpop.eup %7614  ;;  %v2090_v23 = vmul.f32 %v7613_v21, %v7611_v7  ;;  %v7407_v28 = vunpack.i.h.bf16 %v7405_v26  ;;  %v7406_v16 = vunpack.i.l.bf16 %v7405_v26 }
0x12b0   :  { %v2091_v25 = vmul.f32 %v7615_v22, %v7609_v63 }
0x12b1   :  { %6984 = vmatpush3.bf16.msra.mxu1 %v6981_v20  ;;  %6536 = vmatprep.mubr.msk.f32.mxu1 %vm651_vm1, %v2090_v23  ;;  %v6991_v29 = vpack.c.bf16 %v7407_v28, %v7406_v16 }
0x12b2   :  { %6987 = vmatprep.subr.msk.bf16.mxu1 %vm9046_vm3, %v6985_v24  ;;  %v2188_v30 = vpop.permute.xlu1 %2187 }
0x12b4   :  { %6537 = vmatmul.mubr.msk.f32.vlgmr.msra.gmra.mrb[16].mxu1 %vm651_vm1, %v2091_v25 }
0x12b5   :  { %6547 = vmatprep.mubr.msk.f32.mxu1 %vm793_vm2, %v2186_v27 }
0x12ba   :  { %6990 = vmatpush3.bf16.xpose.msk.msra.mxu1 %vm9046_vm3, %v6985_v24 }
0x12bb   :  { %6993 = vmatprep.subr.msk.bf16.mxu1 %vm9046_vm3, %v6991_v29 }
0x12c2   :  { %6996 = vmatpush3.bf16.xpose.msk.msra.mxu1 %vm9046_vm3, %v6991_v29 }
0x12c9   :  { %6548 = vmatmul.mubr.msk.f32.vlgmr.msra.gmra.mrb[18].mxu1 %vm793_vm2, %v2188_v30 }
0x1387   :  { %v9230_v31 = vpop.f32.mrb[16].mxu1 }
0x1388   :  { %v9232_v32 = vpop.f32.mrb[17].mxu1 }
0x139c   :  { %v6549_v33 = vpop.f32.mrb[18].mxu1 }
0x139d   :  { %v2285_v34 = vmul.f32 0.35355338, %v6549_v33  ;;  %v2275_v35 = vpop.f32.mrb[19].mxu1 }
0x139e   :  { %v2284_v54 = vmul.f32 0.35355338, %v2275_v35 }
0x139f   :  { %v2287_v36 = vadd.f32 %v2285_v34, %v9196_v47 }
0x13a0   :  { %v2286_v52 = vadd.f32 %v2284_v54, %v9198_v15 }
0x13a1   :  { %v2291_v38 = vsel %vm651_vm1, %v2287_v36, -inf }
0x13a2   :  { %2292 = vmax.xlane.f32.xlu1 %v2291_v38  ;;  %v2288_v39 = vsel %vm651_vm1, %v2286_v52, -inf }
0x13a3   :  { %2289 = vmax.xlane.f32.xlu0 %v2288_v39 }
0x13b3   :  { %7414 = vrot.lane.b32.xlu1 %v9184_v40, %s8536_s12 }
0x13b7   :  { %7419 = vrot.lane.b32.xlu1 %v9176_v37, %s8542_s19 }
0x13bb   :  { %7424 = vrot.lane.b32.xlu1 %v9184_v40, %s8542_s19 }
0x13bf   :  { %2405 = vrot.lane.b32.xlu1 %v9190_v45, %s8542_s19 }
0x142f   :  { %v2293_v12 = vpop.xlane.xlu1 %2292 }
0x1430   :  { %v2295_v41 = vsub.f32 %v2287_v36, %v2293_v12  ;;  %v2290_v42 = vpop.xlane.xlu0 %2289 }
0x1431   :  { %v2294_v46 = vsub.f32 %v2286_v52, %v2290_v42 }
0x1432   :  { %v2298_v48 = vmul.f32 1.442695, %v2295_v41 }
0x1433   :  { %v2296_v49 = vmul.f32 1.442695, %v2294_v46  ;;  %v7415_v57 = vpop.permute.xlu1 %7414 }
0x1434   :  { %7616 = vpow2.f32 %v2298_v48  ;;  %v7417_v60 = vunpack.i.h.bf16 %v7415_v57  ;;  %v7416_v61 = vunpack.i.l.bf16 %v7415_v57 }
0x1435   :  { %7618 = vpow2.f32 %v2296_v49 }
0x1436   :  { %v7001_v3 = vpack.c.bf16 %v7417_v60, %v7416_v61 }
0x1437   :  { %v7420_v7 = vpop.permute.xlu1 %7419 }
0x1438   :  { %v7422_v1 = vunpack.i.h.bf16 %v7420_v7  ;;  %v7421_v2 = vunpack.i.l.bf16 %v7420_v7 }
0x143a   :  { %v7005_v55 = vpack.c.bf16 %v7422_v1, %v7421_v2 }
0x143b   :  { %v7425_v9 = vpop.permute.xlu1 %7424 }
0x143c   :  { %v7427_v17 = vunpack.i.h.bf16 %v7425_v9  ;;  %v7426_v18 = vunpack.i.l.bf16 %v7425_v9 }
0x143e   :  { %v7617_v50 = vpop.eup %7616  ;;  %v7011_v19 = vpack.c.bf16 %v7427_v17, %v7426_v18 }
0x143f   :  { %v2303_v14 = vsel %vm651_vm1, %v7617_v50, 0.0  ;;  %v7619_v51 = vpop.eup %7618  ;;  %v2406_v20 = vpop.permute.xlu1 %2405 }
0x1440   :  { %2304 = vadd.xlane.f32.xlu0 %v2303_v14  ;;  %v2300_v53 = vsel %vm651_vm1, %v7619_v51, 0.0 }
0x1444   :  { %2301 = vadd.xlane.f32.xlu0 %v2300_v53 }
0x145a   :  { %7409 = vrot.lane.b32.xlu0 %v9176_v37, %s8536_s12 }
0x145e   :  { %2403 = vrot.lane.b32.xlu0 %v9188_v11, %s8542_s19 }
0x14cd   :  { %v2305_v56 = vpop.xlane.xlu0 %2304 }
0x14d1   :  { %v2302_v58 = vpop.xlane.xlu0 %2301 }
0x14d2   :  { %7620 = vrcp.f32 %v2302_v58 }
0x14d3   :  { %7622 = vrcp.f32 %v2305_v56 }
0x14d5   :  { %v7410_v59 = vpop.permute.xlu0 %7409 }
0x14d6   :  { %v7412_v4 = vunpack.i.h.bf16 %v7410_v59  ;;  %v7411_v63 = vunpack.i.l.bf16 %v7410_v59 }
0x14d8   :  { %v6997_v0 = vpack.c.bf16 %v7412_v4, %v7411_v63 }
0x14d9   :  { %v2404_v13 = vpop.permute.xlu0 %2403 }
0x14da   :  { %6998 = vmatprep.subr.bf16.mxu0 %v6997_v0 }
0x14db   :  { %7000 = vmatpush3.bf16.msra.mxu0 %v6997_v0 }
0x14dc   :  { %v7621_v5 = vpop.eup %7620  ;;  %7002 = vmatprep.subr.bf16.mxu0 %v7001_v3 }
0x14dd   :  { %v7623_v6 = vpop.eup %7622  ;;  %v2308_v8 = vmul.f32 %v7621_v5, %v7619_v51 }
0x14de   :  { %v2309_v10 = vmul.f32 %v7623_v6, %v7617_v50 }
0x14df   :  { %7004 = vmatpush3.bf16.msra.mxu0 %v7001_v3  ;;  %6558 = vmatprep.mubr.msk.f32.mxu0 %vm651_vm1, %v2308_v8 }
0x14e0   :  { %7007 = vmatprep.subr.msk.bf16.mxu0 %vm9046_vm3, %v7005_v55 }
0x14e2   :  { %6559 = vmatmul.mubr.msk.f32.vlgmr.msra.gmra.mrb[14].mxu0 %vm651_vm1, %v2309_v10 }
0x14e3   :  { %6569 = vmatprep.mubr.msk.f32.mxu0 %vm793_vm2, %v2404_v13 }
0x14e8   :  { %7010 = vmatpush3.bf16.xpose.msk.msra.mxu0 %vm9046_vm3, %v7005_v55 }
0x14e9   :  { %7013 = vmatprep.subr.msk.bf16.mxu0 %vm9046_vm3, %v7011_v19 }
0x14f0   :  { %7016 = vmatpush3.bf16.xpose.msk.msra.mxu0 %vm9046_vm3, %v7011_v19 }
0x14f7   :  { %6570 = vmatmul.mubr.msk.f32.vlgmr.msra.gmra.mrb[16].mxu0 %vm793_vm2, %v2406_v20 }
0x15b5   :  { %v9264_v21 = vpop.f32.mrb[14].mxu0 }
0x15b6   :  { %v9266_v22 = vpop.f32.mrb[15].mxu0 }
0x15ca   :  { %v6571_v23 = vpop.f32.mrb[16].mxu0 }
0x15cb   :  { %v2503_v24 = vmul.f32 0.35355338, %v6571_v23  ;;  %v2493_v25 = vpop.f32.mrb[17].mxu0 }
0x15cc   :  { %v2502_v26 = vmul.f32 0.35355338, %v2493_v25 }
0x15cd   :  { %v2505_v27 = vadd.f32 %v2503_v24, %v9196_v47 }
0x15ce   :  { %v2504_v28 = vadd.f32 %v2502_v26, %v9198_v15 }
0x15cf   :  { %v2509_v16 = vsel %vm651_vm1, %v2505_v27, -inf }
0x15d0   :  { %2510 = vmax.xlane.f32.xlu1 %v2509_v16  ;;  %v2506_v29 = vsel %vm651_vm1, %v2504_v28, -inf }
0x15d1   :  { %2507 = vmax.xlane.f32.xlu0 %v2506_v29 }
0x15e1   :  { %7434 = vrot.lane.b32.xlu1 %v9184_v40, %s8541_s17 }
0x15e5   :  { %7439 = vrot.lane.b32.xlu1 %v9176_v37, %s8544_s24 }
0x15e9   :  { %7444 = vrot.lane.b32.xlu1 %v9184_v40, %s8544_s24 }
0x15ed   :  { %2623 = vrot.lane.b32.xlu1 %v9190_v45, %s8544_s24 }
0x165d   :  { %v2511_v30 = vpop.xlane.xlu1 %2510 }
0x165e   :  { %v2513_v33 = vsub.f32 %v2505_v27, %v2511_v30  ;;  %v2508_v34 = vpop.xlane.xlu0 %2507 }
0x165f   :  { %v2512_v35 = vsub.f32 %v2504_v28, %v2508_v34 }
0x1660   :  { %v2516_v54 = vmul.f32 1.442695, %v2513_v33 }
0x1661   :  { %v2514_v36 = vmul.f32 1.442695, %v2512_v35  ;;  %v7435_v41 = vpop.permute.xlu1 %7434 }
0x1662   :  { %7624 = vpow2.f32 %v2516_v54  ;;  %v7437_v48 = vunpack.i.h.bf16 %v7435_v41  ;;  %v7436_v49 = vunpack.i.l.bf16 %v7435_v41  ;;  %v2871_v41 = vld [vmem:[#allocation32 + $0x10] sm:$0xff] }
0x1663   :  { %7626 = vpow2.f32 %v2514_v36 }
0x1664   :  { %v7021_v58 = vpack.c.bf16 %v7437_v48, %v7436_v49 }
0x1665   :  { %v7440_v51 = vpop.permute.xlu1 %7439 }
0x1666   :  { %v7442_v56 = vunpack.i.h.bf16 %v7440_v51  ;;  %v7441_v57 = vunpack.i.l.bf16 %v7440_v51 }
0x1668   :  { %v7025_v61 = vpack.c.bf16 %v7442_v56, %v7441_v57 }
0x1669   :  { %v7445_v4 = vpop.permute.xlu1 %7444 }
0x166a   :  { %v7447_v0 = vunpack.i.h.bf16 %v7445_v4  ;;  %v7446_v1 = vunpack.i.l.bf16 %v7445_v4 }
0x166c   :  { %v7625_v52 = vpop.eup %7624  ;;  %v7031_v2 = vpack.c.bf16 %v7447_v0, %v7446_v1  ;;  %v6042_v0 = vld [vmem:[#allocation34] ss:$0 sm:$0xff] }
0x166d   :  { %v2521_v38 = vsel %vm651_vm1, %v7625_v52, 0.0  ;;  %v7627_v39 = vpop.eup %7626  ;;  %v2624_v3 = vpop.permute.xlu1 %2623 }
0x166e   :  { %2522 = vadd.xlane.f32.xlu0 %v2521_v38  ;;  %v2518_v12 = vsel %vm651_vm1, %v7627_v39, 0.0 }
0x1672   :  { %2519 = vadd.xlane.f32.xlu0 %v2518_v12  ;;  %v2869_v12 = vld [vmem:[#allocation32] sm:$0xff] }
0x1688   :  { %7429 = vrot.lane.b32.xlu0 %v9176_v37, %s8541_s17 }
0x168c   :  { %2621 = vrot.lane.b32.xlu0 %v9188_v11, %s8544_s24 }
0x16fb   :  { %v2523_v45 = vpop.xlane.xlu0 %2522 }
0x16ff   :  { %v2520_v42 = vpop.xlane.xlu0 %2519 }
0x1700   :  { %7628 = vrcp.f32 %v2520_v42 }
0x1701   :  { %7630 = vrcp.f32 %v2523_v45  ;;  %v2870_v45 = vld [vmem:[#allocation32 + $0x8] sm:$0xff] }
0x1702   :  { %v7045_v42 = vpack.c.bf16 %v2870_v45, %v2869_v12  ;;  %v6044_v12 = vld [vmem:[#allocation37] ss:$0 sm:$0xff] }
0x1703   :  { %v7430_v46 = vpop.permute.xlu0 %7429 }
0x1704   :  { %v7432_v50 = vunpack.i.h.bf16 %v7430_v46  ;;  %v7431_v14 = vunpack.i.l.bf16 %v7430_v46  ;;  %v2872_v46 = vld [vmem:[#allocation32 + $0x18] sm:$0xff] }
0x1705   :  { %v7049_v48 = vpack.c.bf16 %v2872_v46, %v2871_v41 }
0x1706   :  { %v7017_v53 = vpack.c.bf16 %v7432_v50, %v7431_v14 }
0x1707   :  { %v2622_v7 = vpop.permute.xlu0 %2621 }
0x1708   :  { %7018 = vmatprep.subr.bf16.mxu1 %v7017_v53 }
0x1709   :  { %7020 = vmatpush3.bf16.msra.mxu1 %v7017_v53 }
0x170a   :  { %v7629_v59 = vpop.eup %7628  ;;  %7022 = vmatprep.subr.bf16.mxu1 %v7021_v58 }
0x170b   :  { %v7631_v11 = vpop.eup %7630  ;;  %v2526_v60 = vmul.f32 %v7629_v59, %v7627_v39 }
0x170c   :  { %v2527_v63 = vmul.f32 %v7631_v11, %v7625_v52 }
0x170d   :  { %7024 = vmatpush3.bf16.msra.mxu1 %v7021_v58  ;;  %6580 = vmatprep.mubr.msk.f32.mxu1 %vm651_vm1, %v2526_v60 }
0x170e   :  { %7027 = vmatprep.subr.msk.bf16.mxu1 %vm9046_vm3, %v7025_v61 }
0x1710   :  { %6581 = vmatmul.mubr.msk.f32.vlgmr.msra.gmra.mrb[20].mxu1 %vm651_vm1, %v2527_v63 }
0x1711   :  { %6591 = vmatprep.mubr.msk.f32.mxu1 %vm793_vm2, %v2622_v7 }
0x1716   :  { %7030 = vmatpush3.bf16.xpose.msk.msra.mxu1 %vm9046_vm3, %v7025_v61 }
0x1717   :  { %7033 = vmatprep.subr.msk.bf16.mxu1 %vm9046_vm3, %v7031_v2 }
0x171e   :  { %7036 = vmatpush3.bf16.xpose.msk.msra.mxu1 %vm9046_vm3, %v7031_v2 }
0x1725   :  { %6592 = vmatmul.mubr.msk.f32.vlgmr.msra.gmra.mrb[22].mxu1 %vm793_vm2, %v2624_v3 }
0x17e3   :  { %v6582_v5 = vpop.f32.mrb[20].mxu1 }
0x17e4   :  { %v2612_v6 = vpop.f32.mrb[21].mxu1 }
0x17f8   :  { %v6593_v8 = vpop.f32.mrb[22].mxu1 }
0x17f9   :  { %v2721_v55 = vmul.f32 0.35355338, %v6593_v8  ;;  %v2711_v9 = vpop.f32.mrb[23].mxu1 }
0x17fa   :  { %v2720_v10 = vmul.f32 0.35355338, %v2711_v9 }
0x17fb   :  { %v2723_v13 = vadd.f32 %v2721_v55, %v9196_v47 }
0x17fc   :  { %v2722_v17 = vadd.f32 %v2720_v10, %v9198_v15 }
0x17fd   :  { %v2727_v18 = vsel %vm651_vm1, %v2723_v13, -inf }
0x17fe   :  { %2728 = vmax.xlane.f32.xlu1 %v2727_v18  ;;  %v2724_v19 = vsel %vm651_vm1, %v2722_v17, -inf }
0x17ff   :  { %2725 = vmax.xlane.f32.xlu0 %v2724_v19 }
0x180f   :  { %7454 = vrot.lane.b32.xlu1 %v9184_v40, %s8545_s1 }
0x1813   :  { %2841 = vrot.lane.b32.xlu1 %v9266_v22, %s8504_s7 }
0x1817   :  { %2843 = vrot.lane.b32.xlu1 %v9264_v21, %s8504_s7 }
0x181b   :  { %2851 = vrot.lane.b32.xlu1 %v6582_v5, %s8507_s28 }
0x188b   :  { %v2729_v47 = vpop.xlane.xlu1 %2728 }
0x188c   :  { %v2731_v20 = vsub.f32 %v2723_v13, %v2729_v47  ;;  %v2726_v15 = vpop.xlane.xlu0 %2725  ;;  %v3009_v47 = vld [vmem:[#allocation38] sm:$0xff] }
0x188d   :  { %v2730_v23 = vsub.f32 %v2722_v17, %v2726_v15 }
0x188e   :  { %v2734_v24 = vmul.f32 1.442695, %v2731_v20  ;;  %v3010_v20 = vld [vmem:[#allocation38 + $0x8] sm:$0xff] }
0x188f   :  { %v2732_v25 = vmul.f32 1.442695, %v2730_v23  ;;  %v7455_v16 = vpop.permute.xlu1 %7454  ;;  %v7053_v15 = vpack.c.bf16 %v3010_v20, %v3009_v47  ;;  %v3011_v23 = vld [vmem:[#allocation38 + $0x10] sm:$0xff]  ;;  %v3253_v47 = vld [vmem:[#allocation17 + $0x30] sm:$0xff]  ;;  %v3254_v20 = vld [vmem:[#allocation17 + $0x38] sm:$0xff] }
0x1890   :  { %7632 = vpow2.f32 %v2734_v24  ;;  %v7457_v30 = vunpack.i.h.bf16 %v7455_v16  ;;  %v7456_v33 = vunpack.i.l.bf16 %v7455_v16  ;;  %v3012_v24 = vld [vmem:[#allocation38 + $0x18] sm:$0xff]  ;;  %v3107_v16 = vld [vmem:[#allocation41 + $0x20] sm:$0xff] }
0x1891   :  { %7634 = vpow2.f32 %v2732_v25  ;;  %7054 = vmatprep.subr.bf16.mxu1 %v7053_v15  ;;  %v7057_v25 = vpack.c.bf16 %v3012_v24, %v3011_v23 }
0x1892   :  { %v7041_v36 = vpack.c.bf16 %v7457_v30, %v7456_v33  ;;  %7056 = vmatpush3.bf16.msra.mxu1 %v7053_v15  ;;  %v7081_v15 = vpack.c.bf16 %v3254_v20, %v3253_v47 }
0x1893   :  { %v2842_v14 = vpop.permute.xlu1 %2841  ;;  %7058 = vmatprep.subr.bf16.mxu1 %v7057_v25 }
0x1894   :  { %v2863_v57 = vsel %vm793_vm2, %v9232_v32, %v2842_v14  ;;  %v3110_v14 = vld [vmem:[#allocation41 + $0x38] sm:$0xff] }
0x1896   :  { %7060 = vmatpush3.bf16.msra.mxu1 %v7057_v25 }
0x1897   :  { %v2844_v51 = vpop.permute.xlu1 %2843 }
0x1898   :  { %v2864_v59 = vsel %vm793_vm2, %v9230_v31, %v2844_v51 }
0x189a   :  { %v7633_v26 = vpop.eup %7632 }
0x189b   :  { %v2739_v27 = vsel %vm651_vm1, %v7633_v26, 0.0  ;;  %v7635_v40 = vpop.eup %7634  ;;  %v2852_v53 = vpop.permute.xlu1 %2851 }
0x189c   :  { %2740 = vadd.xlane.f32.xlu0 %v2739_v27  ;;  %v2736_v22 = vsel %vm651_vm1, %v7635_v40, 0.0  ;;  %v2866_v61 = vsel %vm553_vm0, %v2864_v59, %v2852_v53  ;;  %v3104_v27 = vld [vmem:[#allocation41 + $0x8] sm:$0xff]  ;;  %v6045_v53 = vld [vmem:[#allocation40] ss:$0 sm:$0xff] }
0x18a0   :  { %2737 = vadd.xlane.f32.xlu0 %v2736_v22 }
0x18b6   :  { %7449 = vrot.lane.b32.xlu0 %v9176_v37, %s8545_s1 }
0x18ba   :  { %2849 = vrot.lane.b32.xlu0 %v2612_v6, %s8507_s28 }
0x1929   :  { %v2741_v21 = vpop.xlane.xlu0 %2740 }
0x192d   :  { %v2738_v28 = vpop.xlane.xlu0 %2737 }
0x192e   :  { %7636 = vrcp.f32 %v2738_v28 }
0x192f   :  { %7638 = vrcp.f32 %v2741_v21  ;;  %v3106_v21 = vld [vmem:[#allocation41 + $0x18] sm:$0xff] }
0x1931   :  { %v7450_v29 = vpop.permute.xlu0 %7449 }
0x1932   :  { %v7452_v34 = vunpack.i.h.bf16 %v7450_v29  ;;  %v7451_v35 = vunpack.i.l.bf16 %v7450_v29  ;;  %v3108_v29 = vld [vmem:[#allocation41 + $0x28] sm:$0xff] }
0x1933   :  { %v7069_v30 = vpack.c.bf16 %v3108_v29, %v3107_v16 }
0x1934   :  { %v7037_v54 = vpack.c.bf16 %v7452_v34, %v7451_v35 }
0x1935   :  { %v2850_v56 = vpop.permute.xlu0 %2849 }
0x1936   :  { %7038 = vmatprep.subr.bf16.mxu0 %v7037_v54  ;;  %v2865_v11 = vsel %vm553_vm0, %v2863_v57, %v2850_v56 }
0x1937   :  { %7040 = vmatpush3.bf16.msra.mxu0 %v7037_v54 }
0x1938   :  { %v7637_v52 = vpop.eup %7636  ;;  %7042 = vmatprep.subr.bf16.mxu0 %v7041_v36 }
0x1939   :  { %v7639_v38 = vpop.eup %7638  ;;  %v2744_v37 = vmul.f32 %v7637_v52, %v7635_v40  ;;  %v3105_v40 = vld [vmem:[#allocation41 + $0x10] sm:$0xff] }
0x193a   :  { %v2745_v39 = vmul.f32 %v7639_v38, %v7633_v26  ;;  %v3103_v26 = vld [vmem:[#allocation41] sm:$0xff]  ;;  %v7065_v28 = vpack.c.bf16 %v3106_v21, %v3105_v40  ;;  %v6051_v21 = vld [vmem:[#allocation14 + $0x1] ss:$0 sm:$0xff] }
0x193b   :  { %7044 = vmatpush3.bf16.msra.mxu0 %v7041_v36  ;;  %6602 = vmatprep.mubr.msk.f32.mxu0 %vm651_vm1, %v2744_v37  ;;  %v7061_v22 = vpack.c.bf16 %v3104_v27, %v3103_v26  ;;  %v6043_v37 = vld [vmem:[#allocation35] ss:$0 sm:$0xff] }
0x193c   :  { %7046 = vmatprep.subr.bf16.mxu0 %v7045_v42 }
0x193e   :  { %6603 = vmatmul.mubr.msk.f32.vlgmr.msra.gmra.mrb[18].mxu0 %vm651_vm1, %v2745_v39 }
0x193f   :  { %7048 = vmatpush3.bf16.msra.mxu0 %v7045_v42 }
0x1940   :  { %7050 = vmatprep.subr.bf16.mxu0 %v7049_v48 }
0x1943   :  { %7052 = vmatpush3.bf16.msra.mxu0 %v7049_v48 }
0x1944   :  { %7062 = vmatprep.subr.bf16.mxu0 %v7061_v22 }
0x1a11   :  { %v6604_v49 = vpop.f32.mrb[18].mxu0 }
0x1a12   :  { %2859 = vrot.lane.b32.xlu1 %v6604_v49, %s8547_s10  ;;  %v2830_v50 = vpop.f32.mrb[19].mxu0 }
0x1a13   :  { %2857 = vrot.lane.b32.xlu0 %v2830_v50, %s8547_s10  ;;  %v3109_v50 = vld [vmem:[#allocation41 + $0x30] sm:$0xff] }
0x1a14   :  { %v7073_v51 = vpack.c.bf16 %v3110_v14, %v3109_v50 }
0x1a84   :  { %v2860_v58 = vpop.permute.xlu1 %2859 }
0x1a85   :  { %v2858_v60 = vpop.permute.xlu0 %2857  ;;  %v2868_v63 = vsel %vm1630_vm4, %v2866_v61, %v2860_v58 }
0x1a86   :  { %v2867_v4 = vsel %vm1630_vm4, %v2865_v11, %v2858_v60 }
0x1a87   :  { %6613 = vmatprep.mubr.msk.f32.mxu0 %vm651_vm1, %v2867_v4  ;;  %v6050_v4 = vld [vmem:[#allocation43] ss:$0 sm:$0xff] }
0x1a88   :  { %6614 = vmatmul.mubr.msk.f32.vlgmr.msra.gmra.mrb[20].mxu0 %vm651_vm1, %v2868_v63 }
0x1a89   :  { %7064 = vmatpush3.bf16.msra.mxu0 %v7061_v22 }
0x1a8a   :  { %7066 = vmatprep.subr.bf16.mxu0 %v7065_v28 }
0x1a8d   :  { %7068 = vmatpush3.bf16.msra.mxu0 %v7065_v28 }
0x1a8e   :  { %7070 = vmatprep.subr.bf16.mxu0 %v7069_v30 }
0x1a91   :  { %7072 = vmatpush3.bf16.msra.mxu0 %v7069_v30  ;;  %v6052_v30 = vld [vmem:[#allocation16 + $0x1] ss:$0 sm:$0xff] }
0x1a92   :  { %7074 = vmatprep.subr.bf16.mxu0 %v7073_v51 }
0x1a95   :  { %7076 = vmatpush3.bf16.msra.mxu0 %v7073_v51  ;;  %v9386_v51 = vld [vmem:[#allocation7] sm:$0xff] }
0x1b5b   :  { %v6615_v7 = vpop.f32.mrb[20].mxu0 }
0x1b5c   :  { %v2955_v32 = vadd.f32 %v6615_v7, %v9158_v43  ;;  %v2945_v1 = vpop.f32.mrb[21].mxu0 }
0x1b5d   :  { %v2954_v31 = vadd.f32 %v2945_v1, %v9160_v44 }
0x1b5e   :  { %v9330_v2 = vadd.f32 %v6042_v0, %v2955_v32 }
0x1b5f   :  { %v9332_v3 = vadd.f32 %v6042_v0, %v2954_v31 }
0x1b60   :  { %v2970_v5 = vsel %vm651_vm1, %v9330_v2, 0.0 }
0x1b61   :  { %2971 = vadd.xlane.f32.xlu1 %v2970_v5  ;;  %v2967_v6 = vsel %vm651_vm1, %v9332_v3, 0.0 }
0x1b62   :  { %2968 = vadd.xlane.f32.xlu0 %v2967_v6 }
0x1bee   :  { %v2972_v8 = vpop.xlane.xlu1 %2971 }
0x1bef   :  { %v2974_v55 = vmul.f32 0.03125, %v2972_v8  ;;  %v2969_v9 = vpop.xlane.xlu0 %2968 }
0x1bf0   :  { %v2973_v10 = vmul.f32 0.03125, %v2969_v9 }
0x1bf1   :  { %v2976_v43 = vsub.f32 %v9330_v2, %v2974_v55 }
0x1bf2   :  { %v2975_v44 = vsub.f32 %v9332_v3, %v2973_v10 }
0x1bf3   :  { %v2978_v18 = vmul.f32 %v2976_v43, %v2976_v43 }
0x1bf4   :  { %v2977_v13 = vmul.f32 %v2975_v44, %v2975_v44 }
0x1bf5   :  { %v2982_v19 = vsel %vm651_vm1, %v2978_v18, 0.0  ;;  %v3252_v18 = vld [vmem:[#allocation17 + $0x28] sm:$0xff] }
0x1bf6   :  { %v2979_v17 = vsel %vm651_vm1, %v2977_v13, 0.0 }
0x1bf7   :  { %2980 = vadd.xlane.f32.xlu0 %v2979_v17  ;;  %v3251_v17 = vld [vmem:[#allocation17 + $0x20] sm:$0xff] }
0x1bfb   :  { %2983 = vadd.xlane.f32.xlu0 %v2982_v19  ;;  %v7077_v19 = vpack.c.bf16 %v3252_v18, %v3251_v17 }
0x1bfd   :  { %7078 = vmatprep.subr.bf16.mxu1 %v7077_v19 }
0x1c84   :  { %v2981_v33 = vpop.xlane.xlu0 %2980 }
0x1c85   :  { %v2985_v34 = vmul.f32 0.03125, %v2981_v33 }
0x1c87   :  { %v2987_v35 = vadd.f32 1e-05, %v2985_v34 }
0x1c88   :  { %v2984_v54 = vpop.xlane.xlu0 %2983 }
0x1c89   :  { %7640 = vrsqrt.f32 %v2987_v35  ;;  %v2986_v36 = vmul.f32 0.03125, %v2984_v54 }
0x1c8b   :  { %v2988_v52 = vadd.f32 1e-05, %v2986_v36  ;;  %v6053_v36 = vld [vmem:[#allocation19 + $0x1] ss:$0 sm:$0xff] }
0x1c8d   :  { %7642 = vrsqrt.f32 %v2988_v52 }
0x1c93   :  { %v7641_v38 = vpop.eup %7640 }
0x1c94   :  { %v2991_v39 = vmul.f32 %v7641_v38, %v2975_v44 }
0x1c96   :  { %v2999_v45 = vmul.f32 %v6043_v37, %v2991_v39 }
0x1c97   :  { %v7643_v41 = vpop.eup %7642 }
0x1c98   :  { %v2992_v42 = vmul.f32 %v7643_v41, %v2976_v43  ;;  %v3007_v46 = vadd.f32 %v6044_v12, %v2999_v45 }
0x1c9a   :  { %v3000_v48 = vmul.f32 %v6043_v37, %v2992_v42  ;;  %6624 = vmatprep.mubr.msk.f32.mxu1 %vm651_vm1, %v3007_v46 }
0x1c9c   :  { %v3008_v49 = vadd.f32 %v6044_v12, %v3000_v48 }
0x1c9e   :  { %6625 = vmatmul.mubr.msk.f32.vlgmr.msra.gmra.mrb[24].mxu1 %vm651_vm1, %v3008_v49 }
0x1c9f   :  { %7080 = vmatpush3.bf16.msra.mxu1 %v7077_v19 }
0x1ca0   :  { %7082 = vmatprep.subr.bf16.mxu1 %v7081_v15 }
0x1ca3   :  { %7084 = vmatpush3.bf16.msra.mxu1 %v7081_v15 }
0x1d71   :  { %v6626_v56 = vpop.f32.mrb[24].mxu1 }
0x1d72   :  { %v3098_v57 = vadd.f32 %v6626_v56, %v6045_v53  ;;  %v3092_v58 = vpop.f32.mrb[25].mxu1 }
0x1d73   :  { %v3093_v59 = vadd.f32 %v6045_v53, %v3092_v58 }
0x1d74   :  { %v3102_v60 = vmax.f32 %v3098_v57, 0.0  ;;  %v9390_v57 = vld [vmem:[#allocation7 + $0x8] sm:$0xff] }
0x1d75   :  { %v3101_v11 = vmax.f32 %v3093_v59, 0.0 }
0x1d77   :  { %6643 = vmatprep.mubr.msk.f32.mxu0 %vm3111_vm5, %v3101_v11 }
0x1d78   :  { %6644 = vmatmul.mubr.msk.f32.vlgmr.msra.gmra.mrb[22].mxu0 %vm3111_vm5, %v3102_v60 }
0x1e4b   :  { %v6645_v61 = vpop.f32.mrb[22].mxu0 }
0x1e4c   :  { %v3194_v63 = vadd.f32 %v6645_v61, %v9330_v2  ;;  %v3184_v7 = vpop.f32.mrb[23].mxu0 }
0x1e4d   :  { %v3193_v0 = vadd.f32 %v3184_v7, %v9332_v3 }
0x1e4e   :  { %v9348_v32 = vadd.f32 %v6050_v4, %v3194_v63 }
0x1e4f   :  { %v9350_v1 = vadd.f32 %v6050_v4, %v3193_v0 }
0x1e50   :  { %v3211_v31 = vsel %vm651_vm1, %v9348_v32, 0.0 }
0x1e51   :  { %3212 = vadd.xlane.f32.xlu1 %v3211_v31  ;;  %v3208_v5 = vsel %vm651_vm1, %v9350_v1, 0.0 }
0x1e52   :  { %3209 = vadd.xlane.f32.xlu0 %v3208_v5 }
0x1ede   :  { %v3213_v6 = vpop.xlane.xlu1 %3212 }
0x1edf   :  { %v3215_v8 = vmul.f32 0.03125, %v3213_v6  ;;  %v3210_v55 = vpop.xlane.xlu0 %3209 }
0x1ee0   :  { %v3214_v9 = vmul.f32 0.03125, %v3210_v55 }
0x1ee1   :  { %v3217_v2 = vsub.f32 %v9348_v32, %v3215_v8 }
0x1ee2   :  { %v3216_v3 = vsub.f32 %v9350_v1, %v3214_v9 }
0x1ee3   :  { %v3219_v10 = vmul.f32 %v3217_v2, %v3217_v2 }
0x1ee4   :  { %v3218_v43 = vmul.f32 %v3216_v3, %v3216_v3 }
0x1ee5   :  { %v3223_v44 = vsel %vm651_vm1, %v3219_v10, 0.0 }
0x1ee6   :  { %3224 = vadd.xlane.f32.xlu1 %v3223_v44  ;;  %v3220_v13 = vsel %vm651_vm1, %v3218_v43, 0.0 }
0x1ee7   :  { %3221 = vadd.xlane.f32.xlu0 %v3220_v13 }
0x1f73   :  { %v3225_v23 = vpop.xlane.xlu1 %3224 }
0x1f74   :  { %v3227_v24 = vmul.f32 0.03125, %v3225_v23  ;;  %v3222_v25 = vpop.xlane.xlu0 %3221 }
0x1f75   :  { %v3226_v26 = vmul.f32 0.03125, %v3222_v25 }
0x1f76   :  { %v3229_v27 = vadd.f32 1e-05, %v3227_v24 }
0x1f77   :  { %v3228_v40 = vadd.f32 1e-05, %v3226_v26 }
0x1f78   :  { %7644 = vrsqrt.f32 %v3229_v27 }
0x1f79   :  { %7646 = vrsqrt.f32 %v3228_v40 }
0x1f82   :  { %v7645_v22 = vpop.eup %7644 }
0x1f83   :  { %v7647_v28 = vpop.eup %7646  ;;  %v3233_v16 = vmul.f32 %v7645_v22, %v3217_v2 }
0x1f84   :  { %v3232_v29 = vmul.f32 %v7647_v28, %v3216_v3 }
0x1f85   :  { %v3241_v33 = vmul.f32 %v6051_v21, %v3233_v16 }
0x1f86   :  { %v3240_v34 = vmul.f32 %v6051_v21, %v3232_v29 }
0x1f87   :  { %v3249_v54 = vadd.f32 %v6052_v30, %v3241_v33 }
0x1f88   :  { %v3248_v35 = vadd.f32 %v6052_v30, %v3240_v34 }
0x1f8a   :  { %6654 = vmatprep.mubr.msk.f32.mxu1 %vm651_vm1, %v3248_v35 }
0x1f8b   :  { %6655 = vmatmul.mubr.msk.f32.vlgmr.msra.gmra.mrb[26].mxu1 %vm651_vm1, %v3249_v54 }
0x205e   :  { %v6656_v52 = vpop.f32.mrb[26].mxu1 }
0x205f   :  { %v9362_v38 = vadd.f32 %v6656_v52, %v6053_v36  ;;  %v3335_v37 = vpop.f32.mrb[27].mxu1 }
0x2060   :  { %v9364_v39 = vadd.f32 %v6053_v36, %v3335_v37 }
0x2062   :  { %6661 = vmatprep.mubr.msk.f32.mxu1 %vm793_vm2, %v9364_v39  ;;  %v9370_v12 = vpack.i.bf16 %v9362_v38, %v9364_v39 }
0x2064   :  { %7459 = vrot.lane.b32.xlu0 %v9370_v12, %s8537_s27 }
0x2068   :  { %7469 = vrot.lane.b32.xlu0 %v9370_v12, %s8536_s12 }
0x206c   :  { %3546 = vrot.lane.b32.xlu0 %v9364_v39, %s8538_s22 }
0x2070   :  { %3548 = vrot.lane.b32.xlu0 %v9362_v38, %s8538_s22 }
0x20d6   :  { %v7460_v45 = vpop.permute.xlu0 %7459 }
0x20d7   :  { %v7462_v41 = vunpack.i.h.bf16 %v7460_v45  ;;  %v7461_v42 = vunpack.i.l.bf16 %v7460_v45 }
0x20d9   :  { %v7085_v46 = vpack.c.bf16 %v7462_v41, %v7461_v42 }
0x20da   :  { %v7470_v9 = vpop.permute.xlu0 %7469 }
0x20db   :  { %7087 = vmatprep.subr.msk.bf16.mxu1 %vm9046_vm3, %v7085_v46  ;;  %v7472_v3 = vunpack.i.h.bf16 %v7470_v9  ;;  %v7471_v10 = vunpack.i.l.bf16 %v7470_v9 }
0x20dc   :  { %7090 = vmatpush3.bf16.xpose.msk.msra.mxu1 %vm9046_vm3, %v7085_v46 }
0x20dd   :  { %v7095_v17 = vpack.c.bf16 %v7472_v3, %v7471_v10 }
0x20de   :  { %v3547_v15 = vpop.permute.xlu0 %3546 }
0x20e2   :  { %v3549_v23 = vpop.permute.xlu0 %3548 }
0x20e3   :  { %6662 = vmatmul.mubr.msk.f32.vlgmr.msra.gmra.mrb[28].mxu1 %vm793_vm2, %v9362_v38 }
0x21b6   :  { %v6663_v48 = vpop.f32.mrb[28].mxu1 }
0x21b7   :  { %v3424_v49 = vpop.f32.mrb[29].mxu1  ;;  %v3434_v50 = vmul.f32 0.35355338, %v6663_v48 }
0x21b8   :  { %v3433_v14 = vmul.f32 0.35355338, %v3424_v49 }
0x21b9   :  { %v3436_v58 = vadd.f32 %v9390_v57, %v3434_v50 }
0x21ba   :  { %v3435_v53 = vadd.f32 %v9386_v51, %v3433_v14 }
0x21bb   :  { %v3440_v59 = vsel %vm553_vm0, %v3436_v58, -inf }
0x21bc   :  { %v3437_v56 = vsel %vm553_vm0, %v3435_v53, -inf }
0x21bd   :  { %3438 = vmax.xlane.f32.xlu1 %v3437_v56 }
0x21c1   :  { %3441 = vmax.xlane.f32.xlu1 %v3440_v59 }
0x224a   :  { %v3439_v11 = vpop.xlane.xlu1 %3438 }
0x224b   :  { %v3443_v60 = vsub.f32 %v3435_v53, %v3439_v11 }
0x224d   :  { %v3445_v63 = vmul.f32 1.442695, %v3443_v60 }
0x224e   :  { %v3442_v61 = vpop.xlane.xlu1 %3441 }
0x224f   :  { %v3444_v4 = vsub.f32 %v3436_v58, %v3442_v61 }
0x2251   :  { %v3447_v7 = vmul.f32 1.442695, %v3444_v4 }
0x2253   :  { %7648 = vpow2.f32 %v3447_v7 }
0x2254   :  { %7650 = vpow2.f32 %v3445_v63 }
0x225d   :  { %v7649_v0 = vpop.eup %7648 }
0x225e   :  { %v3452_v31 = vsel %vm553_vm0, %v7649_v0, 0.0  ;;  %v7651_v5 = vpop.eup %7650 }
0x225f   :  { %3453 = vadd.xlane.f32.xlu1 %v3452_v31  ;;  %v3449_v6 = vsel %vm553_vm0, %v7651_v5, 0.0 }
0x2263   :  { %3450 = vadd.xlane.f32.xlu1 %v3449_v6 }
0x2274   :  { %7464 = vrot.lane.b32.xlu1 %v9370_v12, %s8540_s30 }
0x22ec   :  { %v3454_v8 = vpop.xlane.xlu1 %3453 }
0x22ed   :  { %7652 = vrcp.f32 %v3454_v8 }
0x22f0   :  { %v3451_v55 = vpop.xlane.xlu1 %3450 }
0x22f1   :  { %7654 = vrcp.f32 %v3451_v55 }
0x22f4   :  { %v7465_v2 = vpop.permute.xlu1 %7464 }
0x22f5   :  { %v7467_v43 = vunpack.i.h.bf16 %v7465_v2  ;;  %v7466_v44 = vunpack.i.l.bf16 %v7465_v2 }
0x22f7   :  { %v7091_v13 = vpack.c.bf16 %v7467_v43, %v7466_v44  ;;  %v7653_v18 = vpop.eup %7652 }
0x22f8   :  { %v3458_v20 = vmul.f32 %v7653_v18, %v7649_v0 }
0x22f9   :  { %7092 = vmatprep.subr.bf16.mxu0 %v7091_v13 }
0x22fa   :  { %7094 = vmatpush3.bf16.msra.mxu0 %v7091_v13 }
0x22fb   :  { %v7655_v19 = vpop.eup %7654  ;;  %7097 = vmatprep.subr.msk.bf16.mxu0 %vm9046_vm3, %v7095_v17 }
0x22fc   :  { %v3457_v47 = vmul.f32 %v7655_v19, %v7651_v5 }
0x22fe   :  { %6668 = vmatprep.mubr.msk.f32.mxu0 %vm553_vm0, %v3457_v47 }
0x22ff   :  { %6669 = vmatmul.mubr.msk.f32.vlgmr.msra.gmra.mrb[24].mxu0 %vm553_vm0, %v3458_v20 }
0x2300   :  { %6675 = vmatprep.mubr.msk.f32.mxu0 %vm793_vm2, %v3547_v15 }
0x2303   :  { %7100 = vmatpush3.bf16.xpose.msk.msra.mxu0 %vm9046_vm3, %v7095_v17 }
0x230a   :  { %6676 = vmatmul.mubr.msk.f32.vlgmr.msra.gmra.mrb[26].mxu0 %vm793_vm2, %v3549_v23 }
0x23d2   :  { %v9406_v24 = vpop.f32.mrb[24].mxu0 }
0x23d3   :  { %v9408_v25 = vpop.f32.mrb[25].mxu0 }
0x23dd   :  { %v6677_v26 = vpop.f32.mrb[26].mxu0 }
0x23de   :  { %v3638_v27 = vmul.f32 0.35355338, %v6677_v26  ;;  %v3628_v40 = vpop.f32.mrb[27].mxu0 }
0x23df   :  { %v3637_v22 = vmul.f32 0.35355338, %v3628_v40 }
0x23e0   :  { %v3640_v21 = vadd.f32 %v9390_v57, %v3638_v27 }
0x23e1   :  { %v3639_v28 = vadd.f32 %v9386_v51, %v3637_v22 }
0x23e2   :  { %v3644_v16 = vsel %vm553_vm0, %v3640_v21, -inf }
0x23e3   :  { %3645 = vmax.xlane.f32.xlu0 %v3644_v16  ;;  %v3641_v29 = vsel %vm553_vm0, %v3639_v28, -inf }
0x23e4   :  { %3642 = vmax.xlane.f32.xlu1 %v3641_v29 }
0x23f5   :  { %7474 = vrot.lane.b32.xlu1 %v9370_v12, %s8539_s23 }
0x23f9   :  { %3750 = vrot.lane.b32.xlu1 %v9364_v39, %s8542_s19 }
0x23fd   :  { %3752 = vrot.lane.b32.xlu1 %v9362_v38, %s8542_s19 }
0x2470   :  { %v3646_v30 = vpop.xlane.xlu0 %3645 }
0x2471   :  { %v3648_v33 = vsub.f32 %v3640_v21, %v3646_v30  ;;  %v3643_v34 = vpop.xlane.xlu1 %3642 }
0x2472   :  { %v3647_v35 = vsub.f32 %v3639_v28, %v3643_v34 }
0x2473   :  { %v3651_v54 = vmul.f32 1.442695, %v3648_v33 }
0x2474   :  { %v3649_v36 = vmul.f32 1.442695, %v3647_v35 }
0x2475   :  { %7656 = vpow2.f32 %v3651_v54  ;;  %v7475_v52 = vpop.permute.xlu1 %7474 }
0x2476   :  { %v7477_v37 = vunpack.i.h.bf16 %v7475_v52  ;;  %v7476_v45 = vunpack.i.l.bf16 %v7475_v52  ;;  %7658 = vpow2.f32 %v3649_v36 }
0x2478   :  { %v7101_v41 = vpack.c.bf16 %v7477_v37, %v7476_v45 }
0x2479   :  { %v3751_v63 = vpop.permute.xlu1 %3750 }
0x247a   :  { %7102 = vmatprep.subr.bf16.mxu1 %v7101_v41 }
0x247b   :  { %7104 = vmatpush3.bf16.msra.mxu1 %v7101_v41 }
0x247d   :  { %v3753_v7 = vpop.permute.xlu1 %3752 }
0x247f   :  { %v7657_v42 = vpop.eup %7656 }
0x2480   :  { %v3656_v46 = vsel %vm553_vm0, %v7657_v42, 0.0  ;;  %v7659_v48 = vpop.eup %7658 }
0x2481   :  { %3657 = vadd.xlane.f32.xlu0 %v3656_v46  ;;  %v3653_v49 = vsel %vm553_vm0, %v7659_v48, 0.0 }
0x2485   :  { %3654 = vadd.xlane.f32.xlu0 %v3653_v49 }
0x249b   :  { %7479 = vrot.lane.b32.xlu0 %v9370_v12, %s8541_s17 }
0x250e   :  { %v3658_v50 = vpop.xlane.xlu0 %3657 }
0x250f   :  { %7660 = vrcp.f32 %v3658_v50 }
0x2512   :  { %v3655_v14 = vpop.xlane.xlu0 %3654 }
0x2513   :  { %7662 = vrcp.f32 %v3655_v14 }
0x2516   :  { %v7480_v53 = vpop.permute.xlu0 %7479 }
0x2517   :  { %v7482_v56 = vunpack.i.h.bf16 %v7480_v53  ;;  %v7481_v58 = vunpack.i.l.bf16 %v7480_v53 }
0x2519   :  { %v7105_v59 = vpack.c.bf16 %v7482_v56, %v7481_v58  ;;  %v7661_v11 = vpop.eup %7660 }
0x251a   :  { %v3662_v4 = vmul.f32 %v7661_v11, %v7657_v42 }
0x251b   :  { %7107 = vmatprep.subr.msk.bf16.mxu1 %vm9046_vm3, %v7105_v59 }
0x251d   :  { %v7663_v60 = vpop.eup %7662 }
0x251e   :  { %v3661_v61 = vmul.f32 %v7663_v60, %v7659_v48 }
0x2520   :  { %6682 = vmatprep.mubr.msk.f32.mxu1 %vm553_vm0, %v3661_v61 }
0x2521   :  { %6683 = vmatmul.mubr.msk.f32.vlgmr.msra.gmra.mrb[30].mxu1 %vm553_vm0, %v3662_v4 }
0x2522   :  { %7110 = vmatpush3.bf16.xpose.msk.msra.mxu1 %vm9046_vm3, %v7105_v59  ;;  %6689 = vmatprep.mubr.msk.f32.mxu1 %vm793_vm2, %v3751_v63 }
0x2529   :  { %6690 = vmatmul.mubr.msk.f32.vlgmr.msra.gmra.mrb[32].mxu1 %vm793_vm2, %v3753_v7 }
0x25f4   :  { %v9432_v0 = vpop.f32.mrb[30].mxu1 }
0x25f5   :  { %v9434_v31 = vpop.f32.mrb[31].mxu1 }
0x25fc   :  { %v6691_v5 = vpop.f32.mrb[32].mxu1 }
0x25fd   :  { %v3842_v6 = vmul.f32 0.35355338, %v6691_v5  ;;  %v3832_v8 = vpop.f32.mrb[33].mxu1 }
0x25fe   :  { %v3841_v55 = vmul.f32 0.35355338, %v3832_v8 }
0x25ff   :  { %v3844_v9 = vadd.f32 %v9390_v57, %v3842_v6 }
0x2600   :  { %v3843_v2 = vadd.f32 %v9386_v51, %v3841_v55 }
0x2601   :  { %v3848_v3 = vsel %vm553_vm0, %v3844_v9, -inf }
0x2602   :  { %3849 = vmax.xlane.f32.xlu0 %v3848_v3  ;;  %v3845_v10 = vsel %vm553_vm0, %v3843_v2, -inf  ;;  %v4189_v3 = vld [vmem:[#allocation20 + $0x20] sm:$0xff] }
0x2603   :  { %3846 = vmax.xlane.f32.xlu1 %v3845_v10  ;;  %v4190_v10 = vld [vmem:[#allocation20 + $0x28] sm:$0xff] }
0x2614   :  { %7484 = vrot.lane.b32.xlu1 %v9370_v12, %s8543_s26 }
0x2618   :  { %3954 = vrot.lane.b32.xlu1 %v9364_v39, %s8544_s24 }
0x261c   :  { %3956 = vrot.lane.b32.xlu1 %v9362_v38, %s8544_s24 }
0x268f   :  { %v3850_v43 = vpop.xlane.xlu0 %3849 }
0x2690   :  { %v3852_v44 = vsub.f32 %v3844_v9, %v3850_v43  ;;  %v3847_v13 = vpop.xlane.xlu1 %3846  ;;  %v4191_v43 = vld [vmem:[#allocation20 + $0x30] sm:$0xff] }
0x2691   :  { %v3851_v17 = vsub.f32 %v3843_v2, %v3847_v13  ;;  %v4192_v13 = vld [vmem:[#allocation20 + $0x38] sm:$0xff] }
0x2692   :  { %v3855_v18 = vmul.f32 1.442695, %v3852_v44  ;;  %v7125_v44 = vpack.c.bf16 %v4190_v10, %v4189_v3  ;;  %v6084_v10 = vld [vmem:[#allocation25 + $0x1] ss:$0 sm:$0xff] }
0x2693   :  { %v3853_v19 = vmul.f32 1.442695, %v3851_v17  ;;  %v7129_v17 = vpack.c.bf16 %v4192_v13, %v4191_v43 }
0x2694   :  { %7664 = vpow2.f32 %v3855_v18  ;;  %v7485_v47 = vpop.permute.xlu1 %7484 }
0x2695   :  { %v7487_v20 = vunpack.i.h.bf16 %v7485_v47  ;;  %v7486_v15 = vunpack.i.l.bf16 %v7485_v47  ;;  %7666 = vpow2.f32 %v3853_v19 }
0x2697   :  { %v7111_v23 = vpack.c.bf16 %v7487_v20, %v7486_v15 }
0x2698   :  { %v3955_v54 = vpop.permute.xlu1 %3954 }
0x2699   :  { %7112 = vmatprep.subr.bf16.mxu0 %v7111_v23 }
0x269a   :  { %7114 = vmatpush3.bf16.msra.mxu0 %v7111_v23 }
0x269c   :  { %v3957_v36 = vpop.permute.xlu1 %3956 }
0x269e   :  { %v7665_v26 = vpop.eup %7664 }
0x269f   :  { %v3860_v39 = vsel %vm553_vm0, %v7665_v26, 0.0  ;;  %v7667_v27 = vpop.eup %7666 }
0x26a0   :  { %3861 = vadd.xlane.f32.xlu0 %v3860_v39  ;;  %v3857_v38 = vsel %vm553_vm0, %v7667_v27, 0.0 }
0x26a4   :  { %3858 = vadd.xlane.f32.xlu0 %v3857_v38 }
0x26ba   :  { %7489 = vrot.lane.b32.xlu0 %v9370_v12, %s8545_s1 }
0x272d   :  { %v3862_v40 = vpop.xlane.xlu0 %3861 }
0x272e   :  { %7668 = vrcp.f32 %v3862_v40 }
0x2731   :  { %v3859_v22 = vpop.xlane.xlu0 %3858 }
0x2732   :  { %7670 = vrcp.f32 %v3859_v22 }
0x2735   :  { %v7490_v21 = vpop.permute.xlu0 %7489 }
0x2736   :  { %v7492_v28 = vunpack.i.h.bf16 %v7490_v21  ;;  %v7491_v16 = vunpack.i.l.bf16 %v7490_v21 }
0x2738   :  { %v7115_v29 = vpack.c.bf16 %v7492_v28, %v7491_v16  ;;  %v7669_v30 = vpop.eup %7668  ;;  %v7726_v28 = vld [vmem:[#allocation5] sm:$0xff]  ;;  %v6082_v16 = vld [vmem:[#allocation22 + $0x1] ss:$0 sm:$0xff] }
0x2739   :  { %v3866_v35 = vmul.f32 %v7669_v30, %v7665_v26 }
0x273a   :  { %7117 = vmatprep.subr.msk.bf16.mxu0 %vm9046_vm3, %v7115_v29 }
0x273c   :  { %v7671_v33 = vpop.eup %7670 }
0x273d   :  { %v3865_v34 = vmul.f32 %v7671_v33, %v7667_v27 }
0x273f   :  { %6696 = vmatprep.mubr.msk.f32.mxu0 %vm553_vm0, %v3865_v34 }
0x2740   :  { %6697 = vmatmul.mubr.msk.f32.vlgmr.msra.gmra.mrb[28].mxu0 %vm553_vm0, %v3866_v35 }
0x2741   :  { %7120 = vmatpush3.bf16.xpose.msk.msra.mxu0 %vm9046_vm3, %v7115_v29  ;;  %6703 = vmatprep.mubr.msk.f32.mxu0 %vm793_vm2, %v3955_v54 }
0x2748   :  { %6704 = vmatmul.mubr.msk.f32.vlgmr.msra.gmra.mrb[30].mxu0 %vm793_vm2, %v3957_v36  ;;  %v4427_v36 = vld [vmem:[#allocation29 + $0x20] sm:$0xff] }
0x2813   :  { %v6698_v52 = vpop.f32.mrb[28].mxu0 }
0x2814   :  { %v3945_v37 = vpop.f32.mrb[29].mxu0 }
0x281b   :  { %v6705_v45 = vpop.f32.mrb[30].mxu0 }
0x281c   :  { %v4046_v41 = vmul.f32 0.35355338, %v6705_v45  ;;  %v4036_v42 = vpop.f32.mrb[31].mxu0 }
0x281d   :  { %v4045_v46 = vmul.f32 0.35355338, %v4036_v42 }
0x281e   :  { %v4048_v48 = vadd.f32 %v9390_v57, %v4046_v41 }
0x281f   :  { %v4047_v49 = vadd.f32 %v9386_v51, %v4045_v46 }
0x2820   :  { %v4052_v50 = vsel %vm553_vm0, %v4048_v48, -inf }
0x2821   :  { %4053 = vmax.xlane.f32.xlu0 %v4052_v50  ;;  %v4049_v14 = vsel %vm553_vm0, %v4047_v49, -inf }
0x2822   :  { %4050 = vmax.xlane.f32.xlu1 %v4049_v14 }
0x2833   :  { %7494 = vrot.lane.b32.xlu1 %v9370_v12, %s8546_s6 }
0x2837   :  { %4162 = vrot.lane.b32.xlu1 %v9432_v0, %s8504_s7 }
0x283b   :  { %4168 = vrot.lane.b32.xlu1 %v3945_v37, %s8507_s28 }
0x283f   :  { %4170 = vrot.lane.b32.xlu1 %v6698_v52, %s8507_s28  ;;  %v4428_v52 = vld [vmem:[#allocation29 + $0x28] sm:$0xff] }
0x2840   :  { %v7141_v37 = vpack.c.bf16 %v4428_v52, %v4427_v36 }
0x28ae   :  { %v4054_v53 = vpop.xlane.xlu0 %4053 }
0x28af   :  { %v4056_v57 = vsub.f32 %v4048_v48, %v4054_v53  ;;  %v4051_v56 = vpop.xlane.xlu1 %4050  ;;  %v4429_v53 = vld [vmem:[#allocation29 + $0x30] sm:$0xff] }
0x28b0   :  { %v4055_v51 = vsub.f32 %v4047_v49, %v4051_v56 }
0x28b1   :  { %v4059_v58 = vmul.f32 1.442695, %v4056_v57  ;;  %v4430_v57 = vld [vmem:[#allocation29 + $0x38] sm:$0xff] }
0x28b2   :  { %v4057_v59 = vmul.f32 1.442695, %v4055_v51  ;;  %v7145_v56 = vpack.c.bf16 %v4430_v57, %v4429_v53  ;;  %v7727_v51 = vld [vmem:[#allocation5 + $0x8] sm:$0xff] }
0x28b3   :  { %v7495_v11 = vpop.permute.xlu1 %7494 }
0x28b4   :  { %7672 = vpow2.f32 %v4057_v59  ;;  %v7497_v60 = vunpack.i.h.bf16 %v7495_v11  ;;  %v7496_v61 = vunpack.i.l.bf16 %v7495_v11  ;;  %v7729_v59 = vld [vmem:[#allocation5 + $0x18] sm:$0xff]  ;;  %v4333_v11 = vld [vmem:[#allocation26 + $0x20] sm:$0xff] }
0x28b5   :  { %7674 = vpow2.f32 %v4059_v58  ;;  %v7728_v58 = vld [vmem:[#allocation5 + $0x10] sm:$0xff] }
0x28b6   :  { %v7121_v4 = vpack.c.bf16 %v7497_v60, %v7496_v61  ;;  %v4334_v60 = vld [vmem:[#allocation26 + $0x28] sm:$0xff] }
0x28b7   :  { %v4163_v19 = vpop.permute.xlu1 %4162  ;;  %v7133_v61 = vpack.c.bf16 %v4334_v60, %v4333_v11 }
0x28b8   :  { %7122 = vmatprep.subr.bf16.mxu1 %v7121_v4  ;;  %v4183_v39 = vsel %vm793_vm2, %v9406_v24, %v4163_v19  ;;  %v6088_v19 = vld [vmem:[#allocation31 + $0x1] ss:$0 sm:$0xff] }
0x28b9   :  { %7124 = vmatpush3.bf16.msra.mxu1 %v7121_v4  ;;  %7134 = vmatprep.subr.bf16.mxu0 %v7133_v61  ;;  %v4335_v4 = vld [vmem:[#allocation26 + $0x30] sm:$0xff] }
0x28ba   :  { %7126 = vmatprep.subr.bf16.mxu1 %v7125_v44  ;;  %7136 = vmatpush3.bf16.msra.mxu0 %v7133_v61 }
0x28bb   :  { %v4169_v47 = vpop.permute.xlu1 %4168 }
0x28be   :  { %v7673_v12 = vpop.eup %7672 }
0x28bf   :  { %v4061_v63 = vsel %vm553_vm0, %v7673_v12, 0.0  ;;  %v7675_v7 = vpop.eup %7674  ;;  %v4171_v15 = vpop.permute.xlu1 %4170 }
0x28c0   :  { %4062 = vadd.xlane.f32.xlu0 %v4061_v63  ;;  %v4064_v0 = vsel %vm553_vm0, %v7675_v7, 0.0  ;;  %v4185_v40 = vsel %vm553_vm0, %v4183_v39, %v4171_v15 }
0x28c4   :  { %4065 = vadd.xlane.f32.xlu0 %v4064_v0 }
0x28da   :  { %4160 = vrot.lane.b32.xlu0 %v9434_v31, %s8504_s7 }
0x294d   :  { %v4063_v5 = vpop.xlane.xlu0 %4062 }
0x294e   :  { %7676 = vrcp.f32 %v4063_v5 }
0x2951   :  { %v4066_v6 = vpop.xlane.xlu0 %4065 }
0x2952   :  { %7678 = vrcp.f32 %v4066_v6 }
0x2955   :  { %v4161_v20 = vpop.permute.xlu0 %4160 }
0x2956   :  { %v4182_v23 = vsel %vm793_vm2, %v9408_v25, %v4161_v20 }
0x2957   :  { %v4184_v27 = vsel %vm553_vm0, %v4182_v23, %v4169_v47 }
0x2958   :  { %v7677_v8 = vpop.eup %7676 }
0x2959   :  { %v4069_v55 = vmul.f32 %v7677_v8, %v7673_v12  ;;  %v4336_v12 = vld [vmem:[#allocation26 + $0x38] sm:$0xff] }
0x295a   :  { %v7137_v63 = vpack.c.bf16 %v4336_v12, %v4335_v4 }
0x295b   :  { %6710 = vmatprep.mubr.msk.f32.mxu1 %vm553_vm0, %v4069_v55 }
0x295c   :  { %v7679_v9 = vpop.eup %7678  ;;  %7138 = vmatprep.subr.bf16.mxu0 %v7137_v63 }
0x295d   :  { %v4070_v2 = vmul.f32 %v7679_v9, %v7675_v7  ;;  %7140 = vmatpush3.bf16.msra.mxu0 %v7137_v63 }
0x295f   :  { %6711 = vmatmul.mubr.msk.f32.vlgmr.msra.gmra.mrb[34].mxu1 %vm553_vm0, %v4070_v2  ;;  %v6083_v2 = vld [vmem:[#allocation23 + $0x1] ss:$0 sm:$0xff] }
0x2960   :  { %7128 = vmatpush3.bf16.msra.mxu1 %v7125_v44 }
0x2961   :  { %7130 = vmatprep.subr.bf16.mxu1 %v7129_v17 }
0x2964   :  { %7132 = vmatpush3.bf16.msra.mxu1 %v7129_v17 }
0x2965   :  { %7142 = vmatprep.subr.bf16.mxu1 %v7141_v37 }
0x2a32   :  { %v6712_v31 = vpop.f32.mrb[34].mxu1 }
0x2a33   :  { %4178 = vrot.lane.b32.xlu1 %v6712_v31, %s8547_s10  ;;  %v4149_v18 = vpop.f32.mrb[35].mxu1 }
0x2a34   :  { %4176 = vrot.lane.b32.xlu0 %v4149_v18, %s8547_s10 }
0x2aa5   :  { %v4179_v26 = vpop.permute.xlu1 %4178 }
0x2aa6   :  { %v4177_v38 = vpop.permute.xlu0 %4176  ;;  %v4187_v21 = vsel %vm1630_vm4, %v4185_v40, %v4179_v26 }
0x2aa7   :  { %v4186_v22 = vsel %vm1630_vm4, %v4184_v27, %v4177_v38 }
0x2aa8   :  { %6721 = vmatprep.mubr.msk.f32.mxu1 %vm651_vm1, %v4186_v22 }
0x2aa9   :  { %6722 = vmatmul.mubr.msk.f32.vlgmr.msra.gmra.mrb[36].mxu1 %vm651_vm1, %v4187_v21 }
0x2aaa   :  { %6743 = vmatprep.mubr.msk.f32.mxu1 %vm651_vm1, %v7726_v28  ;;  %7144 = vmatpush3.bf16.msra.mxu1 %v7141_v37  ;;  %v9526_v37 = vld [vmem:[#allocation8 + $0x8] sm:$0xff] }
0x2aab   :  { %7146 = vmatprep.subr.bf16.mxu1 %v7145_v56 }
0x2aae   :  { %7148 = vmatpush3.bf16.msra.mxu1 %v7145_v56 }
0x2ab1   :  { %6744 = vmatmul.mubr.msk.f32.vlgmr.msra.gmra.mrb[38].mxu1 %vm651_vm1, %v7727_v51 }
0x2ab2   :  { %6746 = vmatprep.mubr.msk.f32.mxu1 %vm651_vm1, %v7728_v58 }
0x2ab5   :  { %6747 = vmatmul.mubr.msk.f32.gmra.mrb[40].mxu1 %vm651_vm1, %v7729_v59 }
0x2b7c   :  { %v6723_v25 = vpop.f32.mrb[36].mxu1 }
0x2b7d   :  { %v4275_v24 = vadd.f32 %v6723_v25, %v9348_v32  ;;  %v4265_v29 = vpop.f32.mrb[37].mxu1  ;;  %v6085_v25 = vld [vmem:[#allocation28 + $0x1] ss:$0 sm:$0xff] }
0x2b7e   :  { %v4274_v30 = vadd.f32 %v4265_v29, %v9350_v1 }
0x2b7f   :  { %v9489_v33 = vadd.f32 %v6082_v16, %v4275_v24 }
0x2b80   :  { %v9491_v34 = vadd.f32 %v6082_v16, %v4274_v30 }
0x2b81   :  { %v4293_v35 = vsel %vm651_vm1, %v9489_v33, 0.0 }
0x2b82   :  { %4294 = vadd.xlane.f32.xlu1 %v4293_v35  ;;  %v4290_v54 = vsel %vm651_vm1, %v9491_v34, 0.0 }
0x2b83   :  { %4291 = vadd.xlane.f32.xlu0 %v4290_v54 }
0x2b84   :  { %v6745_v47 = vpop.f32.mrb[38].mxu1 }
0x2b85   :  { %v4511_v20 = vadd.f32 %v6745_v47, %v6088_v19  ;;  %v4505_v15 = vpop.f32.mrb[39].mxu1 }
0x2b86   :  { %v4506_v23 = vadd.f32 %v6088_v19, %v4505_v15 }
0x2b88   :  { %v7149_v26 = vpack.c.bf16 %v4511_v20, %v4506_v23  ;;  %v6748_v39 = vpop.f32.mrb[40].mxu1  ;;  %v9506_v40 = vpack.i.bf16 %v4511_v20, %v4506_v23 }
0x2b89   :  { %v4521_v27 = vadd.f32 %v6748_v39, %v6088_v19  ;;  %v4515_v38 = vpop.f32.mrb[41].mxu1 }
0x2b8a   :  { %7151 = vmatprep.subr.msk.bf16.mxu0 %vm9046_vm3, %v7149_v26  ;;  %v4516_v22 = vadd.f32 %v6088_v19, %v4515_v38 }
0x2b8c   :  { %v7155_v21 = vpack.c.bf16 %v4521_v27, %v4516_v22  ;;  %v9514_v28 = vpack.i.bf16 %v4521_v27, %v4516_v22 }
0x2c0f   :  { %v4295_v32 = vpop.xlane.xlu1 %4294 }
0x2c10   :  { %v4297_v45 = vmul.f32 0.03125, %v4295_v32  ;;  %v4292_v1 = vpop.xlane.xlu0 %4291 }
0x2c11   :  { %v4296_v41 = vmul.f32 0.03125, %v4292_v1 }
0x2c12   :  { %v4299_v42 = vsub.f32 %v9489_v33, %v4297_v45  ;;  %v9529_v45 = vld [vmem:[#allocation8] sm:$0xff] }
0x2c13   :  { %v4298_v46 = vsub.f32 %v9491_v34, %v4296_v41 }
0x2c14   :  { %v4301_v50 = vmul.f32 %v4299_v42, %v4299_v42 }
0x2c15   :  { %v4300_v48 = vmul.f32 %v4298_v46, %v4298_v46 }
0x2c16   :  { %v4305_v14 = vsel %vm651_vm1, %v4301_v50, 0.0 }
0x2c17   :  { %v4302_v49 = vsel %vm651_vm1, %v4300_v48, 0.0 }
0x2c18   :  { %4303 = vadd.xlane.f32.xlu0 %v4302_v49 }
0x2c1c   :  { %4306 = vadd.xlane.f32.xlu0 %v4305_v14 }
0x2ca5   :  { %v4304_v7 = vpop.xlane.xlu0 %4303 }
0x2ca6   :  { %v4308_v0 = vmul.f32 0.03125, %v4304_v7 }
0x2ca8   :  { %v4310_v5 = vadd.f32 1e-05, %v4308_v0 }
0x2ca9   :  { %v4307_v6 = vpop.xlane.xlu0 %4306 }
0x2caa   :  { %7680 = vrsqrt.f32 %v4310_v5  ;;  %v4309_v8 = vmul.f32 0.03125, %v4307_v6 }
0x2cac   :  { %v4311_v55 = vadd.f32 1e-05, %v4309_v8 }
0x2cae   :  { %7682 = vrsqrt.f32 %v4311_v55 }
0x2cb4   :  { %v7681_v9 = vpop.eup %7680 }
0x2cb5   :  { %v4314_v3 = vmul.f32 %v7681_v9, %v4298_v46 }
0x2cb7   :  { %v4322_v43 = vmul.f32 %v6083_v2, %v4314_v3 }
0x2cb8   :  { %v7683_v44 = vpop.eup %7682 }
0x2cb9   :  { %v4315_v13 = vmul.f32 %v7683_v44, %v4299_v42  ;;  %v4330_v17 = vadd.f32 %v6084_v10, %v4322_v43 }
0x2cbb   :  { %v4323_v31 = vmul.f32 %v6083_v2, %v4315_v13  ;;  %6732 = vmatprep.mubr.msk.f32.mxu0 %vm651_vm1, %v4330_v17 }
0x2cbd   :  { %v4331_v18 = vadd.f32 %v6084_v10, %v4323_v31 }
0x2cbf   :  { %6733 = vmatmul.mubr.msk.f32.vlgmr.msra.gmra.mrb[32].mxu0 %vm651_vm1, %v4331_v18 }
0x2cc0   :  { %7154 = vmatpush3.bf16.xpose.msk.msra.mxu0 %vm9046_vm3, %v7149_v26 }
0x2cc1   :  { %7157 = vmatprep.subr.msk.bf16.mxu0 %vm9046_vm3, %v7155_v21 }
0x2cc8   :  { %7160 = vmatpush3.bf16.xpose.msk.msra.mxu0 %vm9046_vm3, %v7155_v21 }
0x2d92   :  { %v6734_v16 = vpop.f32.mrb[32].mxu0 }
0x2d93   :  { %v4417_v24 = vpop.f32.mrb[33].mxu0  ;;  %v9520_v30 = vadd.f32 %v6734_v16, %v6085_v25 }
0x2d94   :  { %v9518_v29 = vadd.f32 %v6085_v25, %v4417_v24 }
0x2d96   :  { %6757 = vmatprep.mubr.msk.f32.mxu0 %vm793_vm2, %v9518_v29 }
0x2d97   :  { %6758 = vmatmul.mubr.msk.f32.vlgmr.msra.gmra.mrb[34].mxu0 %vm793_vm2, %v9520_v30 }
0x2e6a   :  { %v6759_v35 = vpop.f32.mrb[34].mxu0 }
0x2e6b   :  { %v4618_v54 = vmul.f32 0.35355338, %v6759_v35  ;;  %v4608_v36 = vpop.f32.mrb[35].mxu0 }
0x2e6c   :  { %v4617_v52 = vmul.f32 0.35355338, %v4608_v36 }
0x2e6d   :  { %v4620_v32 = vadd.f32 %v9526_v37, %v4618_v54 }
0x2e6e   :  { %v4619_v1 = vadd.f32 %v9529_v45, %v4617_v52 }
0x2e6f   :  { %v4624_v41 = vsel %vm651_vm1, %v4620_v32, -inf }
0x2e70   :  { %4625 = vmax.xlane.f32.xlu1 %v4624_v41  ;;  %v4621_v42 = vsel %vm651_vm1, %v4619_v1, -inf }
0x2e71   :  { %4622 = vmax.xlane.f32.xlu0 %v4621_v42 }
0x2efd   :  { %v4626_v46 = vpop.xlane.xlu1 %4625 }
0x2efe   :  { %v4628_v48 = vsub.f32 %v4620_v32, %v4626_v46  ;;  %v4623_v49 = vpop.xlane.xlu0 %4622 }
0x2eff   :  { %v4627_v50 = vsub.f32 %v4619_v1, %v4623_v49 }
0x2f00   :  { %v4631_v14 = vmul.f32 1.442695, %v4628_v48 }
0x2f01   :  { %v4629_v53 = vmul.f32 1.442695, %v4627_v50 }
0x2f02   :  { %7684 = vpow2.f32 %v4631_v14 }
0x2f03   :  { %7686 = vpow2.f32 %v4629_v53 }
0x2f0c   :  { %v7685_v57 = vpop.eup %7684 }
0x2f0d   :  { %v7687_v56 = vpop.eup %7686  ;;  %v4636_v51 = vsel %vm651_vm1, %v7685_v57, 0.0 }
0x2f0e   :  { %4637 = vadd.xlane.f32.xlu1 %v4636_v51  ;;  %v4633_v58 = vsel %vm651_vm1, %v7687_v56, 0.0 }
0x2f0f   :  { %4634 = vadd.xlane.f32.xlu0 %v4633_v58 }
0x2f1f   :  { %7504 = vrot.lane.b32.xlu1 %v9514_v28, %s8537_s27 }
0x2f23   :  { %7509 = vrot.lane.b32.xlu1 %v9506_v40, %s8538_s22 }
0x2f25   :  { %7499 = vrot.lane.b32.xlu0 %v9506_v40, %s8537_s27 }
0x2f27   :  { %7514 = vrot.lane.b32.xlu1 %v9514_v28, %s8538_s22 }
0x2f29   :  { %4736 = vrot.lane.b32.xlu0 %v9518_v29, %s8538_s22 }
0x2f2b   :  { %4738 = vrot.lane.b32.xlu1 %v9520_v30, %s8538_s22 }
0x2f9b   :  { %v4638_v59 = vpop.xlane.xlu1 %4637 }
0x2f9c   :  { %v4635_v11 = vpop.xlane.xlu0 %4634 }
0x2f9d   :  { %7688 = vrcp.f32 %v4635_v11 }
0x2f9e   :  { %7690 = vrcp.f32 %v4638_v59 }
0x2f9f   :  { %v7505_v60 = vpop.permute.xlu1 %7504 }
0x2fa0   :  { %v7500_v61 = vpop.permute.xlu0 %7499  ;;  %v7507_v4 = vunpack.i.h.bf16 %v7505_v60  ;;  %v7506_v12 = vunpack.i.l.bf16 %v7505_v60 }
0x2fa1   :  { %v7502_v63 = vunpack.i.h.bf16 %v7500_v61  ;;  %v7501_v7 = vunpack.i.l.bf16 %v7500_v61 }
0x2fa2   :  { %v7165_v6 = vpack.c.bf16 %v7507_v4, %v7506_v12 }
0x2fa3   :  { %v7161_v0 = vpack.c.bf16 %v7502_v63, %v7501_v7  ;;  %v7510_v5 = vpop.permute.xlu1 %7509 }
0x2fa4   :  { %v7512_v8 = vunpack.i.h.bf16 %v7510_v5  ;;  %v7511_v55 = vunpack.i.l.bf16 %v7510_v5  ;;  %v4737_v13 = vpop.permute.xlu0 %4736 }
0x2fa5   :  { %7162 = vmatprep.subr.bf16.mxu1 %v7161_v0 }
0x2fa6   :  { %7164 = vmatpush3.bf16.msra.mxu1 %v7161_v0  ;;  %v7169_v10 = vpack.c.bf16 %v7512_v8, %v7511_v55 }
0x2fa7   :  { %v7689_v9 = vpop.eup %7688  ;;  %7166 = vmatprep.subr.bf16.mxu1 %v7165_v6  ;;  %v7515_v44 = vpop.permute.xlu1 %7514 }
0x2fa8   :  { %v7691_v2 = vpop.eup %7690  ;;  %v4641_v3 = vmul.f32 %v7689_v9, %v7687_v56  ;;  %v7517_v17 = vunpack.i.h.bf16 %v7515_v44  ;;  %v7516_v31 = vunpack.i.l.bf16 %v7515_v44 }
0x2fa9   :  { %v4642_v43 = vmul.f32 %v7691_v2, %v7685_v57 }
0x2faa   :  { %7168 = vmatpush3.bf16.msra.mxu1 %v7165_v6  ;;  %6768 = vmatprep.mubr.msk.f32.mxu1 %vm651_vm1, %v4641_v3  ;;  %v7175_v18 = vpack.c.bf16 %v7517_v17, %v7516_v31 }
0x2fab   :  { %7171 = vmatprep.subr.msk.bf16.mxu1 %vm9046_vm3, %v7169_v10  ;;  %v4739_v19 = vpop.permute.xlu1 %4738 }
0x2fad   :  { %6769 = vmatmul.mubr.msk.f32.vlgmr.msra.gmra.mrb[42].mxu1 %vm651_vm1, %v4642_v43 }
0x2fae   :  { %6779 = vmatprep.mubr.msk.f32.mxu1 %vm793_vm2, %v4737_v13 }
0x2fb3   :  { %7174 = vmatpush3.bf16.xpose.msk.msra.mxu1 %vm9046_vm3, %v7169_v10 }
0x2fb4   :  { %7177 = vmatprep.subr.msk.bf16.mxu1 %vm9046_vm3, %v7175_v18 }
0x2fbb   :  { %7180 = vmatpush3.bf16.xpose.msk.msra.mxu1 %vm9046_vm3, %v7175_v18 }
0x2fc2   :  { %6780 = vmatmul.mubr.msk.f32.vlgmr.msra.gmra.mrb[44].mxu1 %vm793_vm2, %v4739_v19 }
0x3080   :  { %v9560_v47 = vpop.f32.mrb[42].mxu1 }
0x3081   :  { %v9562_v20 = vpop.f32.mrb[43].mxu1 }
0x3095   :  { %v6781_v15 = vpop.f32.mrb[44].mxu1 }
0x3096   :  { %v4836_v23 = vmul.f32 0.35355338, %v6781_v15  ;;  %v4826_v26 = vpop.f32.mrb[45].mxu1 }
0x3097   :  { %v4835_v39 = vmul.f32 0.35355338, %v4826_v26 }
0x3098   :  { %v4838_v27 = vadd.f32 %v9526_v37, %v4836_v23 }
0x3099   :  { %v4837_v38 = vadd.f32 %v9529_v45, %v4835_v39 }
0x309a   :  { %v4842_v22 = vsel %vm651_vm1, %v4838_v27, -inf }
0x309b   :  { %4843 = vmax.xlane.f32.xlu1 %v4842_v22  ;;  %v4839_v21 = vsel %vm651_vm1, %v4837_v38, -inf }
0x309c   :  { %4840 = vmax.xlane.f32.xlu0 %v4839_v21 }
0x30ac   :  { %7524 = vrot.lane.b32.xlu1 %v9514_v28, %s8536_s12 }
0x30b0   :  { %7529 = vrot.lane.b32.xlu1 %v9506_v40, %s8542_s19 }
0x30b4   :  { %7534 = vrot.lane.b32.xlu1 %v9514_v28, %s8542_s19 }
0x30b8   :  { %4956 = vrot.lane.b32.xlu1 %v9520_v30, %s8542_s19 }
0x3128   :  { %v4844_v25 = vpop.xlane.xlu1 %4843 }
0x3129   :  { %v4846_v16 = vsub.f32 %v4838_v27, %v4844_v25  ;;  %v4841_v24 = vpop.xlane.xlu0 %4840 }
0x312a   :  { %v4845_v35 = vsub.f32 %v4837_v38, %v4841_v24 }
0x312b   :  { %v4849_v54 = vmul.f32 1.442695, %v4846_v16 }
0x312c   :  { %v4847_v36 = vmul.f32 1.442695, %v4845_v35  ;;  %v7525_v46 = vpop.permute.xlu1 %7524 }
0x312d   :  { %7692 = vpow2.f32 %v4849_v54  ;;  %v7527_v50 = vunpack.i.h.bf16 %v7525_v46  ;;  %v7526_v14 = vunpack.i.l.bf16 %v7525_v46 }
0x312e   :  { %7694 = vpow2.f32 %v4847_v36 }
0x312f   :  { %v7185_v58 = vpack.c.bf16 %v7527_v50, %v7526_v14 }
0x3130   :  { %v7530_v56 = vpop.permute.xlu1 %7529 }
0x3131   :  { %v7532_v59 = vunpack.i.h.bf16 %v7530_v56  ;;  %v7531_v11 = vunpack.i.l.bf16 %v7530_v56 }
0x3133   :  { %v7189_v12 = vpack.c.bf16 %v7532_v59, %v7531_v11 }
0x3134   :  { %v7535_v63 = vpop.permute.xlu1 %7534 }
0x3135   :  { %v7537_v5 = vunpack.i.h.bf16 %v7535_v63  ;;  %v7536_v6 = vunpack.i.l.bf16 %v7535_v63 }
0x3137   :  { %v7693_v52 = vpop.eup %7692  ;;  %v7195_v8 = vpack.c.bf16 %v7537_v5, %v7536_v6 }
0x3138   :  { %v4854_v32 = vsel %vm651_vm1, %v7693_v52, 0.0  ;;  %v7695_v1 = vpop.eup %7694  ;;  %v4957_v55 = vpop.permute.xlu1 %4956 }
0x3139   :  { %4855 = vadd.xlane.f32.xlu0 %v4854_v32  ;;  %v4851_v41 = vsel %vm651_vm1, %v7695_v1, 0.0 }
0x313d   :  { %4852 = vadd.xlane.f32.xlu0 %v4851_v41 }
0x3153   :  { %7519 = vrot.lane.b32.xlu0 %v9506_v40, %s8536_s12 }
0x3157   :  { %4954 = vrot.lane.b32.xlu0 %v9518_v29, %s8542_s19 }
0x31c6   :  { %v4856_v42 = vpop.xlane.xlu0 %4855 }
0x31ca   :  { %v4853_v48 = vpop.xlane.xlu0 %4852 }
0x31cb   :  { %7696 = vrcp.f32 %v4853_v48 }
0x31cc   :  { %7698 = vrcp.f32 %v4856_v42 }
0x31ce   :  { %v7520_v49 = vpop.permute.xlu0 %7519 }
0x31cf   :  { %v7522_v53 = vunpack.i.h.bf16 %v7520_v49  ;;  %v7521_v57 = vunpack.i.l.bf16 %v7520_v49 }
0x31d1   :  { %v7181_v51 = vpack.c.bf16 %v7522_v53, %v7521_v57 }
0x31d2   :  { %v4955_v0 = vpop.permute.xlu0 %4954 }
0x31d3   :  { %7182 = vmatprep.subr.bf16.mxu0 %v7181_v51 }
0x31d4   :  { %7184 = vmatpush3.bf16.msra.mxu0 %v7181_v51 }
0x31d5   :  { %v7697_v60 = vpop.eup %7696  ;;  %7186 = vmatprep.subr.bf16.mxu0 %v7185_v58 }
0x31d6   :  { %v7699_v61 = vpop.eup %7698  ;;  %v4859_v4 = vmul.f32 %v7697_v60, %v7695_v1 }
0x31d7   :  { %v4860_v7 = vmul.f32 %v7699_v61, %v7693_v52 }
0x31d8   :  { %7188 = vmatpush3.bf16.msra.mxu0 %v7185_v58  ;;  %6790 = vmatprep.mubr.msk.f32.mxu0 %vm651_vm1, %v4859_v4 }
0x31d9   :  { %7191 = vmatprep.subr.msk.bf16.mxu0 %vm9046_vm3, %v7189_v12 }
0x31db   :  { %6791 = vmatmul.mubr.msk.f32.vlgmr.msra.gmra.mrb[36].mxu0 %vm651_vm1, %v4860_v7 }
0x31dc   :  { %6801 = vmatprep.mubr.msk.f32.mxu0 %vm793_vm2, %v4955_v0 }
0x31e1   :  { %7194 = vmatpush3.bf16.xpose.msk.msra.mxu0 %vm9046_vm3, %v7189_v12 }
0x31e2   :  { %7197 = vmatprep.subr.msk.bf16.mxu0 %vm9046_vm3, %v7195_v8 }
0x31e9   :  { %7200 = vmatpush3.bf16.xpose.msk.msra.mxu0 %vm9046_vm3, %v7195_v8 }
0x31f0   :  { %6802 = vmatmul.mubr.msk.f32.vlgmr.msra.gmra.mrb[38].mxu0 %vm793_vm2, %v4957_v55 }
0x32ae   :  { %v9594_v9 = vpop.f32.mrb[36].mxu0 }
0x32af   :  { %v9596_v2 = vpop.f32.mrb[37].mxu0 }
0x32c3   :  { %v6803_v3 = vpop.f32.mrb[38].mxu0 }
0x32c4   :  { %v5054_v10 = vmul.f32 0.35355338, %v6803_v3  ;;  %v5044_v43 = vpop.f32.mrb[39].mxu0 }
0x32c5   :  { %v5053_v44 = vmul.f32 0.35355338, %v5044_v43 }
0x32c6   :  { %v5056_v13 = vadd.f32 %v9526_v37, %v5054_v10 }
0x32c7   :  { %v5055_v17 = vadd.f32 %v9529_v45, %v5053_v44 }
0x32c8   :  { %v5060_v31 = vsel %vm651_vm1, %v5056_v13, -inf }
0x32c9   :  { %5061 = vmax.xlane.f32.xlu1 %v5060_v31  ;;  %v5057_v18 = vsel %vm651_vm1, %v5055_v17, -inf }
0x32ca   :  { %5058 = vmax.xlane.f32.xlu0 %v5057_v18 }
0x32da   :  { %7544 = vrot.lane.b32.xlu1 %v9514_v28, %s8541_s17 }
0x32de   :  { %7549 = vrot.lane.b32.xlu1 %v9506_v40, %s8544_s24 }
0x32e2   :  { %7554 = vrot.lane.b32.xlu1 %v9514_v28, %s8544_s24 }
0x32e6   :  { %5174 = vrot.lane.b32.xlu1 %v9520_v30, %s8544_s24 }
0x3356   :  { %v5062_v19 = vpop.xlane.xlu1 %5061 }
0x3357   :  { %v5064_v15 = vsub.f32 %v5056_v13, %v5062_v19  ;;  %v5059_v23 = vpop.xlane.xlu0 %5058 }
0x3358   :  { %v5063_v26 = vsub.f32 %v5055_v17, %v5059_v23 }
0x3359   :  { %v5067_v39 = vmul.f32 1.442695, %v5064_v15 }
0x335a   :  { %v5065_v27 = vmul.f32 1.442695, %v5063_v26  ;;  %v7545_v16 = vpop.permute.xlu1 %7544 }
0x335b   :  { %7700 = vpow2.f32 %v5067_v39  ;;  %v7547_v54 = vunpack.i.h.bf16 %v7545_v16  ;;  %v7546_v36 = vunpack.i.l.bf16 %v7545_v16 }
0x335c   :  { %7702 = vpow2.f32 %v5065_v27 }
0x335d   :  { %v7205_v42 = vpack.c.bf16 %v7547_v54, %v7546_v36 }
0x335e   :  { %v7550_v1 = vpop.permute.xlu1 %7549 }
0x335f   :  { %v7552_v46 = vunpack.i.h.bf16 %v7550_v1  ;;  %v7551_v48 = vunpack.i.l.bf16 %v7550_v1 }
0x3361   :  { %v7209_v14 = vpack.c.bf16 %v7552_v46, %v7551_v48 }
0x3362   :  { %v7555_v53 = vpop.permute.xlu1 %7554 }
0x3363   :  { %v7557_v51 = vunpack.i.h.bf16 %v7555_v53  ;;  %v7556_v58 = vunpack.i.l.bf16 %v7555_v53 }
0x3365   :  { %v7701_v38 = vpop.eup %7700  ;;  %v7215_v59 = vpack.c.bf16 %v7557_v51, %v7556_v58 }
0x3366   :  { %v5072_v22 = vsel %vm651_vm1, %v7701_v38, 0.0  ;;  %v7703_v21 = vpop.eup %7702  ;;  %v5175_v11 = vpop.permute.xlu1 %5174 }
0x3367   :  { %5073 = vadd.xlane.f32.xlu0 %v5072_v22  ;;  %v5069_v25 = vsel %vm651_vm1, %v7703_v21, 0.0 }
0x336b   :  { %5070 = vadd.xlane.f32.xlu0 %v5069_v25  ;;  %v5422_v25 = vld [vmem:[#allocation32 + $0x28] sm:$0xff] }
0x3381   :  { %7539 = vrot.lane.b32.xlu0 %v9506_v40, %s8541_s17 }
0x3385   :  { %5172 = vrot.lane.b32.xlu0 %v9518_v29, %s8544_s24 }
0x33f4   :  { %v5074_v30 = vpop.xlane.xlu0 %5073 }
0x33f8   :  { %v5071_v24 = vpop.xlane.xlu0 %5070 }
0x33f9   :  { %7704 = vrcp.f32 %v5071_v24  ;;  %v5424_v24 = vld [vmem:[#allocation32 + $0x38] sm:$0xff] }
0x33fa   :  { %7706 = vrcp.f32 %v5074_v30  ;;  %v5423_v30 = vld [vmem:[#allocation32 + $0x30] sm:$0xff] }
0x33fc   :  { %v7540_v35 = vpop.permute.xlu0 %7539 }
0x33fd   :  { %v7542_v52 = vunpack.i.h.bf16 %v7540_v35  ;;  %v7541_v32 = vunpack.i.l.bf16 %v7540_v35  ;;  %v7233_v35 = vpack.c.bf16 %v5424_v24, %v5423_v30 }
0x33ff   :  { %v7201_v41 = vpack.c.bf16 %v7542_v52, %v7541_v32 }
0x3400   :  { %v5173_v56 = vpop.permute.xlu0 %5172 }
0x3401   :  { %7202 = vmatprep.subr.bf16.mxu1 %v7201_v41 }
0x3402   :  { %7204 = vmatpush3.bf16.msra.mxu1 %v7201_v41 }
0x3403   :  { %v7705_v49 = vpop.eup %7704  ;;  %7206 = vmatprep.subr.bf16.mxu1 %v7205_v42 }
0x3404   :  { %v7707_v29 = vpop.eup %7706  ;;  %v5077_v50 = vmul.f32 %v7705_v49, %v7703_v21  ;;  %v5421_v21 = vld [vmem:[#allocation32 + $0x20] sm:$0xff] }
0x3405   :  { %v5078_v57 = vmul.f32 %v7707_v29, %v7701_v38  ;;  %v7229_v16 = vpack.c.bf16 %v5422_v25, %v5421_v21 }
0x3406   :  { %7208 = vmatpush3.bf16.msra.mxu1 %v7205_v42  ;;  %6812 = vmatprep.mubr.msk.f32.mxu1 %vm651_vm1, %v5077_v50 }
0x3407   :  { %7211 = vmatprep.subr.msk.bf16.mxu1 %vm9046_vm3, %v7209_v14 }
0x3409   :  { %6813 = vmatmul.mubr.msk.f32.vlgmr.msra.gmra.mrb[46].mxu1 %vm651_vm1, %v5078_v57 }
0x340a   :  { %6823 = vmatprep.mubr.msk.f32.mxu1 %vm793_vm2, %v5173_v56  ;;  %v6127_v56 = vld [vmem:[#allocation34 + $0x1] ss:$0 sm:$0xff] }
0x340f   :  { %7214 = vmatpush3.bf16.xpose.msk.msra.mxu1 %vm9046_vm3, %v7209_v14 }
0x3410   :  { %7217 = vmatprep.subr.msk.bf16.mxu1 %vm9046_vm3, %v7215_v59 }
0x3417   :  { %7220 = vmatpush3.bf16.xpose.msk.msra.mxu1 %vm9046_vm3, %v7215_v59 }
0x341e   :  { %6824 = vmatmul.mubr.msk.f32.vlgmr.msra.gmra.mrb[48].mxu1 %vm793_vm2, %v5175_v11 }
0x34dc   :  { %v6814_v60 = vpop.f32.mrb[46].mxu1 }
0x34dd   :  { %v5163_v61 = vpop.f32.mrb[47].mxu1 }
0x34f1   :  { %v6825_v4 = vpop.f32.mrb[48].mxu1 }
0x34f2   :  { %v5272_v12 = vmul.f32 0.35355338, %v6825_v4  ;;  %v5262_v63 = vpop.f32.mrb[49].mxu1 }
0x34f3   :  { %v5271_v7 = vmul.f32 0.35355338, %v5262_v63 }
0x34f4   :  { %v5274_v0 = vadd.f32 %v9526_v37, %v5272_v12 }
0x34f5   :  { %v5273_v5 = vadd.f32 %v9529_v45, %v5271_v7 }
0x34f6   :  { %v5278_v6 = vsel %vm651_vm1, %v5274_v0, -inf }
0x34f7   :  { %5279 = vmax.xlane.f32.xlu1 %v5278_v6  ;;  %v5275_v8 = vsel %vm651_vm1, %v5273_v5, -inf }
0x34f8   :  { %5276 = vmax.xlane.f32.xlu0 %v5275_v8  ;;  %v5565_v8 = vld [vmem:[#allocation38 + $0x20] sm:$0xff] }
0x3508   :  { %7564 = vrot.lane.b32.xlu1 %v9514_v28, %s8545_s1 }
0x350c   :  { %5392 = vrot.lane.b32.xlu1 %v9596_v2, %s8504_s7 }
0x3510   :  { %5394 = vrot.lane.b32.xlu1 %v9594_v9, %s8504_s7 }
0x3514   :  { %5402 = vrot.lane.b32.xlu1 %v6814_v60, %s8507_s28 }
0x3584   :  { %v5280_v62 = vpop.xlane.xlu1 %5279 }
0x3585   :  { %v5282_v37 = vsub.f32 %v5274_v0, %v5280_v62  ;;  %v5277_v45 = vpop.xlane.xlu0 %5276  ;;  %v5566_v62 = vld [vmem:[#allocation38 + $0x28] sm:$0xff] }
0x3586   :  { %v5281_v55 = vsub.f32 %v5273_v5, %v5277_v45  ;;  %v5567_v45 = vld [vmem:[#allocation38 + $0x30] sm:$0xff] }
0x3587   :  { %v5285_v3 = vmul.f32 1.442695, %v5282_v37  ;;  %v7237_v37 = vpack.c.bf16 %v5566_v62, %v5565_v8  ;;  %v5809_v8 = vld [vmem:[#allocation47 + $0x18] sm:$0xff] }
0x3588   :  { %v5283_v10 = vmul.f32 1.442695, %v5281_v55  ;;  %v7565_v17 = vpop.permute.xlu1 %7564  ;;  %v5568_v55 = vld [vmem:[#allocation38 + $0x38] sm:$0xff] }
0x3589   :  { %7708 = vpow2.f32 %v5285_v3  ;;  %v7567_v18 = vunpack.i.h.bf16 %v7565_v17  ;;  %v7566_v19 = vunpack.i.l.bf16 %v7565_v17  ;;  %7238 = vmatprep.subr.bf16.mxu1 %v7237_v37  ;;  %v7241_v3 = vpack.c.bf16 %v5568_v55, %v5567_v45  ;;  %v5666_v17 = vld [vmem:[#allocation41 + $0x68] sm:$0xff] }
0x358a   :  { %7710 = vpow2.f32 %v5283_v10  ;;  %7240 = vmatpush3.bf16.msra.mxu1 %v7237_v37  ;;  %v5661_v10 = vld [vmem:[#allocation41 + $0x40] sm:$0xff] }
0x358b   :  { %v7225_v39 = vpack.c.bf16 %v7567_v18, %v7566_v19  ;;  %7242 = vmatprep.subr.bf16.mxu1 %v7241_v3 }
0x358c   :  { %v5393_v52 = vpop.permute.xlu1 %5392 }
0x358d   :  { %v5414_v42 = vsel %vm793_vm2, %v9562_v20, %v5393_v52 }
0x358e   :  { %7244 = vmatpush3.bf16.msra.mxu1 %v7241_v3 }
0x3590   :  { %v5395_v32 = vpop.permute.xlu1 %5394 }
0x3591   :  { %v5415_v48 = vsel %vm793_vm2, %v9560_v47, %v5395_v32  ;;  %v6130_v32 = vld [vmem:[#allocation40 + $0x1] ss:$0 sm:$0xff] }
0x3593   :  { %v7709_v43 = vpop.eup %7708 }
0x3594   :  { %v5290_v44 = vsel %vm651_vm1, %v7709_v43, 0.0  ;;  %v7711_v28 = vpop.eup %7710  ;;  %v5403_v1 = vpop.permute.xlu1 %5402 }
0x3595   :  { %5291 = vadd.xlane.f32.xlu0 %v5290_v44  ;;  %v5287_v2 = vsel %vm651_vm1, %v7711_v28, 0.0  ;;  %v5417_v50 = vsel %vm553_vm0, %v5415_v48, %v5403_v1  ;;  %v5663_v44 = vld [vmem:[#allocation41 + $0x50] sm:$0xff] }
0x3599   :  { %5288 = vadd.xlane.f32.xlu0 %v5287_v2  ;;  %v5664_v2 = vld [vmem:[#allocation41 + $0x58] sm:$0xff] }
0x35af   :  { %7559 = vrot.lane.b32.xlu0 %v9506_v40, %s8545_s1 }
0x35b3   :  { %5400 = vrot.lane.b32.xlu0 %v5163_v61, %s8507_s28  ;;  %s8548_s28 = smov [#allocation50]  }
0x35b4   :  { %s5905_s8 = sshll.u32 %s8548_s28, 4  ;;  %s5906_s8 = int_to_ptr.vmem [resolvable:$true] %s5905_s8 }
0x35b5   :  { %s8414_s11 = scalar_lea.vmem %s5906_s8, 256  ;;  %p8419_p11 = scmp.lt.s32.totalorder %s5906_s8, %s5906_s8 }
0x35b6   :  { %p8415_p10 = scmp.ne.s32.totalorder %s5906_s8, %s8414_s11  ;;  %p8420_p12 = scmp.lt.s32.totalorder %s8414_s11, %s8414_s11 }
0x35b8   :  { %p8421_p13 = por %p8420_p12, %p8419_p11 }
0x35ba   :  { %p8422_p0 = pnand %p8421_p13, %p8415_p10 }
0x3622   :  { %v5292_v9 = vpop.xlane.xlu0 %5291 }
0x3626   :  { %v5289_v13 = vpop.xlane.xlu0 %5288 }
0x3627   :  { %7712 = vrcp.f32 %v5289_v13  ;;  %v5665_v13 = vld [vmem:[#allocation41 + $0x60] sm:$0xff] }
0x3628   :  { %7714 = vrcp.f32 %v5292_v9  ;;  %v7249_v9 = vpack.c.bf16 %v5664_v2, %v5663_v44 }
0x362a   :  { %v7560_v31 = vpop.permute.xlu0 %7559 }
0x362b   :  { %v7562_v15 = vunpack.i.h.bf16 %v7560_v31  ;;  %v7561_v23 = vunpack.i.l.bf16 %v7560_v31  ;;  %v7253_v31 = vpack.c.bf16 %v5666_v17, %v5665_v13  ;;  %v6137_v17 = vld [vmem:[#allocation46] ss:$0 sm:$0xff] }
0x362d   :  { %v7221_v26 = vpack.c.bf16 %v7562_v15, %v7561_v23 }
0x362e   :  { %v5401_v41 = vpop.permute.xlu0 %5400 }
0x362f   :  { %7222 = vmatprep.subr.bf16.mxu0 %v7221_v26  ;;  %v5416_v49 = vsel %vm553_vm0, %v5414_v42, %v5401_v41 }
0x3630   :  { %7224 = vmatpush3.bf16.msra.mxu0 %v7221_v26 }
0x3631   :  { %v7713_v27 = vpop.eup %7712  ;;  %7226 = vmatprep.subr.bf16.mxu0 %v7225_v39 }
0x3632   :  { %v7715_v38 = vpop.eup %7714  ;;  %v5295_v40 = vmul.f32 %v7713_v27, %v7711_v28 }
0x3633   :  { %v5296_v22 = vmul.f32 %v7715_v38, %v7709_v43  ;;  %v5662_v43 = vld [vmem:[#allocation41 + $0x48] sm:$0xff]  ;;  %v6128_v38 = vld [vmem:[#allocation35 + $0x1] ss:$0 sm:$0xff] }
0x3634   :  { %7228 = vmatpush3.bf16.msra.mxu0 %v7225_v39  ;;  %6834 = vmatprep.mubr.msk.f32.mxu0 %vm651_vm1, %v5295_v40  ;;  %v7245_v28 = vpack.c.bf16 %v5662_v43, %v5661_v10 }
0x3635   :  { %7230 = vmatprep.subr.bf16.mxu0 %v7229_v16 }
0x3637   :  { %6835 = vmatmul.mubr.msk.f32.vlgmr.msra.gmra.mrb[40].mxu0 %vm651_vm1, %v5296_v22  ;;  %v6129_v22 = vld [vmem:[#allocation37 + $0x1] ss:$0 sm:$0xff] }
0x3638   :  { %7232 = vmatpush3.bf16.msra.mxu0 %v7229_v16 }
0x3639   :  { %7234 = vmatprep.subr.bf16.mxu0 %v7233_v35 }
0x363c   :  { %7236 = vmatpush3.bf16.msra.mxu0 %v7233_v35 }
0x363d   :  { %7246 = vmatprep.subr.bf16.mxu0 %v7245_v28 }
0x370a   :  { %v6836_v54 = vpop.f32.mrb[40].mxu0 }
0x370b   :  { %5410 = vrot.lane.b32.xlu1 %v6836_v54, %s8547_s10  ;;  %v5381_v36 = vpop.f32.mrb[41].mxu0  ;;  %v5667_v54 = vld [vmem:[#allocation41 + $0x70] sm:$0xff] }
0x370c   :  { %5408 = vrot.lane.b32.xlu0 %v5381_v36, %s8547_s10  ;;  %v5668_v36 = vld [vmem:[#allocation41 + $0x78] sm:$0xff] }
0x370d   :  { %v7257_v52 = vpack.c.bf16 %v5668_v36, %v5667_v54 }
0x377d   :  { %v5411_v46 = vpop.permute.xlu1 %5410 }
0x377e   :  { %v5409_v29 = vpop.permute.xlu0 %5408  ;;  %v5419_v53 = vsel %vm1630_vm4, %v5417_v50, %v5411_v46  ;;  %v6135_v50 = vld [vmem:[#allocation43 + $0x1] ss:$0 sm:$0xff] }
0x377f   :  { %v5418_v14 = vsel %vm1630_vm4, %v5416_v49, %v5409_v29 }
0x3780   :  { %6845 = vmatprep.mubr.msk.f32.mxu0 %vm651_vm1, %v5418_v14 }
0x3781   :  { %6846 = vmatmul.mubr.msk.f32.vlgmr.msra.gmra.mrb[42].mxu0 %vm651_vm1, %v5419_v53 }
0x3782   :  { %7248 = vmatpush3.bf16.msra.mxu0 %v7245_v28  ;;  %v6136_v28 = vld [vmem:[#allocation44] ss:$0 sm:$0xff] }
0x3783   :  { %7250 = vmatprep.subr.bf16.mxu0 %v7249_v9 }
0x3786   :  { %7252 = vmatpush3.bf16.msra.mxu0 %v7249_v9 }
0x3787   :  { %7254 = vmatprep.subr.bf16.mxu0 %v7253_v31 }
0x378a   :  { %7256 = vmatpush3.bf16.msra.mxu0 %v7253_v31 }
0x378b   :  { %7258 = vmatprep.subr.bf16.mxu0 %v7257_v52 }
0x378e   :  { %7260 = vmatpush3.bf16.msra.mxu0 %v7257_v52 }
0x3854   :  { %v6847_v57 = vpop.f32.mrb[42].mxu0 }
0x3855   :  { %v5507_v20 = vadd.f32 %v6847_v57, %v9489_v33  ;;  %v5497_v51 = vpop.f32.mrb[43].mxu0 }
0x3856   :  { %v5506_v47 = vadd.f32 %v5497_v51, %v9491_v34 }
0x3857   :  { %v9660_v58 = vadd.f32 %v6127_v56, %v5507_v20 }
0x3858   :  { %v9662_v59 = vadd.f32 %v6127_v56, %v5506_v47 }
0x3859   :  { %v5525_v11 = vsel %vm651_vm1, %v9660_v58, 0.0 }
0x385a   :  { %5526 = vadd.xlane.f32.xlu1 %v5525_v11  ;;  %v5522_v60 = vsel %vm651_vm1, %v9662_v59, 0.0 }
0x385b   :  { %5523 = vadd.xlane.f32.xlu0 %v5522_v60 }
0x38e7   :  { %v5527_v61 = vpop.xlane.xlu1 %5526 }
0x38e8   :  { %v5529_v4 = vmul.f32 0.03125, %v5527_v61  ;;  %v5524_v12 = vpop.xlane.xlu0 %5523 }
0x38e9   :  { %v5528_v63 = vmul.f32 0.03125, %v5524_v12 }
0x38ea   :  { %v5531_v33 = vsub.f32 %v9660_v58, %v5529_v4 }
0x38eb   :  { %v5530_v34 = vsub.f32 %v9662_v59, %v5528_v63 }
0x38ec   :  { %v5533_v5 = vmul.f32 %v5531_v33, %v5531_v33 }
0x38ed   :  { %v5532_v7 = vmul.f32 %v5530_v34, %v5530_v34 }
0x38ee   :  { %v5537_v6 = vsel %vm651_vm1, %v5533_v5, 0.0 }
0x38ef   :  { %v5534_v0 = vsel %vm651_vm1, %v5532_v7, 0.0  ;;  %v5806_v7 = vld [vmem:[#allocation47] sm:$0xff] }
0x38f0   :  { %5535 = vadd.xlane.f32.xlu0 %v5534_v0  ;;  %v5807_v0 = vld [vmem:[#allocation47 + $0x8] sm:$0xff] }
0x38f1   :  { %v7261_v5 = vpack.c.bf16 %v5807_v0, %v5806_v7 }
0x38f3   :  { %7262 = vmatprep.subr.bf16.mxu1 %v7261_v5 }
0x38f4   :  { %5538 = vadd.xlane.f32.xlu0 %v5537_v6  ;;  %v5808_v6 = vld [vmem:[#allocation47 + $0x10] sm:$0xff] }
0x38f5   :  { %v7265_v62 = vpack.c.bf16 %v5809_v8, %v5808_v6 }
0x397d   :  { %v5536_v18 = vpop.xlane.xlu0 %5535 }
0x397e   :  { %v5540_v19 = vmul.f32 0.03125, %v5536_v18 }
0x3980   :  { %v5542_v15 = vadd.f32 1e-05, %v5540_v19 }
0x3981   :  { %v5539_v23 = vpop.xlane.xlu0 %5538 }
0x3982   :  { %7716 = vrsqrt.f32 %v5542_v15  ;;  %v5541_v26 = vmul.f32 0.03125, %v5539_v23  ;;  %v6138_v23 = vld [vmem:[#allocation49] ss:$0 sm:$0xff] }
0x3984   :  { %v5543_v39 = vadd.f32 1e-05, %v5541_v26 }
0x3986   :  { %7718 = vrsqrt.f32 %v5543_v39 }
0x398c   :  { %v7717_v27 = vpop.eup %7716 }
0x398d   :  { %v5546_v40 = vmul.f32 %v7717_v27, %v5530_v34 }
0x398f   :  { %v5554_v21 = vmul.f32 %v6128_v38, %v5546_v40 }
0x3990   :  { %v7719_v25 = vpop.eup %7718 }
0x3991   :  { %v5547_v30 = vmul.f32 %v7719_v25, %v5531_v33  ;;  %v5562_v16 = vadd.f32 %v6129_v22, %v5554_v21 }
0x3993   :  { %v5555_v24 = vmul.f32 %v6128_v38, %v5547_v30  ;;  %6856 = vmatprep.mubr.msk.f32.mxu1 %vm651_vm1, %v5562_v16 }
0x3995   :  { %v5563_v35 = vadd.f32 %v6129_v22, %v5555_v24 }
0x3997   :  { %6857 = vmatmul.mubr.msk.f32.vlgmr.msra.gmra.mrb[50].mxu1 %vm651_vm1, %v5563_v35 }
0x3998   :  { %7264 = vmatpush3.bf16.msra.mxu1 %v7261_v5 }
0x3999   :  { %7266 = vmatprep.subr.bf16.mxu1 %v7265_v62 }
0x399c   :  { %7268 = vmatpush3.bf16.msra.mxu1 %v7265_v62 }
0x3a6a   :  { %v6858_v1 = vpop.f32.mrb[50].mxu1 }
0x3a6b   :  { %v5655_v41 = vadd.f32 %v6858_v1, %v6130_v32  ;;  %v5649_v42 = vpop.f32.mrb[51].mxu1 }
0x3a6c   :  { %v5650_v46 = vadd.f32 %v6130_v32, %v5649_v42 }
0x3a6d   :  { %v5659_v49 = vmax.f32 %v5655_v41, 0.0 }
0x3a6e   :  { %v5658_v48 = vmax.f32 %v5650_v46, 0.0 }
0x3a70   :  { %6875 = vmatprep.mubr.msk.f32.mxu0 %vm3111_vm5, %v5658_v48 }
0x3a71   :  { %6876 = vmatmul.mubr.msk.f32.vlgmr.msra.gmra.mrb[44].mxu0 %vm3111_vm5, %v5659_v49 }
0x3b44   :  { %v6877_v29 = vpop.f32.mrb[44].mxu0 }
0x3b45   :  { %v5751_v14 = vadd.f32 %v6877_v29, %v9660_v58  ;;  %v5741_v53 = vpop.f32.mrb[45].mxu0 }
0x3b46   :  { %v5750_v57 = vadd.f32 %v5741_v53, %v9662_v59 }
0x3b47   :  { %v5761_v56 = vadd.f32 %v6135_v50, %v5751_v14 }
0x3b48   :  { %v5760_v20 = vadd.f32 %v6135_v50, %v5750_v57 }
0x3b49   :  { %v5767_v51 = vsel %vm651_vm1, %v5761_v56, 0.0 }
0x3b4a   :  { %5768 = vadd.xlane.f32.xlu1 %v5767_v51  ;;  %v5764_v47 = vsel %vm651_vm1, %v5760_v20, 0.0 }
0x3b4b   :  { %5765 = vadd.xlane.f32.xlu0 %v5764_v47 }
0x3bd7   :  { %v5769_v11 = vpop.xlane.xlu1 %5768 }
0x3bd8   :  { %v5771_v60 = vmul.f32 0.03125, %v5769_v11  ;;  %v5766_v61 = vpop.xlane.xlu0 %5765 }
0x3bd9   :  { %v5770_v4 = vmul.f32 0.03125, %v5766_v61 }
0x3bda   :  { %v5773_v12 = vsub.f32 %v5761_v56, %v5771_v60 }
0x3bdb   :  { %v5772_v63 = vsub.f32 %v5760_v20, %v5770_v4 }
0x3bdc   :  { %v5775_v33 = vmul.f32 %v5773_v12, %v5773_v12 }
0x3bdd   :  { %v5774_v34 = vmul.f32 %v5772_v63, %v5772_v63 }
0x3bde   :  { %v5779_v58 = vsel %vm651_vm1, %v5775_v33, 0.0 }
0x3bdf   :  { %5780 = vadd.xlane.f32.xlu1 %v5779_v58  ;;  %v5776_v59 = vsel %vm651_vm1, %v5774_v34, 0.0 }
0x3be0   :  { %5777 = vadd.xlane.f32.xlu0 %v5776_v59 }
0x3c6c   :  { %v5781_v37 = vpop.xlane.xlu1 %5780 }
0x3c6d   :  { %v5783_v45 = vmul.f32 0.03125, %v5781_v37  ;;  %v5778_v55 = vpop.xlane.xlu0 %5777 }
0x3c6e   :  { %v5782_v3 = vmul.f32 0.03125, %v5778_v55 }
0x3c6f   :  { %v5785_v10 = vadd.f32 1e-05, %v5783_v45 }
0x3c70   :  { %v5784_v43 = vadd.f32 1e-05, %v5782_v3 }
0x3c71   :  { %7720 = vrsqrt.f32 %v5785_v10 }
0x3c72   :  { %7722 = vrsqrt.f32 %v5784_v43 }
0x3c7b   :  { %v7721_v44 = vpop.eup %7720 }
0x3c7c   :  { %v7723_v2 = vpop.eup %7722  ;;  %v5789_v9 = vmul.f32 %v7721_v44, %v5773_v12 }
0x3c7d   :  { %v5788_v13 = vmul.f32 %v7723_v2, %v5772_v63 }
0x3c7e   :  { %v5797_v31 = vmul.f32 %v6136_v28, %v5789_v9 }
0x3c7f   :  { %v5796_v18 = vmul.f32 %v6136_v28, %v5788_v13 }
0x3c80   :  { %v5805_v15 = vadd.f32 %v6137_v17, %v5797_v31 }
0x3c81   :  { %v5804_v19 = vadd.f32 %v6137_v17, %v5796_v18 }
0x3c83   :  { %6886 = vmatprep.mubr.msk.f32.mxu1 %vm651_vm1, %v5804_v19 }
0x3c84   :  { %6887 = vmatmul.mubr.msk.f32.vlgmr.msra.gmra.mrb[52].mxu1 %vm651_vm1, %v5805_v15 }
0x3d57   :  { %v6888_v26 = vpop.f32.mrb[52].mxu1 }
0x3d58   :  { %v5895_v39 = vadd.f32 %v6888_v26, %v6138_v23  ;;  %v5889_v27 = vpop.f32.mrb[53].mxu1 }
0x3d59   :  { %v5890_v38 = vadd.f32 %v6138_v23, %v5889_v27 }
0x3d5a   :  { %5899 = vst.msk [vmem:[#allocation50 + $0x8] sm:$0xff] %vm553_vm0, %v5895_v39 }
0x3d5b   :  { %5898 = vst.msk [vmem:[#allocation50] sm:$0xff] %vm553_vm0, %v5890_v38 }
0x3d5c   :  { %8425 = shalt.err (!%p8422_p0)
}
0x3d5d   :  { %s8426_s9 = scalar_lea.hbm %s8712_s5, 256 }
0x3d5e   :  { %p8427_p1 = scmp.ne.s32.totalorder %s8712_s5, %s8426_s9  ;;  %p8430_p2 = scmp.lt.u32.totalorder %s8426_s9, %s8712_s5 }
0x3d60   :  { %p8432_p3 = pnand %p8430_p2, %p8427_p1 }
0x3d62   :  { %8435 = shalt.err (!%p8432_p3)
}
0x3d63   :  { %5911 = dma.vmem_to_hbm [thread:$0]  %s5906_s8, 256, %s8712_s5, [#allocation4], %s8503_s2, %s8503_s2, %s8504_s7  }
0x3d64   :  { %8468 = dma.done.wait [#allocation4], 256  }
0x3d65   :  { %8469 = vsyncadd [#allocation4], 4294967040 }
0x3d66   :  { %5915 = vsyncpa [#allocation3], 1 }
0x3d67   :  { %5916 = vsyncpa [#allocation6], 1 }
0x3d68   :  { %5917 = vsyncpa [#allocation9], 1 }
0x3d69   :  { %5918 = vsyncpa [#allocation12], 1 }
0x3d6a   :  { %5919 = vsyncpa [#allocation15], 1 }
0x3d6b   :  { %5920 = vsyncpa [#allocation18], 1 }
0x3d6c   :  { %5921 = vsyncpa [#allocation21], 1 }
0x3d6d   :  { %5922 = vsyncpa [#allocation24], 1 }
0x3d6e   :  { %5923 = vsyncpa [#allocation27], 1 }
0x3d6f   :  { %5924 = vsyncpa [#allocation30], 1 }
0x3d70   :  { %5925 = vsyncpa [#allocation33], 1 }
0x3d71   :  { %5926 = vsyncpa [#allocation36], 1 }
0x3d72   :  { %5927 = vsyncpa [#allocation39], 1 }
0x3d73   :  { %5928 = vsyncpa [#allocation42], 1 }
0x3d74   :  { %5929 = vsyncpa [#allocation45], 1 }
0x3d75   :  { %5930 = vsyncpa [#allocation48], 1 }
0x3d76   :  { %5931 = vsyncpa [#allocation4], 1 }

</bundles_post_ra>
